<compile_context>
chip_gen: v6e
topology: v6e:2x2x1
jax: 0.10.0
libtpu: 0.0.40
codegen_flags: <defaults>
</compile_context>

<pallas_src>
import numpy as np
import jax
import jax.numpy as jnp
from jax.experimental import pallas as pl
from jax.experimental.pallas import tpu as pltpu

C = 32          # conv channels (fixed by the module)
K1, K2 = 7, 5   # conv kernel sizes
BN_EPS = 1e-5


def _const_spec(shape):
    """Full-array BlockSpec that always maps to block (0, ..., 0)."""
    nd = len(shape)
    return pl.BlockSpec(shape, lambda i, _nd=nd: (0,) * _nd)


def make_topoeeg_kernel(n_names, Bb, Ls):
    n_per = 6   # refs per modality: Xim, w1s, t1, w2s, t2, wc
    pad2 = K2 // 2

    def kernel(*refs):
        ins = refs[: n_names * n_per]
        bcomb_ref = refs[n_names * n_per]
        out_ref = refs[n_names * n_per + 1]
        taps_ref = refs[n_names * n_per + 2]        # shared (Bb, Lmax, K2*C)

        logit = jnp.zeros((Bb, 1), jnp.float32)
        for i in range(n_names):
            X, w1s, t1, w2s, t2, wc = ins[i * n_per:(i + 1) * n_per]
            L = Ls[i]

            # --- Conv1d(1,32,k=7,pad=3) as im2col matmul; BN scale folded
            #     into w1s in the wrapper, only the shift + ReLU remain.
            h1 = jnp.dot(X[...], w1s[...], preferred_element_type=jnp.float32)
            h1 = jnp.maximum(h1 + t1[...], 0.0)                  # (Bb*L, 32)
            h1_3d = h1.reshape(Bb, L, C)

            # --- build conv2 taps (Bb, L, 5*32): tap k holds h1 shifted by
            #     (k - 2) along L.  Halo cells are zeroed unconditionally:
            #     the scratch is shared across modalities with different L,
            #     so a program_id==0 gate would read stale data.
            for k in range(K2):
                lo = max(0, pad2 - k)
                hi = min(L, L + pad2 - k)
                taps_ref[:, lo:hi, k * C:(k + 1) * C] = \
                    h1_3d[:, lo - pad2 + k: hi - pad2 + k, :]
                if lo > 0:      # left halo rows must be zero
                    taps_ref[:, 0:lo, k * C:(k + 1) * C] = \
                        jnp.zeros((Bb, lo, C), jnp.float32)
                if hi < L:      # right halo rows must be zero
                    taps_ref[:, hi:L, k * C:(k + 1) * C] = \
                        jnp.zeros((Bb, L - hi, C), jnp.float32)

            # --- Conv1d(32,32,k=5,pad=2) as ONE K=160 matmul (+shift, ReLU)
            taps = taps_ref[:, 0:L, :].reshape(Bb * L, K2 * C)
            h2 = jnp.dot(taps, w2s[...], preferred_element_type=jnp.float32)
            h2 = jnp.maximum(h2 + t2[...], 0.0)                  # (Bb*L, 32)
            h2_3d = h2.reshape(Bb, L, C)

            # --- collapsed classifier contribution for this modality:
            #     sum_{l,c} h2[b,l,c] * wc[l,c]   (wc already contains
            #     Wf @ W1 permuted to (l, c) order).  Pure VPU mul + lane
            #     reductions; no flatten relayout, no extra matmul.
            prod = h2_3d * wc[...]
            logit = logit + jnp.sum(jnp.sum(prod, axis=-1), axis=-1,
                                    keepdims=True)

        out_ref[...] = 1.0 / (1.0 + jnp.exp(-(logit + bcomb_ref[...])))

    return kernel


def topoeeg_feature_level(x_dict, params, cls_params):
    names = list(x_dict.keys())
    B = x_dict[names[0]].shape[0]
    Ls = [int(x_dict[n].shape[1]) for n in names]
    Lmax = max(Ls)

    # Pad batch to a multiple of 8; pick a batch tile bb that (when possible)
    # gives >= 2 parallel grid steps (both TensorCores on v7x) with up to 128
    # rows per step (better MXU/M occupancy, fewer per-step overheads).
    Bp = ((B + 7) // 8) * 8
    bb = Bp
    if Bp >= 16:
        for cand in (128, 64, 32, 16, 8):
            if Bp % cand == 0 and Bp // cand >= 2:
                bb = cand
                break
    grid = (Bp // bb,)

    # Collapse Linear(total, n_out) -> Linear(n_out, 1) (exact: both linear):
    #   sigmoid((cat @ W1.T + b1) @ Wf.T + bf)
    # = sigmoid(cat @ (Wf @ W1).T + (Wf @ b1 + bf))
    Wc = cls_params['Wf'] @ cls_params['W1']                       # (1, total)
    b_comb = (cls_params['Wf'] @ cls_params['b1']
              + cls_params['bf']).reshape(1, 1).astype(jnp.float32)

    kernel_inputs, in_specs = [], []
    off_t = 0
    for name, L in zip(names, Ls):
        x = x_dict[name].astype(jnp.float32)
        if Bp != B:
            x = jnp.pad(x, ((0, Bp - B), (0, 0)))
        p = params[name]

        # im2col for conv1: Xim[b*L + l, k] = xpad[b, l + k]
        xpad = jnp.pad(x, ((0, 0), (K1 // 2, K1 // 2)))
        Xim = jnp.stack([xpad[:, k:k + L] for k in range(K1)],
                        axis=-1).reshape(Bp * L, K1)

        # conv1 weight with BN scale folded in
        s1 = p['g1'] / jnp.sqrt(p['v1'] + BN_EPS)
        t1 = p['be1'] + s1 * (p['b1'] - p['m1'])
        w1s = jnp.transpose(p['w1'][:, 0, :], (1, 0)) * s1[None, :]   # (7, 32)

        # conv2 weight stacked for the fused K=160 matmul (row = k*C + c_in),
        # BN scale folded in
        s2 = p['g2'] / jnp.sqrt(p['v2'] + BN_EPS)
        t2 = p['be2'] + s2 * (p['b2'] - p['m2'])
        w2s = (jnp.transpose(p['w2'], (2, 1, 0)).reshape(K2 * C, C)
               * s2[None, :])                                         # (160, 32)

        # torch Flatten column index is c*L + l (channel-major); permute the
        # collapsed classifier weight slice into (l, c) layout for the kernel.
        wc = Wc[0, off_t:off_t + C * L].reshape(C, L).T               # (L, 32)
        off_t += C * L

        per = [Xim, w1s, t1.reshape(1, C), w2s, t2.reshape(1, C), wc]
        kernel_inputs += per
        in_specs += ([pl.BlockSpec((bb * L, K1), lambda i: (i, 0))]
                     + [_const_spec(a.shape) for a in per[1:]])

    kernel_inputs.append(b_comb)
    in_specs.append(_const_spec(b_comb.shape))

    kernel = make_topoeeg_kernel(len(names), bb, Ls)
    out = pl.pallas_call(
        kernel,
        out_shape=jax.ShapeDtypeStruct((Bp, 1), jnp.float32),
        grid_spec=pltpu.PrefetchScalarGridSpec(
            num_scalar_prefetch=0,
            grid=grid,
            in_specs=in_specs,
            out_specs=pl.BlockSpec((bb, 1), lambda i: (i, 0)),
            scratch_shapes=[pltpu.VMEM((bb, Lmax, K2 * C), jnp.float32)]),
        compiler_params=pltpu.CompilerParams(
            dimension_semantics=("parallel",),
            vmem_limit_bytes=32 * 1024 * 1024),
    )(*kernel_inputs)
    return out[:B]


def ref_forward(x_dict, params, cls_params):
    """Pure-JAX reference mirroring the PyTorch (NCL) semantics."""
    feats = []
    for name, x in x_dict.items():
        p = params[name]
        B, L = x.shape
        xpad = jnp.pad(x, ((0, 0), (3, 3)))
        h1 = jnp.zeros((B, C, L), jnp.float32)
        for k in range(K1):
            h1 = h1 + p['w1'][None, :, 0, k, None] * xpad[:, None, k:k + L]
        h1 = h1 + p['b1'][None, :, None]
        h1 = (p['g1'][None, :, None] * (h1 - p['m1'][None, :, None])
              / jnp.sqrt(p['v1'][None, :, None] + BN_EPS)
              + p['be1'][None, :, None])
        h1 = jnp.maximum(h1, 0.0)
        h1p = jnp.pad(h1, ((0, 0), (0, 0), (2, 2)))
        h2 = jnp.zeros((B, C, L), jnp.float32)
        for k in range(K2):
            h2 = h2 + jnp.einsum('oc,bcl->bol', p['w2'][:, :, k],
                                 h1p[:, :, k:k + L])
        h2 = h2 + p['b2'][None, :, None]
        h2 = (p['g2'][None, :, None] * (h2 - p['m2'][None, :, None])
              / jnp.sqrt(p['v2'][None, :, None] + BN_EPS)
              + p['be2'][None, :, None])
        h2 = jnp.maximum(h2, 0.0)
        feats.append(h2.reshape(B, C * L))
    cat = jnp.concatenate(feats, axis=1)
    z = cat @ cls_params['W1'].T + cls_params['b1']
    y = 1.0 / (1.0 + jnp.exp(-(z @ cls_params['Wf'].T + cls_params['bf'])))
    return y


if __name__ == "__main__":
    key = jax.random.PRNGKey(0)
    keys = jax.random.split(key, 64)
    _ki = iter(range(64))
    def nxt():
        return keys[next(_ki)]

    B = 4
    n_out = 32                                   # classifier_base_n_out
    input_shapes = {"topo1": (16,), "topo2": (24,)}

    x_dict, params = {}, {}
    for name, (L,) in input_shapes.items():
        x_dict[name] = jax.random.normal(nxt(), (B, L), jnp.float32)
        params[name] = dict(
            w1=0.2 * jax.random.normal(nxt(), (C, 1, K1), jnp.float32),
            b1=0.1 * jax.random.normal(nxt(), (C,), jnp.float32),
            g1=1.0 + 0.1 * jax.random.normal(nxt(), (C,), jnp.float32),
            be1=0.1 * jax.random.normal(nxt(), (C,), jnp.float32),
            m1=0.05 * jax.random.normal(nxt(), (C,), jnp.float32),
            v1=0.5 + jax.random.uniform(nxt(), (C,), jnp.float32),
            w2=0.1 * jax.random.normal(nxt(), (C, C, K2), jnp.float32),
            b2=0.1 * jax.random.normal(nxt(), (C,), jnp.float32),
            g2=1.0 + 0.1 * jax.random.normal(nxt(), (C,), jnp.float32),
            be2=0.1 * jax.random.normal(nxt(), (C,), jnp.float32),
            m2=0.05 * jax.random.normal(nxt(), (C,), jnp.float32),
            v2=0.5 + jax.random.uniform(nxt(), (C,), jnp.float32),
        )

    total_dim = sum(C * L for (L,) in input_shapes.values())
    cls_params = dict(
        W1=0.05 * jax.random.normal(nxt(), (n_out, total_dim), jnp.float32),
        b1=0.05 * jax.random.normal(nxt(), (n_out,), jnp.float32),
        Wf=0.2 * jax.random.normal(nxt(), (1, n_out), jnp.float32),
        bf=0.05 * jax.random.normal(nxt(), (1,), jnp.float32),
    )

    out = topoeeg_feature_level(x_dict, params, cls_params)
    out = jax.block_until_ready(out)
    ref = ref_forward(x_dict, params, cls_params)

    assert out.shape == (B, 1)
    np.testing.assert_allclose(np.asarray(out), np.asarray(ref),
                               rtol=1e-4, atol=1e-5)
    print("KERNEL_OK")
</pallas_src>

<mosaic_0001>
module attributes {stable_mosaic.version = 11 : i64} {
  func.func @kernel(%arg0: i32, %arg1: memref<128x7xf32, #tpu.memory_space<vmem>>, %arg2: memref<7x32xf32, #tpu.memory_space<vmem>>, %arg3: memref<1x32xf32, #tpu.memory_space<vmem>>, %arg4: memref<160x32xf32, #tpu.memory_space<vmem>>, %arg5: memref<1x32xf32, #tpu.memory_space<vmem>>, %arg6: memref<16x32xf32, #tpu.memory_space<vmem>>, %arg7: memref<192x7xf32, #tpu.memory_space<vmem>>, %arg8: memref<7x32xf32, #tpu.memory_space<vmem>>, %arg9: memref<1x32xf32, #tpu.memory_space<vmem>>, %arg10: memref<160x32xf32, #tpu.memory_space<vmem>>, %arg11: memref<1x32xf32, #tpu.memory_space<vmem>>, %arg12: memref<24x32xf32, #tpu.memory_space<vmem>>, %arg13: memref<1x1xf32, #tpu.memory_space<vmem>>, %arg14: memref<8x1xf32, #tpu.memory_space<vmem>>, %arg15: memref<8x24x160xf32, #tpu.memory_space<vmem>>) attributes {dimension_semantics = [#tpu.dimension_semantics<parallel>], iteration_bounds = array<i64: 1>, scalar_prefetch = 0 : i64, scratch_operands = 1 : i64, tpu.core_type = #tpu.core_type<tc>, window_params = [{transform_indices = @transform_0, window_bounds = array<i64: 128, 7>}, {pipeline_mode = #tpu.pipeline_mode<synchronous>, transform_indices = @transform_1, window_bounds = array<i64: 7, 32>}, {pipeline_mode = #tpu.pipeline_mode<synchronous>, transform_indices = @transform_2, window_bounds = array<i64: 1, 32>}, {pipeline_mode = #tpu.pipeline_mode<synchronous>, transform_indices = @transform_3, window_bounds = array<i64: 160, 32>}, {pipeline_mode = #tpu.pipeline_mode<synchronous>, transform_indices = @transform_4, window_bounds = array<i64: 1, 32>}, {pipeline_mode = #tpu.pipeline_mode<synchronous>, transform_indices = @transform_5, window_bounds = array<i64: 16, 32>}, {transform_indices = @transform_6, window_bounds = array<i64: 192, 7>}, {pipeline_mode = #tpu.pipeline_mode<synchronous>, transform_indices = @transform_7, window_bounds = array<i64: 7, 32>}, {pipeline_mode = #tpu.pipeline_mode<synchronous>, transform_indices = @transform_8, window_bounds = array<i64: 1, 32>}, {pipeline_mode = #tpu.pipeline_mode<synchronous>, transform_indices = @transform_9, window_bounds = array<i64: 160, 32>}, {pipeline_mode = #tpu.pipeline_mode<synchronous>, transform_indices = @transform_10, window_bounds = array<i64: 1, 32>}, {pipeline_mode = #tpu.pipeline_mode<synchronous>, transform_indices = @transform_11, window_bounds = array<i64: 24, 32>}, {pipeline_mode = #tpu.pipeline_mode<synchronous>, transform_indices = @transform_12, window_bounds = array<i64: 1, 1>}, {transform_indices = @transform_13, window_bounds = array<i64: 8, 1>}]} {
    %cst = arith.constant 0.000000e+00 : f32
    %0 = vector.broadcast %cst : f32 to vector<8x1xf32>
    %c0 = arith.constant 0 : index
    %c0_0 = arith.constant 0 : index
    %1 = vector.load %arg1[%c0, %c0_0] : memref<128x7xf32, #tpu.memory_space<vmem>>, vector<128x7xf32>
    %c0_1 = arith.constant 0 : index
    %c0_2 = arith.constant 0 : index
    %2 = vector.load %arg2[%c0_1, %c0_2] : memref<7x32xf32, #tpu.memory_space<vmem>>, vector<7x32xf32>
    %cst_3 = arith.constant dense<0.000000e+00> : vector<128x32xf32>
    %3 = tpu.matmul %1, %2, %cst_3 {dimension_numbers = #tpu.dot_dimension_numbers<[1], [0], [0], [1], [0, 0, 1, 1], [], []>} : vector<128x7xf32>, vector<7x32xf32>, vector<128x32xf32> -> vector<128x32xf32>
    %c0_4 = arith.constant 0 : index
    %c0_5 = arith.constant 0 : index
    %4 = vector.load %arg3[%c0_4, %c0_5] : memref<1x32xf32, #tpu.memory_space<vmem>>, vector<1x32xf32>
    %5 = vector.broadcast %4 : vector<1x32xf32> to vector<128x32xf32>
    %6 = arith.addf %3, %5 : vector<128x32xf32>
    %cst_6 = arith.constant 0.000000e+00 : f32
    %7 = vector.broadcast %cst_6 : f32 to vector<128x32xf32>
    %8 = arith.maximumf %6, %7 : vector<128x32xf32>
    %9 = vector.shape_cast %8 : vector<128x32xf32> to vector<8x16x32xf32>
    %10 = vector.extract_strided_slice %9 {offsets = [0, 0, 0], sizes = [8, 14, 32], strides = [1, 1, 1]} : vector<8x16x32xf32> to vector<8x14x32xf32>
    %c0_7 = arith.constant 0 : index
    %c2 = arith.constant 2 : index
    %c0_8 = arith.constant 0 : index
    %11 = vector.load %arg15[%c0_7, %c2, %c0_8] : memref<8x24x160xf32, #tpu.memory_space<vmem>>, vector<8x14x32xf32>
    tpu.vector_store %arg15[%c0_7, %c2, %c0_8], %10 {strides = array<i32>} : memref<8x24x160xf32, #tpu.memory_space<vmem>>, vector<8x14x32xf32>,
    %cst_9 = arith.constant 0.000000e+00 : f32
    %12 = vector.broadcast %cst_9 : f32 to vector<8x2x32xf32>
    %c0_10 = arith.constant 0 : index
    %c0_11 = arith.constant 0 : index
    %c0_12 = arith.constant 0 : index
    %13 = vector.load %arg15[%c0_10, %c0_11, %c0_12] : memref<8x24x160xf32, #tpu.memory_space<vmem>>, vector<8x2x32xf32>
    tpu.vector_store %arg15[%c0_10, %c0_11, %c0_12], %12 {strides = array<i32>} : memref<8x24x160xf32, #tpu.memory_space<vmem>>, vector<8x2x32xf32>,
    %14 = vector.extract_strided_slice %9 {offsets = [0, 0, 0], sizes = [8, 15, 32], strides = [1, 1, 1]} : vector<8x16x32xf32> to vector<8x15x32xf32>
    %c0_13 = arith.constant 0 : index
    %c1 = arith.constant 1 : index
    %c32 = arith.constant 32 : index
    %15 = vector.load %arg15[%c0_13, %c1, %c32] : memref<8x24x160xf32, #tpu.memory_space<vmem>>, vector<8x15x32xf32>
    tpu.vector_store %arg15[%c0_13, %c1, %c32], %14 {strides = array<i32>} : memref<8x24x160xf32, #tpu.memory_space<vmem>>, vector<8x15x32xf32>,
    %cst_14 = arith.constant 0.000000e+00 : f32
    %16 = vector.broadcast %cst_14 : f32 to vector<8x1x32xf32>
    %c0_15 = arith.constant 0 : index
    %c0_16 = arith.constant 0 : index
    %c32_17 = arith.constant 32 : index
    %17 = vector.load %arg15[%c0_15, %c0_16, %c32_17] : memref<8x24x160xf32, #tpu.memory_space<vmem>>, vector<8x1x32xf32>
    tpu.vector_store %arg15[%c0_15, %c0_16, %c32_17], %16 {strides = array<i32>} : memref<8x24x160xf32, #tpu.memory_space<vmem>>, vector<8x1x32xf32>,
    %c0_18 = arith.constant 0 : index
    %c0_19 = arith.constant 0 : index
    %c64 = arith.constant 64 : index
    %18 = vector.load %arg15[%c0_18, %c0_19, %c64] : memref<8x24x160xf32, #tpu.memory_space<vmem>>, vector<8x16x32xf32>
    tpu.vector_store %arg15[%c0_18, %c0_19, %c64], %9 {strides = array<i32>} : memref<8x24x160xf32, #tpu.memory_space<vmem>>, vector<8x16x32xf32>,
    %19 = vector.extract_strided_slice %9 {offsets = [0, 1, 0], sizes = [8, 15, 32], strides = [1, 1, 1]} : vector<8x16x32xf32> to vector<8x15x32xf32>
    %c0_20 = arith.constant 0 : index
    %c0_21 = arith.constant 0 : index
    %c96 = arith.constant 96 : index
    %20 = vector.load %arg15[%c0_20, %c0_21, %c96] : memref<8x24x160xf32, #tpu.memory_space<vmem>>, vector<8x15x32xf32>
    tpu.vector_store %arg15[%c0_20, %c0_21, %c96], %19 {strides = array<i32>} : memref<8x24x160xf32, #tpu.memory_space<vmem>>, vector<8x15x32xf32>,
    %cst_22 = arith.constant 0.000000e+00 : f32
    %21 = vector.broadcast %cst_22 : f32 to vector<8x1x32xf32>
    %c0_23 = arith.constant 0 : index
    %c15 = arith.constant 15 : index
    %c96_24 = arith.constant 96 : index
    %22 = vector.load %arg15[%c0_23, %c15, %c96_24] : memref<8x24x160xf32, #tpu.memory_space<vmem>>, vector<8x1x32xf32>
    tpu.vector_store %arg15[%c0_23, %c15, %c96_24], %21 {strides = array<i32>} : memref<8x24x160xf32, #tpu.memory_space<vmem>>, vector<8x1x32xf32>,
    %23 = vector.extract_strided_slice %9 {offsets = [0, 2, 0], sizes = [8, 14, 32], strides = [1, 1, 1]} : vector<8x16x32xf32> to vector<8x14x32xf32>
    %c0_25 = arith.constant 0 : index
    %c0_26 = arith.constant 0 : index
    %c128 = arith.constant 128 : index
    %24 = vector.load %arg15[%c0_25, %c0_26, %c128] : memref<8x24x160xf32, #tpu.memory_space<vmem>>, vector<8x14x32xf32>
    tpu.vector_store %arg15[%c0_25, %c0_26, %c128], %23 {strides = array<i32>} : memref<8x24x160xf32, #tpu.memory_space<vmem>>, vector<8x14x32xf32>,
    %cst_27 = arith.constant 0.000000e+00 : f32
    %25 = vector.broadcast %cst_27 : f32 to vector<8x2x32xf32>
    %c0_28 = arith.constant 0 : index
    %c14 = arith.constant 14 : index
    %c128_29 = arith.constant 128 : index
    %26 = vector.load %arg15[%c0_28, %c14, %c128_29] : memref<8x24x160xf32, #tpu.memory_space<vmem>>, vector<8x2x32xf32>
    tpu.vector_store %arg15[%c0_28, %c14, %c128_29], %25 {strides = array<i32>} : memref<8x24x160xf32, #tpu.memory_space<vmem>>, vector<8x2x32xf32>,
    %c0_30 = arith.constant 0 : index
    %c0_31 = arith.constant 0 : index
    %c0_32 = arith.constant 0 : index
    %27 = vector.load %arg15[%c0_30, %c0_31, %c0_32] : memref<8x24x160xf32, #tpu.memory_space<vmem>>, vector<8x16x160xf32>
    %28 = vector.shape_cast %27 : vector<8x16x160xf32> to vector<128x160xf32>
    %c0_33 = arith.constant 0 : index
    %c0_34 = arith.constant 0 : index
    %29 = vector.load %arg4[%c0_33, %c0_34] : memref<160x32xf32, #tpu.memory_space<vmem>>, vector<160x32xf32>
    %cst_35 = arith.constant dense<0.000000e+00> : vector<128x32xf32>
    %30 = tpu.matmul %28, %29, %cst_35 {dimension_numbers = #tpu.dot_dimension_numbers<[1], [0], [0], [1], [0, 0, 1, 1], [], []>} : vector<128x160xf32>, vector<160x32xf32>, vector<128x32xf32> -> vector<128x32xf32>
    %c0_36 = arith.constant 0 : index
    %c0_37 = arith.constant 0 : index
    %31 = vector.load %arg5[%c0_36, %c0_37] : memref<1x32xf32, #tpu.memory_space<vmem>>, vector<1x32xf32>
    %32 = vector.broadcast %31 : vector<1x32xf32> to vector<128x32xf32>
    %33 = arith.addf %30, %32 : vector<128x32xf32>
    %cst_38 = arith.constant 0.000000e+00 : f32
    %34 = vector.broadcast %cst_38 : f32 to vector<128x32xf32>
    %35 = arith.maximumf %33, %34 : vector<128x32xf32>
    %36 = vector.shape_cast %35 : vector<128x32xf32> to vector<8x16x32xf32>
    %c0_39 = arith.constant 0 : index
    %c0_40 = arith.constant 0 : index
    %37 = vector.load %arg6[%c0_39, %c0_40] : memref<16x32xf32, #tpu.memory_space<vmem>>, vector<16x32xf32>
    %38 = vector.shape_cast %37 : vector<16x32xf32> to vector<1x16x32xf32>
    %39 = vector.broadcast %38 : vector<1x16x32xf32> to vector<8x16x32xf32>
    %40 = arith.mulf %36, %39 : vector<8x16x32xf32>
    %cst_41 = arith.constant dense<0.000000e+00> : vector<8x16xf32>
    %41 = vector.multi_reduction <add>, %40, %cst_41 [2] : vector<8x16x32xf32> to vector<8x16xf32>
    %cst_42 = arith.constant dense<0.000000e+00> : vector<8xf32>
    %42 = vector.multi_reduction <add>, %41, %cst_42 [1] : vector<8x16xf32> to vector<8xf32>
    %43 = vector.shape_cast %42 : vector<8xf32> to vector<8x1xf32>
    %44 = arith.addf %0, %43 : vector<8x1xf32>
    %c0_43 = arith.constant 0 : index
    %c0_44 = arith.constant 0 : index
    %45 = vector.load %arg7[%c0_43, %c0_44] : memref<192x7xf32, #tpu.memory_space<vmem>>, vector<192x7xf32>
    %c0_45 = arith.constant 0 : index
    %c0_46 = arith.constant 0 : index
    %46 = vector.load %arg8[%c0_45, %c0_46] : memref<7x32xf32, #tpu.memory_space<vmem>>, vector<7x32xf32>
    %cst_47 = arith.constant dense<0.000000e+00> : vector<192x32xf32>
    %47 = tpu.matmul %45, %46, %cst_47 {dimension_numbers = #tpu.dot_dimension_numbers<[1], [0], [0], [1], [0, 0, 1, 1], [], []>} : vector<192x7xf32>, vector<7x32xf32>, vector<192x32xf32> -> vector<192x32xf32>
    %c0_48 = arith.constant 0 : index
    %c0_49 = arith.constant 0 : index
    %48 = vector.load %arg9[%c0_48, %c0_49] : memref<1x32xf32, #tpu.memory_space<vmem>>, vector<1x32xf32>
    %49 = vector.broadcast %48 : vector<1x32xf32> to vector<192x32xf32>
    %50 = arith.addf %47, %49 : vector<192x32xf32>
    %cst_50 = arith.constant 0.000000e+00 : f32
    %51 = vector.broadcast %cst_50 : f32 to vector<192x32xf32>
    %52 = arith.maximumf %50, %51 : vector<192x32xf32>
    %53 = vector.shape_cast %52 : vector<192x32xf32> to vector<8x24x32xf32>
    %54 = vector.extract_strided_slice %53 {offsets = [0, 0, 0], sizes = [8, 22, 32], strides = [1, 1, 1]} : vector<8x24x32xf32> to vector<8x22x32xf32>
    %c0_51 = arith.constant 0 : index
    %c2_52 = arith.constant 2 : index
    %c0_53 = arith.constant 0 : index
    %55 = vector.load %arg15[%c0_51, %c2_52, %c0_53] : memref<8x24x160xf32, #tpu.memory_space<vmem>>, vector<8x22x32xf32>
    tpu.vector_store %arg15[%c0_51, %c2_52, %c0_53], %54 {strides = array<i32>} : memref<8x24x160xf32, #tpu.memory_space<vmem>>, vector<8x22x32xf32>,
    %cst_54 = arith.constant 0.000000e+00 : f32
    %56 = vector.broadcast %cst_54 : f32 to vector<8x2x32xf32>
    %c0_55 = arith.constant 0 : index
    %c0_56 = arith.constant 0 : index
    %c0_57 = arith.constant 0 : index
    %57 = vector.load %arg15[%c0_55, %c0_56, %c0_57] : memref<8x24x160xf32, #tpu.memory_space<vmem>>, vector<8x2x32xf32>
    tpu.vector_store %arg15[%c0_55, %c0_56, %c0_57], %56 {strides = array<i32>} : memref<8x24x160xf32, #tpu.memory_space<vmem>>, vector<8x2x32xf32>,
    %58 = vector.extract_strided_slice %53 {offsets = [0, 0, 0], sizes = [8, 23, 32], strides = [1, 1, 1]} : vector<8x24x32xf32> to vector<8x23x32xf32>
    %c0_58 = arith.constant 0 : index
    %c1_59 = arith.constant 1 : index
    %c32_60 = arith.constant 32 : index
    %59 = vector.load %arg15[%c0_58, %c1_59, %c32_60] : memref<8x24x160xf32, #tpu.memory_space<vmem>>, vector<8x23x32xf32>
    tpu.vector_store %arg15[%c0_58, %c1_59, %c32_60], %58 {strides = array<i32>} : memref<8x24x160xf32, #tpu.memory_space<vmem>>, vector<8x23x32xf32>,
    %cst_61 = arith.constant 0.000000e+00 : f32
    %60 = vector.broadcast %cst_61 : f32 to vector<8x1x32xf32>
    %c0_62 = arith.constant 0 : index
    %c0_63 = arith.constant 0 : index
    %c32_64 = arith.constant 32 : index
    %61 = vector.load %arg15[%c0_62, %c0_63, %c32_64] : memref<8x24x160xf32, #tpu.memory_space<vmem>>, vector<8x1x32xf32>
    tpu.vector_store %arg15[%c0_62, %c0_63, %c32_64], %60 {strides = array<i32>} : memref<8x24x160xf32, #tpu.memory_space<vmem>>, vector<8x1x32xf32>,
    %c0_65 = arith.constant 0 : index
    %c0_66 = arith.constant 0 : index
    %c64_67 = arith.constant 64 : index
    %62 = vector.load %arg15[%c0_65, %c0_66, %c64_67] : memref<8x24x160xf32, #tpu.memory_space<vmem>>, vector<8x24x32xf32>
    tpu.vector_store %arg15[%c0_65, %c0_66, %c64_67], %53 {strides = array<i32>} : memref<8x24x160xf32, #tpu.memory_space<vmem>>, vector<8x24x32xf32>,
    %63 = vector.extract_strided_slice %53 {offsets = [0, 1, 0], sizes = [8, 23, 32], strides = [1, 1, 1]} : vector<8x24x32xf32> to vector<8x23x32xf32>
    %c0_68 = arith.constant 0 : index
    %c0_69 = arith.constant 0 : index
    %c96_70 = arith.constant 96 : index
    %64 = vector.load %arg15[%c0_68, %c0_69, %c96_70] : memref<8x24x160xf32, #tpu.memory_space<vmem>>, vector<8x23x32xf32>
    tpu.vector_store %arg15[%c0_68, %c0_69, %c96_70], %63 {strides = array<i32>} : memref<8x24x160xf32, #tpu.memory_space<vmem>>, vector<8x23x32xf32>,
    %cst_71 = arith.constant 0.000000e+00 : f32
    %65 = vector.broadcast %cst_71 : f32 to vector<8x1x32xf32>
    %c0_72 = arith.constant 0 : index
    %c23 = arith.constant 23 : index
    %c96_73 = arith.constant 96 : index
    %66 = vector.load %arg15[%c0_72, %c23, %c96_73] : memref<8x24x160xf32, #tpu.memory_space<vmem>>, vector<8x1x32xf32>
    tpu.vector_store %arg15[%c0_72, %c23, %c96_73], %65 {strides = array<i32>} : memref<8x24x160xf32, #tpu.memory_space<vmem>>, vector<8x1x32xf32>,
    %67 = vector.extract_strided_slice %53 {offsets = [0, 2, 0], sizes = [8, 22, 32], strides = [1, 1, 1]} : vector<8x24x32xf32> to vector<8x22x32xf32>
    %c0_74 = arith.constant 0 : index
    %c0_75 = arith.constant 0 : index
    %c128_76 = arith.constant 128 : index
    %68 = vector.load %arg15[%c0_74, %c0_75, %c128_76] : memref<8x24x160xf32, #tpu.memory_space<vmem>>, vector<8x22x32xf32>
    tpu.vector_store %arg15[%c0_74, %c0_75, %c128_76], %67 {strides = array<i32>} : memref<8x24x160xf32, #tpu.memory_space<vmem>>, vector<8x22x32xf32>,
    %cst_77 = arith.constant 0.000000e+00 : f32
    %69 = vector.broadcast %cst_77 : f32 to vector<8x2x32xf32>
    %c0_78 = arith.constant 0 : index
    %c22 = arith.constant 22 : index
    %c128_79 = arith.constant 128 : index
    %70 = vector.load %arg15[%c0_78, %c22, %c128_79] : memref<8x24x160xf32, #tpu.memory_space<vmem>>, vector<8x2x32xf32>
    tpu.vector_store %arg15[%c0_78, %c22, %c128_79], %69 {strides = array<i32>} : memref<8x24x160xf32, #tpu.memory_space<vmem>>, vector<8x2x32xf32>,
    %c0_80 = arith.constant 0 : index
    %c0_81 = arith.constant 0 : index
    %c0_82 = arith.constant 0 : index
    %71 = vector.load %arg15[%c0_80, %c0_81, %c0_82] : memref<8x24x160xf32, #tpu.memory_space<vmem>>, vector<8x24x160xf32>
    %72 = vector.shape_cast %71 : vector<8x24x160xf32> to vector<192x160xf32>
    %c0_83 = arith.constant 0 : index
    %c0_84 = arith.constant 0 : index
    %73 = vector.load %arg10[%c0_83, %c0_84] : memref<160x32xf32, #tpu.memory_space<vmem>>, vector<160x32xf32>
    %cst_85 = arith.constant dense<0.000000e+00> : vector<192x32xf32>
    %74 = tpu.matmul %72, %73, %cst_85 {dimension_numbers = #tpu.dot_dimension_numbers<[1], [0], [0], [1], [0, 0, 1, 1], [], []>} : vector<192x160xf32>, vector<160x32xf32>, vector<192x32xf32> -> vector<192x32xf32>
    %c0_86 = arith.constant 0 : index
    %c0_87 = arith.constant 0 : index
    %75 = vector.load %arg11[%c0_86, %c0_87] : memref<1x32xf32, #tpu.memory_space<vmem>>, vector<1x32xf32>
    %76 = vector.broadcast %75 : vector<1x32xf32> to vector<192x32xf32>
    %77 = arith.addf %74, %76 : vector<192x32xf32>
    %cst_88 = arith.constant 0.000000e+00 : f32
    %78 = vector.broadcast %cst_88 : f32 to vector<192x32xf32>
    %79 = arith.maximumf %77, %78 : vector<192x32xf32>
    %80 = vector.shape_cast %79 : vector<192x32xf32> to vector<8x24x32xf32>
    %c0_89 = arith.constant 0 : index
    %c0_90 = arith.constant 0 : index
    %81 = vector.load %arg12[%c0_89, %c0_90] : memref<24x32xf32, #tpu.memory_space<vmem>>, vector<24x32xf32>
    %82 = vector.shape_cast %81 : vector<24x32xf32> to vector<1x24x32xf32>
    %83 = vector.broadcast %82 : vector<1x24x32xf32> to vector<8x24x32xf32>
    %84 = arith.mulf %80, %83 : vector<8x24x32xf32>
    %cst_91 = arith.constant dense<0.000000e+00> : vector<8x24xf32>
    %85 = vector.multi_reduction <add>, %84, %cst_91 [2] : vector<8x24x32xf32> to vector<8x24xf32>
    %cst_92 = arith.constant dense<0.000000e+00> : vector<8xf32>
    %86 = vector.multi_reduction <add>, %85, %cst_92 [1] : vector<8x24xf32> to vector<8xf32>
    %87 = vector.shape_cast %86 : vector<8xf32> to vector<8x1xf32>
    %88 = arith.addf %44, %87 : vector<8x1xf32>
    %c0_93 = arith.constant 0 : index
    %c0_94 = arith.constant 0 : index
    %89 = vector.load %arg13[%c0_93, %c0_94] : memref<1x1xf32, #tpu.memory_space<vmem>>, vector<1x1xf32>
    %90 = vector.broadcast %89 : vector<1x1xf32> to vector<8x1xf32>
    %91 = arith.addf %88, %90 : vector<8x1xf32>
    %cst_95 = arith.constant 0.000000e+00 : f32
    %92 = vector.broadcast %cst_95 : f32 to vector<8x1xf32>
    %93 = arith.subf %92, %91 : vector<8x1xf32>
    %94 = math.exp %93 : vector<8x1xf32>
    %cst_96 = arith.constant 1.000000e+00 : f32
    %95 = vector.broadcast %cst_96 : f32 to vector<8x1xf32>
    %96 = arith.addf %95, %94 : vector<8x1xf32>
    %cst_97 = arith.constant 1.000000e+00 : f32
    %97 = vector.broadcast %cst_97 : f32 to vector<8x1xf32>
    %98 = arith.divf %97, %96 : vector<8x1xf32>
    %c0_98 = arith.constant 0 : index
    %c0_99 = arith.constant 0 : index
    %99 = vector.load %arg14[%c0_98, %c0_99] : memref<8x1xf32, #tpu.memory_space<vmem>>, vector<8x1xf32>
    tpu.vector_store %arg14[%c0_98, %c0_99], %98 {strides = array<i32>} : memref<8x1xf32, #tpu.memory_space<vmem>>, vector<8x1xf32>,
    return
  }
  func.func @transform_0(%arg0: i32) -> (i32, i32) {
    %c0_i32 = arith.constant 0 : i32
    %c0_i32_0 = arith.constant 0 : i32
    return %arg0, %c0_i32 : i32, i32
  }
  func.func @transform_1(%arg0: i32) -> (i32, i32) {
    %c0_i32 = arith.constant 0 : i32
    %c0_i32_0 = arith.constant 0 : i32
    %c0_i32_1 = arith.constant 0 : i32
    return %c0_i32, %c0_i32_0 : i32, i32
  }
  func.func @transform_2(%arg0: i32) -> (i32, i32) {
    %c0_i32 = arith.constant 0 : i32
    %c0_i32_0 = arith.constant 0 : i32
    %c0_i32_1 = arith.constant 0 : i32
    return %c0_i32, %c0_i32_0 : i32, i32
  }
  func.func @transform_3(%arg0: i32) -> (i32, i32) {
    %c0_i32 = arith.constant 0 : i32
    %c0_i32_0 = arith.constant 0 : i32
    %c0_i32_1 = arith.constant 0 : i32
    return %c0_i32, %c0_i32_0 : i32, i32
  }
  func.func @transform_4(%arg0: i32) -> (i32, i32) {
    %c0_i32 = arith.constant 0 : i32
    %c0_i32_0 = arith.constant 0 : i32
    %c0_i32_1 = arith.constant 0 : i32
    return %c0_i32, %c0_i32_0 : i32, i32
  }
  func.func @transform_5(%arg0: i32) -> (i32, i32) {
    %c0_i32 = arith.constant 0 : i32
    %c0_i32_0 = arith.constant 0 : i32
    %c0_i32_1 = arith.constant 0 : i32
    return %c0_i32, %c0_i32_0 : i32, i32
  }
  func.func @transform_6(%arg0: i32) -> (i32, i32) {
    %c0_i32 = arith.constant 0 : i32
    %c0_i32_0 = arith.constant 0 : i32
    return %arg0, %c0_i32 : i32, i32
  }
  func.func @transform_7(%arg0: i32) -> (i32, i32) {
    %c0_i32 = arith.constant 0 : i32
    %c0_i32_0 = arith.constant 0 : i32
    %c0_i32_1 = arith.constant 0 : i32
    return %c0_i32, %c0_i32_0 : i32, i32
  }
  func.func @transform_8(%arg0: i32) -> (i32, i32) {
    %c0_i32 = arith.constant 0 : i32
    %c0_i32_0 = arith.constant 0 : i32
    %c0_i32_1 = arith.constant 0 : i32
    return %c0_i32, %c0_i32_0 : i32, i32
  }
  func.func @transform_9(%arg0: i32) -> (i32, i32) {
    %c0_i32 = arith.constant 0 : i32
    %c0_i32_0 = arith.constant 0 : i32
    %c0_i32_1 = arith.constant 0 : i32
    return %c0_i32, %c0_i32_0 : i32, i32
  }
  func.func @transform_10(%arg0: i32) -> (i32, i32) {
    %c0_i32 = arith.constant 0 : i32
    %c0_i32_0 = arith.constant 0 : i32
    %c0_i32_1 = arith.constant 0 : i32
    return %c0_i32, %c0_i32_0 : i32, i32
  }
  func.func @transform_11(%arg0: i32) -> (i32, i32) {
    %c0_i32 = arith.constant 0 : i32
    %c0_i32_0 = arith.constant 0 : i32
    %c0_i32_1 = arith.constant 0 : i32
    return %c0_i32, %c0_i32_0 : i32, i32
  }
  func.func @transform_12(%arg0: i32) -> (i32, i32) {
    %c0_i32 = arith.constant 0 : i32
    %c0_i32_0 = arith.constant 0 : i32
    %c0_i32_1 = arith.constant 0 : i32
    return %c0_i32, %c0_i32_0 : i32, i32
  }
  func.func @transform_13(%arg0: i32) -> (i32, i32) {
    %c0_i32 = arith.constant 0 : i32
    %c0_i32_0 = arith.constant 0 : i32
    return %arg0, %c0_i32 : i32, i32
  }
}

</mosaic_0001>

<bundles_post_ra>
// kernel: tpu_custom_call.1
= control target key start
LH: loop header
LB: loop body
LE: loop exit
PB: predicated region body
PF: predicated region fallthrough
CT: control target
= control target key end

     0   :  { %vm119_vm0 = vcmask 1046528   ;;  %vm70_vm1 = vcmask 56320   ;;  %v4793_v41 = vmov 0.0   ;;  %vm690_vm2 = vcmask 261126   ;;  %s2929_s26 = smov 64   ;;  %s4776_s1 = inlined_call_operand.vmem [shape: f32[7,32], index: 1, kind: input, shape index: {}]   ;;  %s4777_s0 = inlined_call_operand.vmem [shape: f32[128,7], index: 0, kind: input, shape index: {}]   ;;  %s4778_s7 = inlined_call_operand.vmem [shape: f32[7,32], index: 7, kind: input, shape index: {}]   ;;  %s4779_s6 = inlined_call_operand.vmem [shape: f32[192,7], index: 6, kind: input, shape index: {}]   ;;  %s4780_s3 = inlined_call_operand.vmem [shape: f32[160,32], index: 3, kind: input, shape index: {}]   ;;  %s4781_s2 = inlined_call_operand.vmem [shape: f32[1,32], index: 2, kind: input, shape index: {}]   ;;  %s4782_s8 = inlined_call_operand.vmem [shape: f32[1,32], index: 8, kind: input, shape index: {}]   ;;  %s4783_s9 = inlined_call_operand.vmem [shape: f32[160,32], index: 9, kind: input, shape index: {}]   ;;  %s4784_s4 = inlined_call_operand.vmem [shape: f32[1,32], index: 4, kind: input, shape index: {}]   ;;  %s4785_s5 = inlined_call_operand.vmem [shape: f32[16,32], index: 5, kind: input, shape index: {}]   ;;  %s4786_s10 = inlined_call_operand.vmem [shape: f32[1,32], index: 10, kind: input, shape index: {}]   ;;  %s4787_s11 = inlined_call_operand.vmem [shape: f32[24,32], index: 11, kind: input, shape index: {}]   ;;  %s4788_s12 = inlined_call_operand.<no memory space> [shape: f32[1,1], index: 12, kind: input, shape index: {}]   ;;  %s4789_s13 = inlined_call_operand.vmem [shape: f32[8,1], index: 13, kind: output, shape index: {}]  }
   0x1   :  { %v62_v0 = vld [vmem:[%s4776_s1] sm:$0x7f]  ;;  %v47_v2 = vld [vmem:[%s4777_s0 + $0x8] sm:$0xff]  ;;  %v48_v3 = vld [vmem:[%s4777_s0 + $0x10] sm:$0xff]  ;;  %806 = vmatprep.subr.mxu1 %v4793_v41  ;;  %691 = vst.msk [vmem:[#allocation2 + $0x18] sm:$0xc0] %vm690_vm2, %v4793_v41 }
   0x2   :  { %v46_v1 = vld [vmem:[%s4777_s0] sm:$0xff]  ;;  %2816 = vmatprep.subr.msk.mxu0 %vm119_vm0, %v62_v0  ;;  %v49_v5 = vld [vmem:[%s4777_s0 + $0x18] sm:$0xff]  ;;  %v51_v7 = vld [vmem:[%s4777_s0 + $0x28] sm:$0xff]  ;;  %692 = vst.msk [vmem:[#allocation2 + $0x48] sm:$0xc0] %vm690_vm2, %v4793_v41  ;;  %vm359_vm3 = vcmask 254976  }
   0x3   :  { %2818 = vmatprep.mubr.msk.f32.mxu0 %vm70_vm1, %v46_v1  ;;  %2817 = vmatpush3.msk.msra.mxu0 %vm119_vm0, %v62_v0  ;;  %v1169_v4 = vld [vmem:[%s4778_s7] sm:$0x7f]  ;;  %v52_v8 = vld [vmem:[%s4777_s0 + $0x30] sm:$0xff]  ;;  %v53_v9 = vld [vmem:[%s4777_s0 + $0x38] sm:$0xff]  ;;  %693 = vst.msk [vmem:[#allocation2 + $0x78] sm:$0xc0] %vm690_vm2, %v4793_v41 }
   0x4   :  { %2819 = vmatmul.mubr.msk.f32.vlgmr.msra.gmra.mxu0 %vm70_vm1, %v47_v2  ;;  %2842 = vmatprep.subr.msk.mxu0 %vm119_vm0, %v1169_v4  ;;  %v50_v6 = vld [vmem:[%s4777_s0 + $0x20] sm:$0xff]  ;;  %v55_v11 = vld [vmem:[%s4777_s0 + $0x48] sm:$0xff]  ;;  %v56_v12 = vld [vmem:[%s4777_s0 + $0x50] sm:$0xff]  ;;  %694 = vst.msk [vmem:[#allocation2 + $0xa8] sm:$0xc0] %vm690_vm2, %v4793_v41  ;;  %vm459_vm4 = vcmask 516352  }
   0x5   :  { %2821 = vmatprep.mubr.msk.f32.mxu0 %vm70_vm1, %v48_v3  ;;  %2843 = vmatpush3.msk.msra.mxu0 %vm119_vm0, %v1169_v4  ;;  %v54_v10 = vld [vmem:[%s4777_s0 + $0x40] sm:$0xff]  ;;  %v57_v13 = vld [vmem:[%s4777_s0 + $0x58] sm:$0xff]  ;;  %v59_v15 = vld [vmem:[%s4777_s0 + $0x68] sm:$0xff]  ;;  %695 = vst.msk [vmem:[#allocation2 + $0xd8] sm:$0xc0] %vm690_vm2, %v4793_v41  ;;  %vm674_vm5 = vcmask 259072  }
   0x6   :  { %v58_v14 = vld [vmem:[%s4777_s0 + $0x60] sm:$0xff]  ;;  %v60_v16 = vld [vmem:[%s4777_s0 + $0x70] sm:$0xff]  ;;  %v61_v17 = vld [vmem:[%s4777_s0 + $0x78] sm:$0xff]  ;;  %2208 = vmatprep.subr.mxu0 %v4793_v41  ;;  %696 = vst.msk [vmem:[#allocation2 + $0x108] sm:$0xc0] %vm690_vm2, %v4793_v41  ;;  %vm343_vm6 = vcmask 261120  }
   0x7   :  { %v1145_v18 = vld [vmem:[%s4779_s6] sm:$0xff]  ;;  %v1146_v19 = vld [vmem:[%s4779_s6 + $0x8] sm:$0xff]  ;;  %v1147_v20 = vld [vmem:[%s4779_s6 + $0x10] sm:$0xff]  ;;  %697 = vst.msk [vmem:[#allocation2 + $0x138] sm:$0xc0] %vm690_vm2, %v4793_v41  ;;  %vm632_vm7 = vcmask 1045504  }
   0x8   :  { %2822 = vmatmul.mubr.msk.f32.gmra.mxu0 %vm70_vm1, %v49_v5  ;;  %v1148_v21 = vld [vmem:[%s4779_s6 + $0x18] sm:$0xff]  ;;  %v1149_v22 = vld [vmem:[%s4779_s6 + $0x20] sm:$0xff]  ;;  %v1150_v23 = vld [vmem:[%s4779_s6 + $0x28] sm:$0xff]  ;;  %698 = vst.msk [vmem:[#allocation2 + $0x168] sm:$0xc0] %vm690_vm2, %v4793_v41  ;;  %vm341_vm8 = vcmask 261122  }
   0x9   :  { %2824 = vmatprep.mubr.msk.f32.mxu0 %vm70_vm1, %v50_v6  ;;  %v1151_v24 = vld [vmem:[%s4779_s6 + $0x30] sm:$0xff]  ;;  %v1152_v25 = vld [vmem:[%s4779_s6 + $0x38] sm:$0xff]  ;;  %v1153_v26 = vld [vmem:[%s4779_s6 + $0x40] sm:$0xff]  ;;  %2053 = vst.msk [vmem:[#allocation2 + $0x28] sm:$0xc0] %vm690_vm2, %v4793_v41  ;;  %s2930_s0 = smov 96  }
   0xa   :  { %v1154_v27 = vld [vmem:[%s4779_s6 + $0x48] sm:$0xff]  ;;  %v1155_v28 = vld [vmem:[%s4779_s6 + $0x50] sm:$0xff]  ;;  %v1156_v29 = vld [vmem:[%s4779_s6 + $0x58] sm:$0xff]  ;;  %2054 = vst.msk [vmem:[#allocation2 + $0x58] sm:$0xc0] %vm690_vm2, %v4793_v41  ;;  %vm300_vm9 = vcmask 1041408  }
   0xb   :  { %v1157_v30 = vld [vmem:[%s4779_s6 + $0x60] sm:$0xff]  ;;  %v1158_v31 = vld [vmem:[%s4779_s6 + $0x68] sm:$0xff]  ;;  %v1159_v32 = vld [vmem:[%s4779_s6 + $0x70] sm:$0xff]  ;;  %2055 = vst.msk [vmem:[#allocation2 + $0x88] sm:$0xc0] %vm690_vm2, %v4793_v41  ;;  %vm368_vm10 = vcmask 1040384  }
   0xc   :  { %2825 = vmatmul.mubr.msk.f32.gmra.mxu0 %vm70_vm1, %v51_v7  ;;  %v1160_v33 = vld [vmem:[%s4779_s6 + $0x78] sm:$0xff]  ;;  %v1161_v34 = vld [vmem:[%s4779_s6 + $0x80] sm:$0xff]  ;;  %v1162_v35 = vld [vmem:[%s4779_s6 + $0x88] sm:$0xff]  ;;  %2056 = vst.msk [vmem:[#allocation2 + $0xb8] sm:$0xc0] %vm690_vm2, %v4793_v41  ;;  %vm441_vm11 = vcmask 523521  }
   0xd   :  { %2827 = vmatprep.mubr.msk.f32.mxu0 %vm70_vm1, %v52_v8  ;;  %v1163_v36 = vld [vmem:[%s4779_s6 + $0x90] sm:$0xff]  ;;  %v1164_v37 = vld [vmem:[%s4779_s6 + $0x98] sm:$0xff]  ;;  %v1165_v38 = vld [vmem:[%s4779_s6 + $0xa0] sm:$0xff]  ;;  %2057 = vst.msk [vmem:[#allocation2 + $0xe8] sm:$0xc0] %vm690_vm2, %v4793_v41  ;;  %vm516_vm12 = vcmask 785920  }
   0xe   :  { %v1166_v39 = vld [vmem:[%s4779_s6 + $0xa8] sm:$0xff]  ;;  %v1167_v40 = vld [vmem:[%s4779_s6 + $0xb0] sm:$0xff]  ;;  %v1168_v42 = vld [vmem:[%s4779_s6 + $0xb8] sm:$0xff]  ;;  %2058 = vst.msk [vmem:[#allocation2 + $0x118] sm:$0xc0] %vm690_vm2, %v4793_v41  ;;  %vm605_vm13 = vcmask 1048320  }
   0xf   :  { %2059 = vst.msk [vmem:[#allocation2 + $0x148] sm:$0xc0] %vm690_vm2, %v4793_v41  ;;  %2060 = vst.msk [vmem:[#allocation2 + $0x178] sm:$0xc0] %vm690_vm2, %v4793_v41  ;;  %v746_v43 = vld [vmem:[%s4780_s3 + $0x78] sm:$0xff]  ;;  %v745_v44 = vld [vmem:[%s4780_s3 + $0x70] sm:$0xff] }
  0x10   :  { %2828 = vmatmul.mubr.msk.f32.gmra.mxu0 %vm70_vm1, %v53_v9  ;;  %807 = vmatpush1.msra.mxu1 %v746_v43  ;;  %v744_v45 = vld [vmem:[%s4780_s3 + $0x68] sm:$0xff]  ;;  %v743_v46 = vld [vmem:[%s4780_s3 + $0x60] sm:$0xff]  ;;  %v742_v47 = vld [vmem:[%s4780_s3 + $0x58] sm:$0xff]  ;;  %360 = vst.msk [vmem:[#allocation2] sm:$0x3] %vm359_vm3, %v4793_v41  ;;  %vm443_vm14 = vcmask 523520  }
  0x11   :  { %2830 = vmatprep.mubr.msk.f32.mxu0 %vm70_vm1, %v54_v10  ;;  %808 = vmatprep.subr.mxu1 %v4793_v41  ;;  %v741_v48 = vld [vmem:[%s4780_s3 + $0x50] sm:$0xff]  ;;  %v740_v49 = vld [vmem:[%s4780_s3 + $0x48] sm:$0xff]  ;;  %v739_v50 = vld [vmem:[%s4780_s3 + $0x40] sm:$0xff]  ;;  %361 = vst.msk [vmem:[#allocation2 + $0x30] sm:$0x3] %vm359_vm3, %v4793_v41  ;;  %vm607_vm15 = vcmask 1047296  }
  0x12   :  { %809 = vmatpush1.msra.mxu1 %v745_v44  ;;  %v738_v51 = vld [vmem:[%s4780_s3 + $0x38] sm:$0xff]  ;;  %v737_v52 = vld [vmem:[%s4780_s3 + $0x30] sm:$0xff]  ;;  %v736_v53 = vld [vmem:[%s4780_s3 + $0x28] sm:$0xff]  ;;  %362 = vst.msk [vmem:[#allocation2 + $0x60] sm:$0x3] %vm359_vm3, %v4793_v41  ;;  %vm1125_vm2 = vcmask 1041409  }
  0x13   :  { %810 = vmatprep.subr.mxu1 %v4793_v41  ;;  %v735_v54 = vld [vmem:[%s4780_s3 + $0x20] sm:$0xff]  ;;  %v734_v55 = vld [vmem:[%s4780_s3 + $0x18] sm:$0xff]  ;;  %v733_v56 = vld [vmem:[%s4780_s3 + $0x10] sm:$0xff]  ;;  %363 = vst.msk [vmem:[#allocation2 + $0x90] sm:$0x3] %vm359_vm3, %v4793_v41 }
  0x14   :  { %2831 = vmatmul.mubr.msk.f32.gmra.mxu0 %vm70_vm1, %v55_v11  ;;  %811 = vmatpush1.msra.mxu1 %v744_v45  ;;  %v732_v57 = vld [vmem:[%s4780_s3 + $0x8] sm:$0xff]  ;;  %v3267_v58 = vld [vmem:[%s4781_s2] ss:$0 sm:$0xff]  ;;  %364 = vst.msk [vmem:[#allocation2 + $0xc0] sm:$0x3] %vm359_vm3, %v4793_v41  ;;  %v750_v2 = vld [vmem:[%s4780_s3 + $0x98] sm:$0xff] }
  0x15   :  { %2833 = vmatprep.mubr.msk.f32.mxu0 %vm70_vm1, %v56_v12  ;;  %812 = vmatprep.subr.mxu1 %v4793_v41  ;;  %365 = vst.msk [vmem:[#allocation2 + $0xf0] sm:$0x3] %vm359_vm3, %v4793_v41  ;;  %366 = vst.msk [vmem:[#allocation2 + $0x120] sm:$0x3] %vm359_vm3, %v4793_v41  ;;  %v731_v61 = vld [vmem:[%s4780_s3] sm:$0xff]  ;;  %v749_v3 = vld [vmem:[%s4780_s3 + $0x90] sm:$0xff] }
  0x16   :  { %813 = vmatpush1.msra.mxu1 %v743_v46  ;;  %367 = vst.msk [vmem:[#allocation2 + $0x150] sm:$0x3] %vm359_vm3, %v4793_v41  ;;  %v748_v9 = vld [vmem:[%s4780_s3 + $0x88] sm:$0xff] }
  0x17   :  { %814 = vmatprep.subr.mxu1 %v4793_v41  ;;  %460 = vst.msk [vmem:[#allocation2] sm:$0x1] %vm459_vm4, %v4793_v41  ;;  %461 = vst.msk [vmem:[#allocation2 + $0x30] sm:$0x1] %vm459_vm4, %v4793_v41 }
  0x18   :  { %2834 = vmatmul.mubr.msk.f32.gmra.mxu0 %vm70_vm1, %v57_v13  ;;  %815 = vmatpush1.msra.mxu1 %v742_v47  ;;  %462 = vst.msk [vmem:[#allocation2 + $0x60] sm:$0x1] %vm459_vm4, %v4793_v41  ;;  %463 = vst.msk [vmem:[#allocation2 + $0x90] sm:$0x1] %vm459_vm4, %v4793_v41 }
  0x19   :  { %2836 = vmatprep.mubr.msk.f32.mxu0 %vm70_vm1, %v58_v14  ;;  %816 = vmatprep.subr.mxu1 %v4793_v41  ;;  %464 = vst.msk [vmem:[#allocation2 + $0xc0] sm:$0x1] %vm459_vm4, %v4793_v41  ;;  %465 = vst.msk [vmem:[#allocation2 + $0xf0] sm:$0x1] %vm459_vm4, %v4793_v41 }
  0x1a   :  { %817 = vmatpush1.msra.mxu1 %v741_v48  ;;  %466 = vst.msk [vmem:[#allocation2 + $0x120] sm:$0x1] %vm459_vm4, %v4793_v41  ;;  %467 = vst.msk [vmem:[#allocation2 + $0x150] sm:$0x1] %vm459_vm4, %v4793_v41 }
  0x1b   :  { %818 = vmatprep.subr.mxu1 %v4793_v41 }
  0x1c   :  { %2837 = vmatmul.mubr.msk.f32.gmra.mxu0 %vm70_vm1, %v59_v15  ;;  %819 = vmatpush1.msra.mxu1 %v740_v49 }
  0x1d   :  { %2839 = vmatprep.mubr.msk.f32.mxu0 %vm70_vm1, %v60_v16  ;;  %820 = vmatprep.subr.mxu1 %v4793_v41 }
  0x1e   :  { %821 = vmatpush1.msra.mxu1 %v739_v50 }
  0x1f   :  { %822 = vmatprep.subr.mxu1 %v4793_v41 }
  0x20   :  { %2840 = vmatmul.mubr.msk.f32.gmra.mxu0 %vm70_vm1, %v61_v17  ;;  %823 = vmatpush1.msra.mxu1 %v738_v51 }
  0x21   :  { %2844 = vmatprep.mubr.msk.f32.mxu0 %vm70_vm1, %v1145_v18  ;;  %824 = vmatprep.subr.mxu1 %v4793_v41 }
  0x22   :  { %825 = vmatpush1.msra.mxu1 %v737_v52 }
  0x23   :  { %826 = vmatprep.subr.mxu1 %v4793_v41 }
  0x24   :  { %2845 = vmatmul.mubr.msk.f32.vlgmr.msra.gmra.mxu0 %vm70_vm1, %v1146_v19  ;;  %827 = vmatpush1.msra.mxu1 %v736_v53 }
  0x25   :  { %2847 = vmatprep.mubr.msk.f32.mxu0 %vm70_vm1, %v1147_v20  ;;  %828 = vmatprep.subr.mxu1 %v4793_v41  ;;  %v747_v20 = vld [vmem:[%s4780_s3 + $0x80] sm:$0xff]  ;;  %s2931_s3 = smov 32  }
  0x26   :  { %829 = vmatpush1.msra.mxu1 %v735_v54 }
  0x27   :  { %830 = vmatprep.subr.mxu1 %v4793_v41 }
  0x28   :  { %2848 = vmatmul.mubr.msk.f32.gmra.mxu0 %vm70_vm1, %v1148_v21  ;;  %831 = vmatpush1.msra.mxu1 %v734_v55 }
  0x29   :  { %2850 = vmatprep.mubr.msk.f32.mxu0 %vm70_vm1, %v1149_v22  ;;  %832 = vmatprep.subr.mxu1 %v4793_v41 }
  0x2a   :  { %833 = vmatpush1.msra.mxu1 %v733_v56 }
  0x2b   :  { %834 = vmatprep.subr.mxu1 %v4793_v41 }
  0x2c   :  { %2851 = vmatmul.mubr.msk.f32.gmra.mxu0 %vm70_vm1, %v1150_v23  ;;  %835 = vmatpush1.msra.mxu1 %v732_v57 }
  0x2d   :  { %2853 = vmatprep.mubr.msk.f32.mxu0 %vm70_vm1, %v1151_v24  ;;  %836 = vmatprep.subr.mxu1 %v4793_v41 }
  0x2e   :  { %837 = vmatpush1.msra.mxu1 %v731_v61 }
  0x2f   :  { %862 = vmatprep.subr.mxu1 %v4793_v41 }
  0x30   :  { %2854 = vmatmul.mubr.msk.f32.gmra.mxu0 %vm70_vm1, %v1152_v25  ;;  %863 = vmatpush2.msra.mxu1 %v750_v2 }
  0x31   :  { %2856 = vmatprep.mubr.msk.f32.mxu0 %vm70_vm1, %v1153_v26  ;;  %864 = vmatprep.subr.mxu1 %v4793_v41 }
  0x32   :  { %865 = vmatpush2.msra.mxu1 %v749_v3 }
  0x33   :  { %866 = vmatprep.subr.mxu1 %v4793_v41 }
  0x34   :  { %2857 = vmatmul.mubr.msk.f32.gmra.mxu0 %vm70_vm1, %v1154_v27  ;;  %867 = vmatpush2.msra.mxu1 %v748_v9 }
  0x35   :  { %2859 = vmatprep.mubr.msk.f32.mxu0 %vm70_vm1, %v1155_v28  ;;  %868 = vmatprep.subr.mxu1 %v4793_v41 }
  0x36   :  { %869 = vmatpush2.msra.mxu1 %v747_v20 }
  0x37   :  { %2880 = vmatprep.subr.mxu1 %v4793_v41 }
  0x38   :  { %2860 = vmatmul.mubr.msk.f32.gmra.mxu0 %vm70_vm1, %v1156_v29 }
  0x39   :  { %2862 = vmatprep.mubr.msk.f32.mxu0 %vm70_vm1, %v1157_v30 }
  0x3c   :  { %2863 = vmatmul.mubr.msk.f32.gmra.mxu0 %vm70_vm1, %v1158_v31 }
  0x3d   :  { %2865 = vmatprep.mubr.msk.f32.mxu0 %vm70_vm1, %v1159_v32 }
  0x40   :  { %2866 = vmatmul.mubr.msk.f32.gmra.mxu0 %vm70_vm1, %v1160_v33 }
  0x41   :  { %2868 = vmatprep.mubr.msk.f32.mxu0 %vm70_vm1, %v1161_v34 }
  0x44   :  { %2869 = vmatmul.mubr.msk.f32.gmra.mxu0 %vm70_vm1, %v1162_v35 }
  0x45   :  { %2871 = vmatprep.mubr.msk.f32.mxu0 %vm70_vm1, %v1163_v36 }
  0x48   :  { %2872 = vmatmul.mubr.msk.f32.gmra.mxu0 %vm70_vm1, %v1164_v37 }
  0x49   :  { %2874 = vmatprep.mubr.msk.f32.mxu0 %vm70_vm1, %v1165_v38 }
  0x4c   :  { %2875 = vmatmul.mubr.msk.f32.gmra.mxu0 %vm70_vm1, %v1166_v39 }
  0x4d   :  { %2877 = vmatprep.mubr.msk.f32.mxu0 %vm70_vm1, %v1167_v40 }
  0x50   :  { %2878 = vmatmul.mubr.msk.f32.gmra.mxu0 %vm70_vm1, %v1168_v42  ;;  %vm623_vm1 = vcmask 1041152  }
  0xc4   :  { %v2820_v59 = vpop.f32.mrf.mxu0 }
  0xc5   :  { %v195_v60 = vadd.f32 %v2820_v59, %v3267_v58 }
  0xc6   :  { %v189_v62 = vpop.f32.mrf.mxu0 }
  0xc7   :  { %v3307_v63 = vmax.f32 %v195_v60, 0.0  ;;  %v190_v0 = vadd.f32 %v3267_v58, %v189_v62 }
  0xc8   :  { %v2823_v1 = vpop.f32.mrf.mxu0 }
  0xc9   :  { %v634_v4 = vrot.slane %v3307_v63, 2  ;;  %v268_v5 = vmax.f32 %v190_v0, 0.0  ;;  %470 = vrot.lane.b32.xlu0 %v3307_v63, %s2929_s26  ;;  %v534_v6 = vrot.slane %v3307_v63, 1  ;;  %v205_v7 = vadd.f32 %v2823_v1, %v3267_v58 }
  0xca   :  { %v199_v8 = vpop.f32.mrf.mxu0  ;;  %v302_v24 = vrot.slane %v3307_v63, 6  ;;  %v370_v26 = vrot.slane %v3307_v63, 7 }
  0xcb   :  { %675 = vst.msk [vmem:[#allocation2 + $0x18] sm:$0x3f] %vm674_vm5, %v634_v4  ;;  %v633_v10 = vrot.slane %v268_v5, 2  ;;  %559 = vrot.lane.b32.xlu1 %v534_v6, %s2930_s0  ;;  %v3328_v11 = vmax.f32 %v205_v7, 0.0  ;;  %v533_v12 = vrot.slane %v268_v5, 1  ;;  %v200_v13 = vadd.f32 %v3267_v58, %v199_v8 }
  0xcc   :  { %v2826_v14 = vpop.f32.mrf.mxu0  ;;  %v301_v15 = vrot.slane %v268_v5, 6  ;;  %v369_v21 = vrot.slane %v268_v5, 7 }
  0xcd   :  { %v635_v16 = vsel %vm632_vm7, %v633_v10, %v634_v4  ;;  %468 = vrot.lane.b32.xlu0 %v268_v5, %s2929_s26  ;;  %v637_v17 = vrot.slane %v3328_v11, 2  ;;  %v535_v18 = vsel %vm119_vm0, %v533_v12, %v534_v6  ;;  %v3336_v19 = vmax.f32 %v200_v13, 0.0 }
  0xce   :  { %673 = vst.msk [vmem:[#allocation2 + $0x8] sm:$0xff] %vm343_vm6, %v635_v16  ;;  %v215_v22 = vadd.f32 %v2826_v14, %v3267_v58  ;;  %v209_v23 = vpop.f32.mrf.mxu0  ;;  %v303_v30 = vsel %vm300_vm9, %v301_v15, %v302_v24  ;;  %v305_v32 = vrot.slane %v3328_v11, 6  ;;  %v371_v35 = vsel %vm368_vm10, %v369_v21, %v370_v26 }
  0xcf   :  { %342 = vst.msk [vmem:[#allocation2] sm:$0xfc] %vm341_vm8, %v301_v15  ;;  %557 = vrot.lane.b32.xlu1 %v535_v18, %s2930_s0  ;;  %v636_v25 = vrot.slane %v3336_v19, 2  ;;  %v210_v27 = vadd.f32 %v3267_v58, %v209_v23  ;;  %v304_v31 = vrot.slane %v3336_v19, 6  ;;  %v372_v53 = vrot.slane %v3336_v19, 7 }
  0xd0   :  { %677 = vst.msk [vmem:[#allocation2 + $0x48] sm:$0x3f] %vm674_vm5, %v637_v17  ;;  %v3351_v28 = vmax.f32 %v215_v22, 0.0  ;;  %v2829_v29 = vpop.f32.mrf.mxu0  ;;  %v537_v62 = vrot.slane %v3328_v11, 1  ;;  %v373_v2 = vrot.slane %v3328_v11, 7  ;;  %v536_v5 = vrot.slane %v3336_v19, 1 }
  0xd1   :  { %393 = vrot.lane.b32.xlu0 %v369_v21, %s2931_s3  ;;  %v3358_v33 = vmax.f32 %v210_v27, 0.0  ;;  %v225_v34 = vadd.f32 %v2829_v29, %v3267_v58  ;;  %344 = vst.msk [vmem:[#allocation2 + $0x10] sm:$0xff] %vm343_vm6, %v303_v30  ;;  %v306_v38 = vsel %vm300_vm9, %v304_v31, %v305_v32  ;;  %v638_v44 = vsel %vm632_vm7, %v636_v25, %v637_v17  ;;  %v3449_v32 = vld [vmem:[%s4782_s8] ss:$0 sm:$0xff] }
  0xd2   :  { %v640_v36 = vrot.slane %v3351_v28, 2  ;;  %v219_v37 = vpop.f32.mrf.mxu0  ;;  %345 = vst.msk [vmem:[#allocation2 + $0x30] sm:$0xfc] %vm341_vm8, %v304_v31  ;;  %v308_v46 = vrot.slane %v3351_v28, 6  ;;  %v374_v15 = vsel %vm368_vm10, %v372_v53, %v373_v2 }
  0xd3   :  { %395 = vrot.lane.b32.xlu1 %v371_v35, %s2931_s3  ;;  %v3367_v39 = vmax.f32 %v225_v34, 0.0  ;;  %v220_v40 = vadd.f32 %v3267_v58, %v219_v37  ;;  %346 = vst.msk [vmem:[#allocation2 + $0x40] sm:$0xff] %vm343_vm6, %v306_v38  ;;  %v639_v42 = vrot.slane %v3358_v33, 2  ;;  %v307_v45 = vrot.slane %v3358_v33, 6  ;;  %676 = vst.msk [vmem:[#allocation2 + $0x38] sm:$0xff] %vm343_vm6, %v638_v44 }
  0xd4   :  { %679 = vst.msk [vmem:[#allocation2 + $0x78] sm:$0x3f] %vm674_vm5, %v640_v36  ;;  %v2832_v43 = vpop.f32.mrf.mxu0  ;;  %v375_v35 = vrot.slane %v3358_v33, 7 }
  0xd5   :  { %474 = vrot.lane.b32.xlu0 %v3328_v11, %s2929_s26  ;;  %v700_v47 = vld [vmem:[#allocation2 + $0x8] sm:$0xff]  ;;  %v643_v48 = vrot.slane %v3367_v39, 2  ;;  %v3379_v49 = vmax.f32 %v220_v40, 0.0  ;;  %v235_v50 = vadd.f32 %v2832_v43, %v3267_v58  ;;  %347 = vst.msk [vmem:[#allocation2 + $0x60] sm:$0xfc] %vm341_vm8, %v307_v45  ;;  %v309_v52 = vsel %vm300_vm9, %v307_v45, %v308_v46 }
  0xd6   :  { %2706 = vmatprep.mubr.msk.f32.mxu1 %vm343_vm6, %v700_v47  ;;  %v229_v51 = vpop.f32.mrf.mxu0  ;;  %348 = vst.msk [vmem:[#allocation2 + $0x70] sm:$0xff] %vm343_vm6, %v309_v52  ;;  %v641_v59 = vsel %vm632_vm7, %v639_v42, %v640_v36  ;;  %v311_v61 = vrot.slane %v3367_v39, 6  ;;  %v540_v45 = vrot.slane %v3351_v28, 1  ;;  %v539_v52 = vrot.slane %v3358_v33, 1 }
  0xd7   :  { %472 = vrot.lane.b32.xlu1 %v3336_v19, %s2929_s26  ;;  %681 = vst.msk [vmem:[#allocation2 + $0xa8] sm:$0x3f] %vm674_vm5, %v643_v48  ;;  %v3390_v54 = vmax.f32 %v235_v50, 0.0  ;;  %v230_v55 = vadd.f32 %v3267_v58, %v229_v51  ;;  %v642_v56 = vrot.slane %v3379_v49, 2  ;;  %v310_v60 = vrot.slane %v3379_v49, 6 }
  0xd8   :  { %v2835_v57 = vpop.f32.mrf.mxu0  ;;  %678 = vst.msk [vmem:[#allocation2 + $0x68] sm:$0xff] %vm343_vm6, %v641_v59  ;;  %v538_v19 = vsel %vm119_vm0, %v536_v5, %v537_v62  ;;  %v541_v2 = vsel %vm119_vm0, %v539_v52, %v540_v45 }
  0xd9   :  { %397 = vrot.lane.b32.xlu0 %v372_v53, %s2931_s3  ;;  %v646_v63 = vrot.slane %v3390_v54, 2  ;;  %v3401_v0 = vmax.f32 %v230_v55, 0.0  ;;  %v245_v1 = vadd.f32 %v2835_v57, %v3267_v58  ;;  %349 = vst.msk [vmem:[#allocation2 + $0x90] sm:$0xfc] %vm341_vm8, %v310_v60  ;;  %v312_v4 = vsel %vm300_vm9, %v310_v60, %v311_v61 }
  0xda   :  { %v239_v3 = vpop.f32.mrf.mxu0  ;;  %350 = vst.msk [vmem:[#allocation2 + $0xa0] sm:$0xff] %vm343_vm6, %v312_v4  ;;  %v644_v10 = vsel %vm632_vm7, %v642_v56, %v643_v48  ;;  %v314_v12 = vrot.slane %v3390_v54, 6  ;;  %v376_v48 = vrot.slane %v3351_v28, 7 }
  0xdb   :  { %563 = vrot.lane.b32.xlu1 %v537_v62, %s2930_s0  ;;  %683 = vst.msk [vmem:[#allocation2 + $0xd8] sm:$0x3f] %vm674_vm5, %v646_v63  ;;  %v3411_v6 = vmax.f32 %v245_v1, 0.0  ;;  %v240_v7 = vadd.f32 %v3267_v58, %v239_v3  ;;  %v645_v8 = vrot.slane %v3401_v0, 2  ;;  %v313_v11 = vrot.slane %v3401_v0, 6 }
  0xdc   :  { %v2838_v9 = vpop.f32.mrf.mxu0  ;;  %680 = vst.msk [vmem:[#allocation2 + $0x98] sm:$0xff] %vm343_vm6, %v644_v10  ;;  %v377_v62 = vsel %vm368_vm10, %v375_v35, %v376_v48 }
  0xdd   :  { %478 = vrot.lane.b32.xlu0 %v3351_v28, %s2929_s26  ;;  %v649_v13 = vrot.slane %v3411_v6, 2  ;;  %v255_v14 = vadd.f32 %v2838_v9, %v3267_v58  ;;  %v3425_v16 = vmax.f32 %v240_v7, 0.0  ;;  %v315_v18 = vsel %vm300_vm9, %v313_v11, %v314_v12  ;;  %351 = vst.msk [vmem:[#allocation2 + $0xc0] sm:$0xfc] %vm341_vm8, %v313_v11 }
  0xde   :  { %v249_v17 = vpop.f32.mrf.mxu0  ;;  %352 = vst.msk [vmem:[#allocation2 + $0xd0] sm:$0xff] %vm343_vm6, %v315_v18  ;;  %v317_v25 = vrot.slane %v3411_v6, 6  ;;  %v647_v26 = vsel %vm632_vm7, %v645_v8, %v646_v63 }
  0xdf   :  { %399 = vrot.lane.b32.xlu1 %v374_v15, %s2931_s3  ;;  %685 = vst.msk [vmem:[#allocation2 + $0x108] sm:$0x3f] %vm674_vm5, %v649_v13  ;;  %v3432_v20 = vmax.f32 %v255_v14, 0.0  ;;  %v250_v21 = vadd.f32 %v3267_v58, %v249_v17  ;;  %v648_v22 = vrot.slane %v3425_v16, 2  ;;  %v316_v24 = vrot.slane %v3425_v16, 6 }
  0xe0   :  { %v2841_v23 = vpop.f32.mrf.mxu0  ;;  %682 = vst.msk [vmem:[#allocation2 + $0xc8] sm:$0xff] %vm343_vm6, %v647_v26 }
  0xe1   :  { %561 = vrot.lane.b32.xlu0 %v538_v19, %s2930_s0  ;;  %v652_v27 = vrot.slane %v3432_v20, 2  ;;  %v265_v29 = vadd.f32 %v2841_v23, %v3267_v58  ;;  %v3444_v30 = vmax.f32 %v250_v21, 0.0  ;;  %353 = vst.msk [vmem:[#allocation2 + $0xf0] sm:$0xfc] %vm341_vm8, %v316_v24  ;;  %v318_v34 = vsel %vm300_vm9, %v316_v24, %v317_v25 }
  0xe2   :  { %v259_v31 = vpop.f32.mrf.mxu0  ;;  %354 = vst.msk [vmem:[#allocation2 + $0x100] sm:$0xff] %vm343_vm6, %v318_v34  ;;  %v320_v43 = vrot.slane %v3432_v20, 6  ;;  %v650_v44 = vsel %vm632_vm7, %v648_v22, %v649_v13  ;;  %v378_v19 = vrot.slane %v3379_v49, 7 }
  0xe3   :  { %476 = vrot.lane.b32.xlu1 %v3358_v33, %s2929_s26  ;;  %687 = vst.msk [vmem:[#allocation2 + $0x138] sm:$0x3f] %vm674_vm5, %v652_v27  ;;  %v3457_v36 = vmax.f32 %v265_v29, 0.0  ;;  %v260_v37 = vadd.f32 %v3267_v58, %v259_v31  ;;  %v651_v38 = vrot.slane %v3444_v30, 2  ;;  %v319_v42 = vrot.slane %v3444_v30, 6 }
  0xe4   :  { %v2846_v40 = vpop.f32.mrf.mxu0  ;;  %684 = vst.msk [vmem:[#allocation2 + $0xf8] sm:$0xff] %vm343_vm6, %v650_v44  ;;  %v543_v29 = vrot.slane %v3367_v39, 1 }
  0xe5   :  { %401 = vrot.lane.b32.xlu0 %v375_v35, %s2931_s3  ;;  %v655_v46 = vrot.slane %v3457_v36, 2  ;;  %v3468_v47 = vmax.f32 %v260_v37, 0.0  ;;  %v1324_v58 = vadd.f32 %v2846_v40, %v3449_v32  ;;  %355 = vst.msk [vmem:[#allocation2 + $0x120] sm:$0xfc] %vm341_vm8, %v319_v42  ;;  %v321_v51 = vsel %vm300_vm9, %v319_v42, %v320_v43  ;;  %v3545_v43 = vld [vmem:[#allocation2 + $0x18] sm:$0xff] }
  0xe6   :  { %v1318_v50 = vpop.f32.mrf.mxu0  ;;  %356 = vst.msk [vmem:[#allocation2 + $0x130] sm:$0xff] %vm343_vm6, %v321_v51  ;;  %v323_v59 = vrot.slane %v3457_v36, 6  ;;  %v653_v60 = vsel %vm632_vm7, %v651_v38, %v652_v27  ;;  %v379_v37 = vrot.slane %v3367_v39, 7 }
  0xe7   :  { %567 = vrot.lane.b32.xlu1 %v540_v45, %s2930_s0  ;;  %689 = vst.msk [vmem:[#allocation2 + $0x168] sm:$0x3f] %vm674_vm5, %v655_v46  ;;  %v3478_v53 = vmax.f32 %v1324_v58, 0.0  ;;  %v1319_v55 = vadd.f32 %v3449_v32, %v1318_v50  ;;  %v654_v56 = vrot.slane %v3468_v47, 2  ;;  %v322_v57 = vrot.slane %v3468_v47, 6 }
  0xe8   :  { %v2849_v28 = vpop.f32.mrf.mxu0  ;;  %686 = vst.msk [vmem:[#allocation2 + $0x128] sm:$0xff] %vm343_vm6, %v653_v60  ;;  %v542_v58 = vrot.slane %v3379_v49, 1 }
  0xe9   :  { %482 = vrot.lane.b32.xlu0 %v3367_v39, %s2929_s26  ;;  %v1966_v33 = vrot.slane %v3478_v53, 2  ;;  %v3489_v61 = vmax.f32 %v1319_v55, 0.0  ;;  %v1822_v1 = vrot.slane %v3478_v53, 1  ;;  %357 = vst.msk [vmem:[#allocation2 + $0x150] sm:$0xfc] %vm341_vm8, %v322_v57  ;;  %v1486_v3 = vrot.slane %v3478_v53, 6 }
  0xea   :  { %v1328_v63 = vpop.f32.mrf.mxu0  ;;  %v324_v10 = vsel %vm300_vm9, %v322_v57, %v323_v59  ;;  %v656_v11 = vsel %vm632_vm7, %v654_v56, %v655_v46  ;;  %v1334_v14 = vadd.f32 %v2849_v28, %v3449_v32  ;;  %v380_v56 = vsel %vm368_vm10, %v378_v19, %v379_v37 }
  0xeb   :  { %403 = vrot.lane.b32.xlu1 %v377_v62, %s2931_s3  ;;  %v1965_v4 = vrot.slane %v3489_v61, 2  ;;  %v1329_v5 = vadd.f32 %v3449_v32, %v1328_v63  ;;  %v4791_v7 = vrot.slane %v3489_v61, 6  ;;  %v1821_v9 = vrot.slane %v3489_v61, 1  ;;  %358 = vst.msk [vmem:[#allocation2 + $0x160] sm:$0xff] %vm343_vm6, %v324_v10  ;;  %688 = vst.msk [vmem:[#allocation2 + $0x158] sm:$0xff] %vm343_vm6, %v656_v11  ;;  %v3571_v63 = vld [vmem:[#allocation2 + $0x38] sm:$0xff] }
  0xec   :  { %v2852_v8 = vpop.f32.mrf.mxu0  ;;  %v3542_v38 = vmax.f32 %v1334_v14, 0.0  ;;  %v3583_v10 = vld [vmem:[#allocation2 + $0x48] sm:$0xff] }
  0xed   :  { %565 = vrot.lane.b32.xlu0 %v541_v2, %s2930_s0  ;;  %v1967_v12 = vsel %vm632_vm7, %v1965_v4, %v1966_v33  ;;  %v3506_v13 = vmax.f32 %v1329_v5, 0.0  ;;  %v1344_v15 = vadd.f32 %v2852_v8, %v3449_v32  ;;  %v3514_v18 = vsel %vm119_vm0, %v1821_v9, %v1822_v1 }
  0xee   :  { %2029 = vst.msk [vmem:[#allocation2 + $0x8] sm:$0xff] %vm343_vm6, %v1967_v12  ;;  %v1338_v17 = vpop.f32.mrf.mxu0  ;;  %v3527_v26 = vsel %vm300_vm9, %v4791_v7, %v1486_v3  ;;  %v1970_v39 = vrot.slane %v3542_v38, 2  ;;  %v382_v2 = vrot.slane %v3390_v54, 7  ;;  %v381_v5 = vrot.slane %v3401_v0, 7  ;;  %v3586_v12 = vld [vmem:[#allocation2 + $0x68] sm:$0xff] }
  0xef   :  { %480 = vrot.lane.b32.xlu1 %v3379_v49, %s2929_s26  ;;  %v1968_v21 = vrot.slane %v3506_v13, 2  ;;  %v1339_v22 = vadd.f32 %v3449_v32, %v1338_v17  ;;  %v4792_v23 = vrot.slane %v3506_v13, 1  ;;  %v3522_v24 = vmax.f32 %v1344_v15, 0.0 }
  0xf0   :  { %v2855_v25 = vpop.f32.mrf.mxu0  ;;  %v1488_v27 = vrot.slane %v3506_v13, 6  ;;  %v546_v15 = vrot.slane %v3390_v54, 1 }
  0xf1   :  { %405 = vrot.lane.b32.xlu0 %v378_v19, %s2931_s3  ;;  %2031 = vst.msk [vmem:[#allocation2 + $0x28] sm:$0x3f] %vm674_vm5, %v1968_v21  ;;  %v3533_v31 = vmax.f32 %v1339_v22, 0.0  ;;  %v1354_v34 = vadd.f32 %v2855_v25, %v3449_v32  ;;  %v3539_v35 = vsel %vm119_vm0, %v1822_v1, %v4792_v23  ;;  %v1973_v40 = vrot.slane %v3522_v24, 2 }
  0xf2   :  { %v1348_v42 = vpop.f32.mrf.mxu0  ;;  %v1969_v44 = vsel %vm632_vm7, %v1966_v33, %v1968_v21  ;;  %v1489_v51 = vsel %vm300_vm9, %v1486_v3, %v1488_v27  ;;  %v544_v33 = vsel %vm119_vm0, %v542_v58, %v543_v29  ;;  %v4790_v22 = vrot.slane %v3542_v38, 6 }
  0xf3   :  { %571 = vrot.lane.b32.xlu1 %v543_v29, %s2930_s0  ;;  %v3549_v45 = vmax.f32 %v1354_v34, 0.0  ;;  %v1349_v46 = vadd.f32 %v3449_v32, %v1348_v42  ;;  %2030 = vst.msk [vmem:[#allocation2 + $0x18] sm:$0xff] %vm343_vm6, %v1969_v44  ;;  %v1971_v48 = vrot.slane %v3533_v31, 2  ;;  %1551 = vst.msk [vmem:[#allocation2 + $0x20] sm:$0xff] %vm343_vm6, %v1489_v51  ;;  %v1491_v25 = vrot.slane %v3533_v31, 6 }
  0xf4   :  { %2034 = vst.msk [vmem:[#allocation2 + $0x58] sm:$0x3f] %vm674_vm5, %v1973_v40  ;;  %v2858_v50 = vpop.f32.mrf.mxu0  ;;  %v1493_v29 = vrot.slane %v3522_v24, 6  ;;  %v383_v44 = vsel %vm368_vm10, %v381_v5, %v382_v2 }
  0xf5   :  { %486 = vrot.lane.b32.xlu0 %v3390_v54, %s2929_s26  ;;  %v2062_v52 = vld [vmem:[#allocation2 + $0x8] sm:$0xff]  ;;  %v3560_v55 = vmax.f32 %v1349_v46, 0.0  ;;  %v1976_v49 = vrot.slane %v3549_v45, 2  ;;  %v1364_v28 = vadd.f32 %v2858_v50, %v3449_v32  ;;  %v1972_v1 = vsel %vm632_vm7, %v1970_v39, %v1971_v48 }
  0xf6   :  { %2749 = vmatprep.mubr.msk.f32.mxu0 %vm343_vm6, %v2062_v52  ;;  %v1358_v57 = vpop.f32.mrf.mxu0  ;;  %2032 = vst.msk [vmem:[#allocation2 + $0x38] sm:$0xff] %vm343_vm6, %v1972_v1  ;;  %v1974_v11 = vsel %vm632_vm7, %v1971_v48, %v1973_v40  ;;  %v3607_v40 = vld [vmem:[#allocation2 + $0x78] sm:$0xff]  ;;  %v384_v39 = vrot.slane %v3425_v16, 7  ;;  %v385_v52 = vrot.slane %v3411_v6, 7  ;;  %v3635_v1 = vld [vmem:[#allocation2 + $0xa8] sm:$0xff] }
  0xf7   :  { %407 = vrot.lane.b32.xlu1 %v380_v56, %s2931_s3  ;;  %v1975_v59 = vrot.slane %v3560_v55, 2  ;;  %v1359_v60 = vadd.f32 %v3449_v32, %v1358_v57  ;;  %v3581_v8 = vmax.f32 %v1364_v28, 0.0  ;;  %2033 = vst.msk [vmem:[#allocation2 + $0x48] sm:$0xff] %vm343_vm6, %v1974_v11  ;;  %v1494_v28 = vsel %vm300_vm9, %v1491_v25, %v1493_v29  ;;  %v3651_v29 = vld [vmem:[#allocation2 + $0xc8] sm:$0xff] }
  0xf8   :  { %v2861_v62 = vpop.f32.mrf.mxu0  ;;  %1554 = vst.msk [vmem:[#allocation2 + $0x50] sm:$0xff] %vm343_vm6, %v1494_v28  ;;  %v545_v11 = vrot.slane %v3401_v0, 1 }
  0xf9   :  { %569 = vrot.lane.b32.xlu0 %v544_v33, %s2930_s0  ;;  %v3576_v3 = vmax.f32 %v1359_v60, 0.0  ;;  %v1374_v4 = vadd.f32 %v2861_v62, %v3449_v32  ;;  %v1977_v14 = vsel %vm632_vm7, %v1975_v59, %v1976_v49  ;;  %v1980_v46 = vrot.slane %v3581_v8, 2  ;;  %v3632_v33 = vld [vmem:[#allocation2 + $0x98] sm:$0xff] }
  0xfa   :  { %v1368_v9 = vpop.f32.mrf.mxu0  ;;  %2035 = vst.msk [vmem:[#allocation2 + $0x68] sm:$0xff] %vm343_vm6, %v1977_v14 }
  0xfb   :  { %484 = vrot.lane.b32.xlu1 %v3401_v0, %s2929_s26  ;;  %v1978_v17 = vrot.slane %v3576_v3, 2  ;;  %v3593_v19 = vmax.f32 %v1374_v4, 0.0  ;;  %v1369_v21 = vadd.f32 %v3449_v32, %v1368_v9  ;;  %v386_v9 = vsel %vm368_vm10, %v384_v39, %v385_v52 }
  0xfc   :  { %v2864_v27 = vpop.f32.mrf.mxu0 }
  0xfd   :  { %575 = vrot.lane.b32.xlu0 %v546_v15, %s2930_s0  ;;  %2037 = vst.msk [vmem:[#allocation2 + $0x88] sm:$0x3f] %vm674_vm5, %v1978_v17  ;;  %v1983_v54 = vrot.slane %v3593_v19, 2  ;;  %v3604_v34 = vmax.f32 %v1369_v21, 0.0  ;;  %v1384_v37 = vadd.f32 %v2864_v27, %v3449_v32  ;;  %v1979_v42 = vsel %vm632_vm7, %v1976_v49, %v1978_v17 }
  0xfe   :  { %v1378_v58 = vpop.f32.mrf.mxu0  ;;  %2036 = vst.msk [vmem:[#allocation2 + $0x78] sm:$0xff] %vm343_vm6, %v1979_v42  ;;  %v3624_v49 = vsel %vm300_vm9, %v4790_v22, %v1491_v25  ;;  %v3759_v22 = vld [vmem:[#allocation2 + $0x138] sm:$0xff] }
  0xff   :  { %411 = vrot.lane.b32.xlu1 %v383_v44, %s2931_s3  ;;  %2040 = vst.msk [vmem:[#allocation2 + $0xb8] sm:$0x3f] %vm674_vm5, %v1983_v54  ;;  %v1981_v48 = vrot.slane %v3604_v34, 2  ;;  %v3617_v50 = vmax.f32 %v1384_v37, 0.0  ;;  %v1379_v51 = vadd.f32 %v3449_v32, %v1378_v58  ;;  %v387_v37 = vrot.slane %v3444_v30, 7  ;;  %4813 = vst [vmem:[#allocation10_spill] sm:$0xff] %v3759_v22 }
 0x100   :  { %v2867_v56 = vpop.f32.mrf.mxu0  ;;  %v388_v58 = vrot.slane %v3432_v20, 7  ;;  %v4815_v22 = vmov 0.0  }
 0x101   :  { %409 = vrot.lane.b32.xlu0 %v381_v5, %s2931_s3  ;;  %v3628_v57 = vmax.f32 %v1379_v51, 0.0  ;;  %v1986_v59 = vrot.slane %v3617_v50, 2  ;;  %v1982_v62 = vsel %vm632_vm7, %v1980_v46, %v1981_v48  ;;  %v1984_v2 = vsel %vm632_vm7, %v1981_v48, %v1983_v54 }
 0x102   :  { %v1388_v60 = vpop.f32.mrf.mxu0  ;;  %2038 = vst.msk [vmem:[#allocation2 + $0x98] sm:$0xff] %vm343_vm6, %v1982_v62  ;;  %2039 = vst.msk [vmem:[#allocation2 + $0xa8] sm:$0xff] %vm343_vm6, %v1984_v2  ;;  %v1394_v25 = vadd.f32 %v2867_v56, %v3449_v32  ;;  %v547_v46 = vsel %vm119_vm0, %v545_v11, %v546_v15  ;;  %v389_v2 = vsel %vm368_vm10, %v387_v37, %v388_v58 }
 0x103   :  { %413 = vrot.lane.b32.xlu1 %v384_v39, %s2931_s3  ;;  %v1985_v4 = vrot.slane %v3628_v57, 2  ;;  %v1389_v5 = vadd.f32 %v3449_v32, %v1388_v60  ;;  %v3671_v60 = vld [vmem:[#allocation2 + $0xd8] sm:$0xff] }
 0x104   :  { %v2870_v14 = vpop.f32.mrf.mxu0  ;;  %v3668_v52 = vmax.f32 %v1394_v25, 0.0 }
 0x105   :  { %490 = vrot.lane.b32.xlu0 %v3411_v6, %s2929_s26  ;;  %v3647_v17 = vmax.f32 %v1389_v5, 0.0  ;;  %v1404_v21 = vadd.f32 %v2870_v14, %v3449_v32  ;;  %v1987_v54 = vsel %vm632_vm7, %v1985_v4, %v1986_v59 }
 0x106   :  { %v1398_v27 = vpop.f32.mrf.mxu0  ;;  %2041 = vst.msk [vmem:[#allocation2 + $0xc8] sm:$0xff] %vm343_vm6, %v1987_v54  ;;  %v1990_v4 = vrot.slane %v3668_v52, 2  ;;  %v3694_v54 = vld [vmem:[%s4783_s9 + $0x78] sm:$0xff] }
 0x107   :  { %4807 = vst [vmem:[#allocation4_spill] sm:$0xff] %v3647_v17  ;;  %415 = vrot.lane.b32.xlu1 %v386_v9, %s2931_s3  ;;  %v1988_v0 = vrot.slane %v3647_v17, 2  ;;  %v3657_v42 = vmax.f32 %v1404_v21, 0.0  ;;  %v1399_v44 = vadd.f32 %v3449_v32, %v1398_v27  ;;  %v549_v21 = vrot.slane %v3411_v6, 1  ;;  %2209 = vmatpush1.msra.mxu0 %v3694_v54 }
 0x108   :  { %v2873_v39 = vpop.f32.mrf.mxu0  ;;  %2210 = vmatprep.subr.mxu0 %v4793_v41 }
 0x109   :  { %573 = vrot.lane.b32.xlu0 %v547_v46, %s2930_s0  ;;  %2043 = vst.msk [vmem:[#allocation2 + $0xe8] sm:$0x3f] %vm674_vm5, %v1988_v0  ;;  %v1993_v48 = vrot.slane %v3657_v42, 2  ;;  %v3666_v51 = vmax.f32 %v1399_v44, 0.0  ;;  %v1414_v56 = vadd.f32 %v2873_v39, %v3449_v32  ;;  %v1989_v15 = vsel %vm632_vm7, %v1986_v59, %v1988_v0  ;;  %v3698_v46 = vld [vmem:[#allocation2 + $0xf8] sm:$0xff] }
 0x10a   :  { %v1408_v28 = vpop.f32.mrf.mxu0  ;;  %2042 = vst.msk [vmem:[#allocation2 + $0xd8] sm:$0xff] %vm343_vm6, %v1989_v15  ;;  %v4795_v15 = vrot.slane %v3549_v45, 6 }
 0x10b   :  { %417 = vrot.lane.b32.xlu1 %v387_v37, %s2931_s3  ;;  %2046 = vst.msk [vmem:[#allocation2 + $0x118] sm:$0x3f] %vm674_vm5, %v1993_v48  ;;  %v1409_v62 = vadd.f32 %v3449_v32, %v1408_v28  ;;  %v1991_v5 = vrot.slane %v3666_v51, 2  ;;  %v3685_v59 = vmax.f32 %v1414_v56, 0.0  ;;  %v3711_v56 = vld [vmem:[%s4783_s9 + $0x70] sm:$0xff]  ;;  %v548_v28 = vrot.slane %v3425_v16, 1 }
 0x10c   :  { %v2876_v9 = vpop.f32.mrf.mxu0  ;;  %2211 = vmatpush1.msra.mxu0 %v3711_v56 }
 0x10d   :  { %488 = vrot.lane.b32.xlu0 %v3425_v16, %s2929_s26  ;;  %v3683_v11 = vmax.f32 %v1409_v62, 0.0  ;;  %v1424_v25 = vadd.f32 %v2876_v9, %v3449_v32  ;;  %v1996_v37 = vrot.slane %v3685_v59, 2  ;;  %v1992_v58 = vsel %vm632_vm7, %v1990_v4, %v1991_v5  ;;  %2212 = vmatprep.subr.mxu0 %v4793_v41 }
 0x10e   :  { %v1418_v14 = vpop.f32.mrf.mxu0  ;;  %2044 = vst.msk [vmem:[#allocation2 + $0xf8] sm:$0xff] %vm343_vm6, %v1992_v58  ;;  %v1994_v4 = vsel %vm632_vm7, %v1991_v5, %v1993_v48  ;;  %v1498_v9 = vrot.slane %v3576_v3, 6  ;;  %v3732_v58 = vld [vmem:[%s4783_s9 + $0x68] sm:$0xff]  ;;  %v390_v48 = vrot.slane %v3468_v47, 7 }
 0x10f   :  { %419 = vrot.lane.b32.xlu1 %v389_v2, %s2931_s3  ;;  %v1419_v27 = vadd.f32 %v3449_v32, %v1418_v14  ;;  %v1995_v0 = vrot.slane %v3683_v11, 2  ;;  %v3716_v2 = vld [vmem:[#allocation2 + $0x108] sm:$0xff]  ;;  %v3722_v14 = vmax.f32 %v1424_v25, 0.0  ;;  %2213 = vmatpush1.msra.mxu0 %v3732_v58 }
 0x110   :  { %v2879_v44 = vpop.f32.mrf.mxu0  ;;  %4809 = vst [vmem:[#allocation6_spill] sm:$0xff] %v3716_v2  ;;  %2045 = vst.msk [vmem:[#allocation2 + $0x108] sm:$0xff] %vm343_vm6, %v1994_v4  ;;  %v3737_v5 = vld [vmem:[#allocation2 + $0x128] sm:$0xff]  ;;  %2214 = vmatprep.subr.mxu0 %v4793_v41  ;;  %v3751_v4 = vld [vmem:[%s4783_s9 + $0x60] sm:$0xff]  ;;  %v1499_v41 = vsel %vm300_vm9, %v4795_v15, %v1498_v9  ;;  %v4796_v9 = vrot.slane %v3604_v34, 6  ;;  %v1503_v15 = vrot.slane %v3593_v19, 6 }
 0x111   :  { %579 = vrot.lane.b32.xlu0 %v549_v21, %s2930_s0  ;;  %v3703_v6 = vmax.f32 %v1419_v27, 0.0  ;;  %v1434_v39 = vadd.f32 %v2879_v44, %v3449_v32  ;;  %4811 = vst [vmem:[#allocation8_spill] sm:$0xff] %v3737_v5  ;;  %v1997_v25 = vsel %vm632_vm7, %v1995_v0, %v1996_v37  ;;  %v3756_v0 = vld [vmem:[%s4783_s9 + $0x58] sm:$0xff]  ;;  %2215 = vmatpush1.msra.mxu0 %v3751_v4  ;;  %1557 = vst.msk [vmem:[#allocation2 + $0x80] sm:$0xff] %vm343_vm6, %v1499_v41  ;;  %v3796_v41 = vld [vmem:[%s4783_s9 + $0x48] sm:$0xff] }
 0x112   :  { %v1428_v62 = vpop.f32.mrf.mxu0  ;;  %2047 = vst.msk [vmem:[#allocation2 + $0x128] sm:$0xff] %vm343_vm6, %v1997_v25  ;;  %v550_v25 = vsel %vm119_vm0, %v548_v28, %v549_v21  ;;  %2216 = vmatprep.subr.mxu0 %v4815_v22  ;;  %v4816_v28 = vrot.slane %v3666_v51, 6 }
 0x113   :  { %4808 = vst [vmem:[#allocation5_spill] sm:$0xff] %v3703_v6  ;;  %1727 = vrot.lane.b32.xlu1 %v3478_v53, %s2929_s26  ;;  %v1998_v27 = vrot.slane %v3703_v6, 2  ;;  %v3725_v44 = vmax.f32 %v1434_v39, 0.0  ;;  %v1429_v16 = vadd.f32 %v3449_v32, %v1428_v62  ;;  %v2000_v32 = vrot.slane %v3722_v14, 2  ;;  %2217 = vmatpush1.msra.mxu0 %v3756_v0 }
 0x114   :  { %v1513_v39 = vrot.slane %v3657_v42, 6  ;;  %2218 = vmatprep.subr.mxu0 %v4815_v22 }
 0x115   :  { %4810 = vst [vmem:[#allocation7_spill] sm:$0xff] %v3725_v44  ;;  %494 = vrot.lane.b32.xlu0 %v3432_v20, %s2929_s26  ;;  %2049 = vst.msk [vmem:[#allocation2 + $0x148] sm:$0x3f] %vm674_vm5, %v1998_v27  ;;  %v3745_v62 = vmax.f32 %v1429_v16, 0.0  ;;  %v1999_v7 = vsel %vm632_vm7, %v1996_v37, %v1998_v27  ;;  %v391_v16 = vrot.slane %v3457_v36, 7  ;;  %v4814_v27 = vrot.slane %v3725_v44, 2 }
 0x116   :  { %2048 = vst.msk [vmem:[#allocation2 + $0x138] sm:$0xff] %vm343_vm6, %v1999_v7  ;;  %v3781_v7 = vld [vmem:[%s4783_s9 + $0x50] sm:$0xff]  ;;  %v3798_v37 = vld [vmem:[#allocation2 + $0x158] sm:$0xff]  ;;  %v4821_v5 = vrot.slane %v3725_v44, 2 }
 0x117   :  { %4812 = vst [vmem:[#allocation9_spill] sm:$0xff] %v3745_v62  ;;  %421 = vrot.lane.b32.xlu1 %v390_v48, %s2931_s3  ;;  %2052 = vst.msk [vmem:[#allocation2 + $0x178] sm:$0x3f] %vm674_vm5, %v4814_v27  ;;  %v4797_v23 = vrot.slane %v3745_v62, 2  ;;  %v1514_v27 = vsel %vm300_vm9, %v4816_v28, %v1513_v39  ;;  %v1518_v39 = vrot.slane %v3703_v6, 6  ;;  %v392_v28 = vsel %vm368_vm10, %v390_v48, %v391_v16 }
 0x118   :  { %4817 = vst [vmem:[#allocation11_spill] sm:$0xff] %v3798_v37  ;;  %1566 = vst.msk [vmem:[#allocation2 + $0x110] sm:$0xff] %vm343_vm6, %v1514_v27  ;;  %2219 = vmatpush1.msra.mxu0 %v3781_v7  ;;  %v1508_v37 = vrot.slane %v3647_v17, 6  ;;  %v4818_v48 = vrot.slane %v3685_v59, 6  ;;  %v552_v27 = vrot.slane %v3432_v20, 1  ;;  %v3857_v20 = vld [vmem:[%s4783_s9 + $0x28] sm:$0xff] }
 0x119   :  { %577 = vrot.lane.b32.xlu0 %v550_v25, %s2930_s0  ;;  %v2002_v21 = vsel %vm632_vm7, %v2000_v32, %v4797_v23  ;;  %v1504_v25 = vsel %vm300_vm9, %v4796_v9, %v1503_v15  ;;  %2220 = vmatprep.subr.mxu0 %v4815_v22  ;;  %v3817_v32 = vld [vmem:[%s4783_s9 + $0x40] sm:$0xff]  ;;  %v4819_v15 = vrot.slane %v3617_v50, 6  ;;  %v4800_v9 = vrot.slane %v3745_v62, 6  ;;  %v3892_v17 = vld [vmem:[#allocation2 + $0x168] sm:$0xff] }
 0x11a   :  { %2050 = vst.msk [vmem:[#allocation2 + $0x158] sm:$0xff] %vm343_vm6, %v2002_v21  ;;  %1560 = vst.msk [vmem:[#allocation2 + $0xb0] sm:$0xff] %vm343_vm6, %v1504_v25  ;;  %v1519_v16 = vsel %vm300_vm9, %v4818_v48, %v1518_v39  ;;  %2221 = vmatpush1.msra.mxu0 %v3796_v41  ;;  %v1581_v39 = vrot.slane %v3489_v61, 7  ;;  %v551_v25 = vrot.slane %v3444_v30, 1  ;;  %v3867_v48 = vld [vmem:[%s4783_s9 + $0x20] sm:$0xff]  ;;  %vm2554_vm5 = vcmask 195712  }
 0x11b   :  { %423 = vrot.lane.b32.xlu1 %v392_v28, %s2931_s3  ;;  %1569 = vst.msk [vmem:[#allocation2 + $0x140] sm:$0xff] %vm343_vm6, %v1519_v16  ;;  %v1509_v21 = vsel %vm300_vm9, %v4819_v15, %v1508_v37  ;;  %2222 = vmatprep.subr.mxu0 %v4815_v22  ;;  %v3840_v37 = vld [vmem:[%s4783_s9 + $0x38] sm:$0xff]  ;;  %v3849_v28 = vld [vmem:[%s4783_s9 + $0x30] sm:$0xff]  ;;  %v1582_v15 = vrot.slane %v3478_v53, 7  ;;  %v1523_v53 = vrot.slane %v3725_v44, 6  ;;  %4820 = vst [vmem:[#allocation12_spill] sm:$0xff] %v3892_v17 }
 0x11c   :  { %1563 = vst.msk [vmem:[#allocation2 + $0xe0] sm:$0xff] %vm343_vm6, %v1509_v21  ;;  %2223 = vmatpush1.msra.mxu0 %v3817_v32  ;;  %v3872_v16 = vld [vmem:[%s4783_s9 + $0x18] sm:$0xff]  ;;  %v553_v21 = vsel %vm119_vm0, %v551_v25, %v552_v27 }
 0x11d   :  { %492 = vrot.lane.b32.xlu0 %v3444_v30, %s2929_s26  ;;  %2224 = vmatprep.subr.mxu0 %v4815_v22  ;;  %v3882_v30 = vld [vmem:[%s4783_s9 + $0x10] sm:$0xff]  ;;  %v1583_v23 = vsel %vm368_vm10, %v1581_v39, %v1582_v15  ;;  %v1524_v2 = vsel %vm300_vm9, %v4800_v9, %v1523_v53  ;;  %v1586_v53 = vrot.slane %v3542_v38, 7  ;;  %v1584_v9 = vrot.slane %v3506_v13, 7 }
 0x11e   :  { %2225 = vmatpush1.msra.mxu0 %v3840_v37  ;;  %1572 = vst.msk [vmem:[#allocation2 + $0x170] sm:$0xff] %vm343_vm6, %v1524_v2  ;;  %v3928_v2 = vld [vmem:[%s4783_s9 + $0x98] sm:$0xff] }
 0x11f   :  { %1725 = vrot.lane.b32.xlu1 %v3489_v61, %s2929_s26  ;;  %2226 = vmatprep.subr.mxu0 %v4815_v22  ;;  %v1585_v17 = vsel %vm368_vm10, %v1582_v15, %v1584_v9 }
 0x120   :  { %2227 = vmatpush1.msra.mxu0 %v3849_v28 }
 0x121   :  { %583 = vrot.lane.b32.xlu0 %v552_v27, %s2930_s0  ;;  %2228 = vmatprep.subr.mxu0 %v4815_v22  ;;  %v4822_v27 = vrot.slane %v3745_v62, 2 }
 0x122   :  { %2229 = vmatpush1.msra.mxu0 %v3857_v20 }
 0x123   :  { %1621 = vrot.lane.b32.xlu1 %v1581_v39, %s2931_s3  ;;  %2230 = vmatprep.subr.mxu0 %v4815_v22  ;;  %v2004_v25 = vsel %vm632_vm7, %v4822_v27, %v4821_v5  ;;  %v3907_v39 = vld [vmem:[%s4783_s9 + $0x8] sm:$0xff]  ;;  %v555_v5 = vrot.slane %v3457_v36, 1  ;;  %vm1133_vm7 = vcmask 1045509  }
 0x124   :  { %2231 = vmatpush1.msra.mxu0 %v3867_v48  ;;  %2051 = vst.msk [vmem:[#allocation2 + $0x168] sm:$0xff] %vm343_vm6, %v2004_v25  ;;  %v3943_v27 = vld [vmem:[%s4783_s9 + $0x88] sm:$0xff] }
 0x125   :  { %498 = vrot.lane.b32.xlu0 %v3457_v36, %s2929_s26  ;;  %2232 = vmatprep.subr.mxu0 %v4815_v22  ;;  %v3938_v36 = vld [vmem:[%s4783_s9 + $0x90] sm:$0xff] }
 0x126   :  { %2233 = vmatpush1.msra.mxu0 %v3872_v16 }
 0x127   :  { %1731 = vrot.lane.b32.xlu1 %v3542_v38, %s2929_s26  ;;  %2234 = vmatprep.subr.mxu0 %v4815_v22 }
 0x128   :  { %2235 = vmatpush1.msra.mxu0 %v3882_v30 }
 0x129   :  { %581 = vrot.lane.b32.xlu0 %v553_v21, %s2930_s0  ;;  %2236 = vmatprep.subr.mxu0 %v4815_v22  ;;  %v554_v21 = vrot.slane %v3468_v47, 1 }
 0x12a   :  { %2237 = vmatpush1.msra.mxu0 %v3907_v39 }
 0x12b   :  { %1623 = vrot.lane.b32.xlu1 %v1583_v23, %s2931_s3  ;;  %2238 = vmatprep.subr.mxu0 %v4815_v22  ;;  %v3918_v23 = vld [vmem:[%s4783_s9] sm:$0xff]  ;;  %v556_v25 = vsel %vm119_vm0, %v554_v21, %v555_v5  ;;  %v4823_v21 = vrot.slane %v3506_v13, 1 }
 0x12c   :  { %2239 = vmatpush1.msra.mxu0 %v3918_v23 }
 0x12d   :  { %496 = vrot.lane.b32.xlu0 %v3468_v47, %s2929_s26  ;;  %2264 = vmatprep.subr.mxu0 %v4815_v22  ;;  %v3951_v47 = vld [vmem:[%s4783_s9 + $0x80] sm:$0xff] }
 0x12e   :  { %2265 = vmatpush2.msra.mxu0 %v3928_v2 }
 0x12f   :  { %1729 = vrot.lane.b32.xlu1 %v3506_v13, %s2929_s26  ;;  %2266 = vmatprep.subr.mxu0 %v4815_v22  ;;  %v1829_v13 = vrot.slane %v3522_v24, 1 }
 0x130   :  { %2267 = vmatpush2.msra.mxu0 %v3938_v36 }
 0x131   :  { %587 = vrot.lane.b32.xlu0 %v555_v5, %s2930_s0  ;;  %2268 = vmatprep.subr.mxu0 %v4815_v22 }
 0x132   :  { %2269 = vmatpush2.msra.mxu0 %v3943_v27 }
 0x133   :  { %1627 = vrot.lane.b32.xlu1 %v1586_v53, %s2931_s3  ;;  %2270 = vmatprep.subr.mxu0 %v4815_v22 }
 0x134   :  { %2271 = vmatpush2.msra.mxu0 %v3951_v47 }
 0x135   :  { %585 = vrot.lane.b32.xlu0 %v556_v25, %s2930_s0  ;;  %v1587_v25 = vrot.slane %v3533_v31, 7 }
 0x137   :  { %1735 = vrot.lane.b32.xlu1 %v3522_v24, %s2929_s26 }
 0x139   :  { %1861 = vrot.lane.b32.xlu0 %v3514_v18, %s2930_s0  ;;  %v1588_v18 = vsel %vm368_vm10, %v1586_v53, %v1587_v25 }
 0x13b   :  { %v471_v44 = vpop.permute.xlu0 %470  ;;  %1625 = vrot.lane.b32.xlu1 %v1585_v17, %s2931_s3  ;;  %v1589_v17 = vrot.slane %v3522_v24, 7  ;;  %v1826_v24 = vrot.slane %v3542_v38, 1 }
 0x13d   :  { %v560_v5 = vpop.permute.xlu1 %559  ;;  %1865 = vrot.lane.b32.xlu0 %v4823_v21, %s2930_s0  ;;  %v1590_v15 = vsel %vm368_vm10, %v1587_v25, %v1589_v17 }
 0x13f   :  { %v469_v62 = vpop.permute.xlu0 %468  ;;  %1733 = vrot.lane.b32.xlu1 %v3533_v31, %s2929_s26 }
 0x141   :  { %v558_v6 = vpop.permute.xlu1 %557  ;;  %1863 = vrot.lane.b32.xlu0 %v3539_v35, %s2930_s0 }
 0x143   :  { %v394_v9 = vpop.permute.xlu0 %393  ;;  %1629 = vrot.lane.b32.xlu1 %v1588_v18, %s2931_s3  ;;  %v4824_v18 = vrot.slane %v3489_v61, 6 }
 0x144   :  { %442 = vst.msk [vmem:[#allocation2] sm:$0xfe] %vm441_vm11, %v394_v9 }
 0x145   :  { %517 = vst.msk [vmem:[#allocation2] sm:$0xff] %vm516_vm12, %v469_v62  ;;  %1871 = vrot.lane.b32.xlu0 %v1829_v13, %s2930_s0  ;;  %v396_v35 = vpop.permute.xlu1 %395  ;;  %v1827_v62 = vrot.slane %v3533_v31, 1  ;;  %v1591_v31 = vrot.slane %v3560_v55, 7 }
 0x146   :  { %606 = vst.msk [vmem:[#allocation2] sm:$0xff] %vm605_vm13, %v558_v6 }
 0x147   :  { %444 = vst.msk [vmem:[#allocation2 + $0x10] sm:$0xff] %vm443_vm14, %v396_v35  ;;  %v475_v53 = vpop.permute.xlu0 %474  ;;  %1631 = vrot.lane.b32.xlu1 %v1590_v15, %s2931_s3  ;;  %v1830_v35 = vsel %vm119_vm0, %v1827_v62, %v1829_v13 }
 0x148   :  { %518 = vst.msk [vmem:[#allocation2 + $0x10] sm:$0xff] %vm516_vm12, %v471_v44  ;;  %v1828_v44 = vsel %vm119_vm0, %v1826_v24, %v1827_v62 }
 0x149   :  { %608 = vst.msk [vmem:[#allocation2 + $0x10] sm:$0x7f] %vm607_vm15, %v560_v5  ;;  %1739 = vrot.lane.b32.xlu0 %v3549_v45, %s2929_s26  ;;  %v473_v6 = vpop.permute.xlu1 %472 }
 0x14a   :  { %624 = vst.msk [vmem:[#allocation2 + $0x17] sm:$0x1] %vm623_vm1, %v4815_v22 }
 0x14b   :  { %v398_v21 = vpop.permute.xlu0 %397  ;;  %1737 = vrot.lane.b32.xlu1 %v3560_v55, %s2929_s26 }
 0x14c   :  { %445 = vst.msk [vmem:[#allocation2 + $0x30] sm:$0xfe] %vm441_vm11, %v398_v21  ;;  %v4825_v21 = vrot.slane %v3542_v38, 6 }
 0x14d   :  { %519 = vst.msk [vmem:[#allocation2 + $0x30] sm:$0xff] %vm516_vm12, %v473_v6  ;;  %1867 = vrot.lane.b32.xlu0 %v1828_v44, %s2930_s0  ;;  %v564_v5 = vpop.permute.xlu1 %563  ;;  %v699_v25 = vld [vmem:[#allocation2] sm:$0xff] }
 0x14e   :  { %871 = vmatmul.mubr.f32.vlgmr.msra.gmra.mxu1 %v699_v25  ;;  %1549 = vst.msk [vmem:[#allocation2] sm:$0xfc] %vm341_vm8, %v4824_v18 }
 0x14f   :  { %1573 = vst.msk [vmem:[#allocation2] sm:$0x3] %vm359_vm3, %v4815_v22  ;;  %v479_v17 = vpop.permute.xlu0 %478  ;;  %1633 = vrot.lane.b32.xlu1 %v1591_v31, %s2931_s3  ;;  %2707 = vmatprep.mubr.msk.f32.mxu1 %vm343_vm6, %v3545_v43  ;;  %v1831_v43 = vrot.slane %v3560_v55, 1 }
 0x150   :  { %1717 = vst.msk [vmem:[#allocation2] sm:$0x1] %vm459_vm4, %v4815_v22  ;;  %2900 = vmatpush1.msra.mxu1 %v3694_v54  ;;  %v1832_v54 = vrot.slane %v3549_v45, 1 }
 0x151   :  { %v701_v9 = vld [vmem:[#allocation2 + $0x10] sm:$0xff]  ;;  %1869 = vrot.lane.b32.xlu0 %v1830_v35, %s2930_s0  ;;  %v400_v61 = vpop.permute.xlu1 %399  ;;  %2881 = vmatprep.subr.mxu1 %v4815_v22 }
 0x152   :  { %1550 = vst.msk [vmem:[#allocation2 + $0x10] sm:$0xff] %vm343_vm6, %v3527_v26  ;;  %876 = vmatmul.mubr.f32.gmra.mxu1 %v701_v9  ;;  %v1606_v26 = vrot.slane %v3668_v52, 7 }
 0x153   :  { %446 = vst.msk [vmem:[#allocation2 + $0x40] sm:$0xff] %vm443_vm14, %v400_v61  ;;  %v562_v15 = vpop.permute.xlu0 %561  ;;  %1755 = vrot.lane.b32.xlu1 %v3668_v52, %s2929_s26  ;;  %2708 = vmatprep.mubr.msk.f32.mxu1 %vm343_vm6, %v3571_v63  ;;  %v1607_v61 = vrot.slane %v3666_v51, 7 }
 0x154   :  { %520 = vst.msk [vmem:[#allocation2 + $0x40] sm:$0xff] %vm516_vm12, %v475_v53  ;;  %2901 = vmatpush1.msra.mxu1 %v3711_v56  ;;  %v1833_v56 = vsel %vm119_vm0, %v1831_v43, %v1832_v54  ;;  %v1592_v53 = vrot.slane %v3549_v45, 7  ;;  %v1500_v43 = vrot.slane %v3581_v8, 6 }
 0x155   :  { %610 = vst.msk [vmem:[#allocation2 + $0x40] sm:$0x7f] %vm607_vm15, %v564_v5  ;;  %1743 = vrot.lane.b32.xlu0 %v3581_v8, %s2929_s26  ;;  %v477_v13 = vpop.permute.xlu1 %476  ;;  %2882 = vmatprep.subr.mxu1 %v4815_v22  ;;  %v1596_v5 = vrot.slane %v3581_v8, 7 }
 0x156   :  { %625 = vst.msk [vmem:[#allocation2 + $0x47] sm:$0x1] %vm623_vm1, %v4815_v22  ;;  %2902 = vmatpush1.msra.mxu1 %v3732_v58 }
 0x157   :  { %609 = vst.msk [vmem:[#allocation2 + $0x30] sm:$0xff] %vm605_vm13, %v562_v15  ;;  %v402_v63 = vpop.permute.xlu0 %401  ;;  %1651 = vrot.lane.b32.xlu1 %v1606_v26, %s2931_s3  ;;  %2883 = vmatprep.subr.mxu1 %v4815_v22 }
 0x158   :  { %447 = vst.msk [vmem:[#allocation2 + $0x60] sm:$0xfe] %vm441_vm11, %v402_v63  ;;  %2903 = vmatpush1.msra.mxu1 %v3751_v4  ;;  %v1593_v4 = vsel %vm368_vm10, %v1591_v31, %v1592_v53 }
 0x159   :  { %521 = vst.msk [vmem:[#allocation2 + $0x60] sm:$0xff] %vm516_vm12, %v477_v13  ;;  %1873 = vrot.lane.b32.xlu0 %v1833_v56, %s2930_s0  ;;  %v568_v58 = vpop.permute.xlu1 %567  ;;  %2884 = vmatprep.subr.mxu1 %v4815_v22  ;;  %v1594_v56 = vrot.slane %v3576_v3, 7 }
 0x15a   :  { %2904 = vmatpush1.msra.mxu1 %v3756_v0 }
 0x15b   :  { %v483_v62 = vpop.permute.xlu0 %482  ;;  %1759 = vrot.lane.b32.xlu1 %v3657_v42, %s2929_s26  ;;  %2885 = vmatprep.subr.mxu1 %v4815_v22 }
 0x15c   :  { %2905 = vmatpush1.msra.mxu1 %v3781_v7  ;;  %v1495_v7 = vrot.slane %v3560_v55, 6  ;;  %v1846_v55 = vrot.slane %v3668_v52, 1 }
 0x15d   :  { %v705_v6 = vld [vmem:[#allocation2 + $0x40] sm:$0xff]  ;;  %1635 = vrot.lane.b32.xlu0 %v1593_v4, %s2931_s3  ;;  %v404_v0 = vpop.permute.xlu1 %403  ;;  %2886 = vmatprep.subr.mxu1 %v4815_v22  ;;  %v4828_v4 = vrot.slane %v3617_v50, 6 }
 0x15e   :  { %v703_v24 = vld [vmem:[#allocation2 + $0x30] sm:$0xff]  ;;  %1553 = vst.msk [vmem:[#allocation2 + $0x40] sm:$0xff] %vm343_vm6, %v3624_v49  ;;  %v1849_v49 = vrot.slane %v3657_v42, 1  ;;  %2906 = vmatpush1.msra.mxu1 %v3796_v41  ;;  %v1847_v41 = vrot.slane %v3666_v51, 1 }
 0x15f   :  { %1552 = vst.msk [vmem:[#allocation2 + $0x30] sm:$0xfc] %vm341_vm8, %v4825_v21  ;;  %881 = vmatmul.mubr.f32.gmra.mxu1 %v703_v24  ;;  %v566_v38 = vpop.permute.xlu0 %565  ;;  %1757 = vrot.lane.b32.xlu1 %v3666_v51, %s2929_s26 }
 0x160   :  { %1574 = vst.msk [vmem:[#allocation2 + $0x30] sm:$0x3] %vm359_vm3, %v4815_v22  ;;  %2709 = vmatprep.mubr.msk.f32.mxu1 %vm343_vm6, %v3583_v10  ;;  %2887 = vmatprep.subr.mxu1 %v4815_v22  ;;  %v1848_v35 = vsel %vm119_vm0, %v1846_v55, %v1847_v41  ;;  %v1597_v55 = vrot.slane %v3604_v34, 7 }
 0x161   :  { %1718 = vst.msk [vmem:[#allocation2 + $0x30] sm:$0x1] %vm459_vm4, %v4815_v22  ;;  %1741 = vrot.lane.b32.xlu0 %v3576_v3, %s2929_s26  ;;  %v481_v10 = vpop.permute.xlu1 %480  ;;  %2907 = vmatpush1.msra.mxu1 %v3817_v32  ;;  %v1834_v32 = vrot.slane %v3576_v3, 1 }
 0x162   :  { %448 = vst.msk [vmem:[#allocation2 + $0x70] sm:$0xff] %vm443_vm14, %v404_v0  ;;  %2888 = vmatprep.subr.mxu1 %v4815_v22 }
 0x163   :  { %522 = vst.msk [vmem:[#allocation2 + $0x70] sm:$0xff] %vm516_vm12, %v479_v17  ;;  %886 = vmatmul.mubr.f32.gmra.mxu1 %v705_v6  ;;  %v406_v44 = vpop.permute.xlu0 %405  ;;  %1895 = vrot.lane.b32.xlu1 %v1849_v49, %s2930_s0  ;;  %v4826_v17 = vrot.slane %v3549_v45, 6  ;;  %v1835_v63 = vsel %vm119_vm0, %v1832_v54, %v1834_v32  ;;  %v1505_v45 = vrot.slane %v3628_v57, 6 }
 0x164   :  { %612 = vst.msk [vmem:[#allocation2 + $0x70] sm:$0x7f] %vm607_vm15, %v568_v58  ;;  %2710 = vmatprep.mubr.msk.f32.mxu1 %vm343_vm6, %v3586_v12  ;;  %2908 = vmatpush1.msra.mxu1 %v3840_v37 }
 0x165   :  { %626 = vst.msk [vmem:[#allocation2 + $0x77] sm:$0x1] %vm623_vm1, %v4815_v22  ;;  %1639 = vrot.lane.b32.xlu0 %v1596_v5, %s2931_s3  ;;  %v572_v12 = vpop.permute.xlu1 %571  ;;  %v1497_v9 = vsel %vm300_vm9, %v1495_v7, %v4826_v17  ;;  %2889 = vmatprep.subr.mxu1 %v4815_v22  ;;  %v1507_v0 = vsel %vm300_vm9, %v1505_v45, %v4828_v4  ;;  %v1599_v17 = vrot.slane %v3593_v19, 7 }
 0x166   :  { %611 = vst.msk [vmem:[#allocation2 + $0x60] sm:$0xff] %vm605_vm13, %v566_v38  ;;  %2909 = vmatpush1.msra.mxu1 %v3849_v28  ;;  %v1608_v28 = vsel %vm368_vm10, %v1606_v26, %v1607_v61  ;;  %v1609_v26 = vrot.slane %v3657_v42, 7  ;;  %v1595_v42 = vsel %vm368_vm10, %v1592_v53, %v1594_v56 }
 0x167   :  { %449 = vst.msk [vmem:[#allocation2 + $0x90] sm:$0xfe] %vm441_vm11, %v406_v44  ;;  %v487_v31 = vpop.permute.xlu0 %486  ;;  %1763 = vrot.lane.b32.xlu1 %v3685_v59, %s2929_s26  ;;  %2890 = vmatprep.subr.mxu1 %v4815_v22 }
 0x168   :  { %523 = vst.msk [vmem:[#allocation2 + $0x90] sm:$0xff] %vm516_vm12, %v481_v10  ;;  %2910 = vmatpush1.msra.mxu1 %v3857_v20  ;;  %v1850_v20 = vsel %vm119_vm0, %v1847_v41, %v1849_v49  ;;  %v1837_v10 = vrot.slane %v3604_v34, 1 }
 0x169   :  { %1877 = vrot.lane.b32.xlu0 %v1834_v32, %s2930_s0  ;;  %v408_v37 = vpop.permute.xlu1 %407  ;;  %2891 = vmatprep.subr.mxu1 %v4815_v22 }
 0x16a   :  { %450 = vst.msk [vmem:[#allocation2 + $0xa0] sm:$0xff] %vm443_vm14, %v408_v37  ;;  %2911 = vmatpush1.msra.mxu1 %v3867_v48  ;;  %v4827_v48 = vrot.slane %v3604_v34, 6 }
 0x16b   :  { %524 = vst.msk [vmem:[#allocation2 + $0xa0] sm:$0xff] %vm516_vm12, %v483_v62  ;;  %v570_v15 = vpop.permute.xlu0 %569  ;;  %1891 = vrot.lane.b32.xlu1 %v1848_v35, %s2930_s0  ;;  %2892 = vmatprep.subr.mxu1 %v4815_v22  ;;  %v1610_v62 = vsel %vm368_vm10, %v1607_v61, %v1609_v26  ;;  %v1600_v35 = vsel %vm368_vm10, %v1597_v55, %v1599_v17  ;;  %v1842_v26 = vrot.slane %v3617_v50, 1 }
 0x16c   :  { %v709_v18 = vld [vmem:[#allocation2 + $0x70] sm:$0xff]  ;;  %614 = vst.msk [vmem:[#allocation2 + $0xa0] sm:$0x7f] %vm607_vm15, %v572_v12  ;;  %2912 = vmatpush1.msra.mxu1 %v3872_v16  ;;  %v1502_v24 = vsel %vm300_vm9, %v1500_v43, %v4827_v48 }
 0x16d   :  { %v707_v25 = vld [vmem:[#allocation2 + $0x60] sm:$0xff]  ;;  %1556 = vst.msk [vmem:[#allocation2 + $0x70] sm:$0xff] %vm343_vm6, %v1497_v9  ;;  %1747 = vrot.lane.b32.xlu0 %v3593_v19, %s2929_s26  ;;  %2893 = vmatprep.subr.mxu1 %v4815_v22 }
 0x16e   :  { %1555 = vst.msk [vmem:[#allocation2 + $0x60] sm:$0xfc] %vm341_vm8, %v1495_v7  ;;  %891 = vmatmul.mubr.f32.gmra.mxu1 %v707_v25  ;;  %v1852_v7 = vrot.slane %v3685_v59, 1  ;;  %v1612_v25 = vrot.slane %v3685_v59, 7 }
 0x16f   :  { %1575 = vst.msk [vmem:[#allocation2 + $0x60] sm:$0x3] %vm359_vm3, %v4815_v22  ;;  %2711 = vmatprep.mubr.msk.f32.mxu1 %vm343_vm6, %v3607_v40  ;;  %v485_v40 = vpop.permute.xlu1 %484  ;;  %v576_v13 = vpop.permute.xlu0 %575  ;;  %1653 = vrot.lane.b32.xlu1 %v1608_v28, %s2931_s3 }
 0x170   :  { %1719 = vst.msk [vmem:[#allocation2 + $0x60] sm:$0x1] %vm459_vm4, %v4815_v22  ;;  %2913 = vmatpush1.msra.mxu1 %v3882_v30  ;;  %v1839_v30 = vrot.slane %v3593_v19, 1  ;;  %v1616_v19 = vrot.slane %v3722_v14, 7 }
 0x171   :  { %627 = vst.msk [vmem:[#allocation2 + $0xa7] sm:$0x1] %vm623_vm1, %v4815_v22  ;;  %1875 = vrot.lane.b32.xlu0 %v1835_v63, %s2930_s0  ;;  %2894 = vmatprep.subr.mxu1 %v4815_v22  ;;  %v1515_v63 = vrot.slane %v3683_v11, 6 }
 0x172   :  { %613 = vst.msk [vmem:[#allocation2 + $0x90] sm:$0xff] %vm605_vm13, %v570_v15  ;;  %896 = vmatmul.mubr.f32.gmra.mxu1 %v709_v18 }
 0x173   :  { %2712 = vmatprep.mubr.msk.f32.mxu1 %vm343_vm6, %v3632_v33  ;;  %v412_v33 = vpop.permute.xlu1 %411  ;;  %v410_v54 = vpop.permute.xlu0 %409  ;;  %1893 = vrot.lane.b32.xlu1 %v1850_v20, %s2930_s0  ;;  %v1841_v20 = vrot.slane %v3628_v57, 1 }
 0x174   :  { %452 = vst.msk [vmem:[#allocation2 + $0xd0] sm:$0xff] %vm443_vm14, %v412_v33  ;;  %2914 = vmatpush1.msra.mxu1 %v3907_v39  ;;  %v1611_v39 = vrot.slane %v3683_v11, 7  ;;  %v1601_v33 = vrot.slane %v3628_v57, 7 }
 0x175   :  { %526 = vst.msk [vmem:[#allocation2 + $0xd0] sm:$0xff] %vm516_vm12, %v487_v31  ;;  %1637 = vrot.lane.b32.xlu0 %v1595_v42, %s2931_s3  ;;  %2895 = vmatprep.subr.mxu1 %v4815_v22 }
 0x176   :  { %616 = vst.msk [vmem:[#allocation2 + $0xd0] sm:$0x7f] %vm607_vm15, %v576_v13  ;;  %2915 = vmatpush1.msra.mxu1 %v3918_v23  ;;  %v1836_v23 = vrot.slane %v3581_v8, 1 }
 0x177   :  { %628 = vst.msk [vmem:[#allocation2 + $0xd7] sm:$0x1] %vm623_vm1, %v4815_v22  ;;  %v414_v16 = vpop.permute.xlu1 %413  ;;  %v491_v53 = vpop.permute.xlu0 %490  ;;  %1655 = vrot.lane.b32.xlu1 %v1610_v62, %s2931_s3  ;;  %2896 = vmatprep.subr.mxu1 %v4815_v22  ;;  %v1602_v62 = vrot.slane %v3617_v50, 7 }
 0x178   :  { %v713_v3 = vld [vmem:[#allocation2 + $0xa0] sm:$0xff]  ;;  %451 = vst.msk [vmem:[#allocation2 + $0xc0] sm:$0xfe] %vm441_vm11, %v410_v54  ;;  %453 = vst.msk [vmem:[#allocation2 + $0xf0] sm:$0xfe] %vm441_vm11, %v414_v16  ;;  %2916 = vmatpush2.msra.mxu1 %v3928_v2  ;;  %v1851_v2 = vrot.slane %v3683_v11, 1  ;;  %v1843_v16 = vsel %vm119_vm0, %v1841_v20, %v1842_v26 }
 0x179   :  { %v711_v58 = vld [vmem:[#allocation2 + $0x90] sm:$0xff]  ;;  %1559 = vst.msk [vmem:[#allocation2 + $0xa0] sm:$0xff] %vm343_vm6, %v1502_v24  ;;  %1745 = vrot.lane.b32.xlu0 %v3604_v34, %s2929_s26  ;;  %2897 = vmatprep.subr.mxu1 %v4815_v22  ;;  %v1510_v34 = vrot.slane %v3668_v52, 6  ;;  %v1613_v52 = vsel %vm368_vm10, %v1611_v39, %v1612_v25  ;;  %v4833_v24 = vrot.slane %v3685_v59, 6  ;;  %v2068_v20 = vld [vmem:[#allocation2 + $0x38] sm:$0xff] }
 0x17a   :  { %1558 = vst.msk [vmem:[#allocation2 + $0x90] sm:$0xfc] %vm341_vm8, %v1500_v43  ;;  %901 = vmatmul.mubr.f32.gmra.mxu1 %v711_v58  ;;  %v1853_v41 = vsel %vm119_vm0, %v1851_v2, %v1852_v7  ;;  %v4831_v43 = vld [vmem:[#allocation6_spill] sm:$0xff]  ;;  %v4832_v58 = vld [vmem:[#allocation8_spill] sm:$0xff]  ;;  %v4834_v59 = vld [vmem:[#allocation9_spill] sm:$0xff]  ;;  %v1520_v2 = vrot.slane %v3722_v14, 6 }
 0x17b   :  { %1576 = vst.msk [vmem:[#allocation2 + $0x90] sm:$0x3] %vm359_vm3, %v4815_v22  ;;  %2713 = vmatprep.mubr.msk.f32.mxu1 %vm343_vm6, %v3635_v1  ;;  %v416_v6 = vpop.permute.xlu1 %415  ;;  %v574_v1 = vpop.permute.xlu0 %573  ;;  %1761 = vrot.lane.b32.xlu1 %v3683_v11, %s2929_s26  ;;  %v1517_v42 = vsel %vm300_vm9, %v1515_v63, %v4833_v24  ;;  %v1857_v4 = vrot.slane %v4834_v59, 1 }
 0x17c   :  { %1720 = vst.msk [vmem:[#allocation2 + $0x90] sm:$0x1] %vm459_vm4, %v4815_v22  ;;  %2917 = vmatpush2.msra.mxu1 %v3938_v36  ;;  %v1838_v36 = vsel %vm119_vm0, %v1836_v23, %v1837_v10  ;;  %v4836_v23 = vld [vmem:[#allocation10_spill] sm:$0xff] }
 0x17d   :  { %525 = vst.msk [vmem:[#allocation2 + $0xc0] sm:$0xff] %vm516_vm12, %v485_v40  ;;  %1883 = vrot.lane.b32.xlu0 %v1839_v30, %s2930_s0  ;;  %2898 = vmatprep.subr.mxu1 %v4815_v22 }
 0x17e   :  { %906 = vmatmul.mubr.f32.gmra.mxu1 %v713_v3  ;;  %454 = vst.msk [vmem:[#allocation2 + $0x100] sm:$0xff] %vm443_vm14, %v416_v6  ;;  %v717_v21 = vld [vmem:[#allocation2 + $0xd0] sm:$0xff] }
 0x17f   :  { %2714 = vmatprep.mubr.msk.f32.mxu1 %vm343_vm6, %v3651_v29  ;;  %528 = vst.msk [vmem:[#allocation2 + $0x100] sm:$0xff] %vm516_vm12, %v491_v53  ;;  %v418_v29 = vpop.permute.xlu1 %417  ;;  %v489_v38 = vpop.permute.xlu0 %488  ;;  %1657 = vrot.lane.b32.xlu1 %v1611_v39, %s2931_s3  ;;  %v4835_v39 = vld [vmem:[#allocation4_spill] sm:$0xff] }
 0x180   :  { %629 = vst.msk [vmem:[#allocation2 + $0x107] sm:$0x1] %vm623_vm1, %v4815_v22  ;;  %2918 = vmatpush2.msra.mxu1 %v3943_v27 }
 0x181   :  { %615 = vst.msk [vmem:[#allocation2 + $0xc0] sm:$0xff] %vm605_vm13, %v574_v1  ;;  %1751 = vrot.lane.b32.xlu0 %v3617_v50, %s2929_s26  ;;  %2899 = vmatprep.subr.mxu1 %v4815_v22  ;;  %v1603_v1 = vsel %vm368_vm10, %v1601_v33, %v1602_v62  ;;  %v2064_v50 = vld [vmem:[#allocation2 + $0x18] sm:$0xff] }
 0x182   :  { %1562 = vst.msk [vmem:[#allocation2 + $0xd0] sm:$0xff] %vm343_vm6, %v1507_v0  ;;  %2919 = vmatpush2.msra.mxu1 %v3951_v47 }
 0x183   :  { %455 = vst.msk [vmem:[#allocation2 + $0x120] sm:$0xfe] %vm441_vm11, %v418_v29  ;;  %v420_v49 = vpop.permute.xlu1 %419  ;;  %v580_v12 = vpop.permute.xlu0 %579  ;;  %1767 = vrot.lane.b32.xlu1 %v3722_v14, %s2929_s26 }
 0x184   :  { %527 = vst.msk [vmem:[#allocation2 + $0xf0] sm:$0xff] %vm516_vm12, %v489_v38 }
 0x185   :  { %456 = vst.msk [vmem:[#allocation2 + $0x130] sm:$0xff] %vm443_vm14, %v420_v49  ;;  %1879 = vrot.lane.b32.xlu0 %v1838_v36, %s2930_s0  ;;  %v1617_v49 = vrot.slane %v4834_v59, 7  ;;  %v4837_v36 = vld [vmem:[#allocation11_spill] sm:$0xff] }
 0x186   :  { %618 = vst.msk [vmem:[#allocation2 + $0x100] sm:$0x7f] %vm607_vm15, %v580_v12 }
 0x187   :  { %v4224_v27 = vpop.permute.xlu1 %1727  ;;  %v495_v31 = vpop.permute.xlu0 %494  ;;  %1897 = vrot.lane.b32.xlu1 %v1853_v41, %s2930_s0 }
 0x188   :  { %v715_v44 = vld [vmem:[#allocation2 + $0xc0] sm:$0xff]  ;;  %530 = vst.msk [vmem:[#allocation2 + $0x130] sm:$0xff] %vm516_vm12, %v495_v31  ;;  %v4839_v31 = vrot.slane %v4834_v59, 6 }
 0x189   :  { %1561 = vst.msk [vmem:[#allocation2 + $0xc0] sm:$0xfc] %vm341_vm8, %v1505_v45  ;;  %911 = vmatmul.mubr.f32.gmra.mxu1 %v715_v44  ;;  %v1844_v44 = vrot.slane %v4835_v39, 1 }
 0x18a   :  { %1577 = vst.msk [vmem:[#allocation2 + $0xc0] sm:$0x3] %vm359_vm3, %v4815_v22  ;;  %2715 = vmatprep.mubr.msk.f32.mxu1 %vm343_vm6, %v3671_v60  ;;  %v1598_v60 = vsel %vm368_vm10, %v1596_v5, %v1597_v55  ;;  %v4829_v5 = vrot.slane %v3666_v51, 6  ;;  %v4830_v51 = vld [vmem:[#allocation5_spill] sm:$0xff]  ;;  %v1618_v55 = vsel %vm368_vm10, %v1616_v19, %v1617_v49 }
 0x18b   :  { %1721 = vst.msk [vmem:[#allocation2 + $0xc0] sm:$0x1] %vm459_vm4, %v4815_v22  ;;  %1641 = vrot.lane.b32.xlu0 %v1598_v60, %s2931_s3  ;;  %v422_v32 = vpop.permute.xlu1 %421  ;;  %v578_v47 = vpop.permute.xlu0 %577  ;;  %1659 = vrot.lane.b32.xlu1 %v1613_v52, %s2931_s3  ;;  %v1854_v13 = vrot.slane %v4830_v51, 1  ;;  %v1614_v3 = vrot.slane %v4830_v51, 7  ;;  %v1522_v60 = vsel %vm300_vm9, %v1520_v2, %v4839_v31  ;;  %v1604_v52 = vrot.slane %v4835_v39, 7  ;;  %v2096_v31 = vld [vmem:[#allocation2 + $0x118] sm:$0xff] }
 0x18c   :  { %630 = vst.msk [vmem:[#allocation2 + $0x137] sm:$0x1] %vm623_vm1, %v4815_v22  ;;  %v1512_v18 = vsel %vm300_vm9, %v1510_v34, %v4829_v5  ;;  %vm1137_vm9 = vcmask 1047559  }
 0x18d   :  { %916 = vmatmul.mubr.f32.gmra.mxu1 %v717_v21  ;;  %457 = vst.msk [vmem:[#allocation2 + $0x150] sm:$0xfe] %vm441_vm11, %v422_v32  ;;  %v721_v8 = vld [vmem:[#allocation2 + $0x100] sm:$0xff]  ;;  %v1855_v54 = vsel %vm119_vm0, %v1852_v7, %v1854_v13  ;;  %v1615_v53 = vsel %vm368_vm10, %v1612_v25, %v1614_v3  ;;  %v1856_v21 = vrot.slane %v3722_v14, 1  ;;  %v1845_v32 = vsel %vm119_vm0, %v1842_v26, %v1844_v44 }
 0x18e   :  { %2716 = vmatprep.mubr.msk.f32.mxu1 %vm343_vm6, %v3698_v46  ;;  %617 = vst.msk [vmem:[#allocation2 + $0xf0] sm:$0xff] %vm605_vm13, %v578_v47  ;;  %v1840_v46 = vsel %vm119_vm0, %v1837_v10, %v1839_v30 }
 0x18f   :  { %1565 = vst.msk [vmem:[#allocation2 + $0x100] sm:$0xff] %vm343_vm6, %v1512_v18  ;;  %1881 = vrot.lane.b32.xlu0 %v1840_v46, %s2930_s0  ;;  %v424_v9 = vpop.permute.xlu1 %423  ;;  %v493_v37 = vpop.permute.xlu0 %492  ;;  %1765 = vrot.lane.b32.xlu1 %v4830_v51, %s2929_s26  ;;  %v1858_v10 = vsel %vm119_vm0, %v1856_v21, %v1857_v4  ;;  %v1605_v46 = vsel %vm368_vm10, %v1602_v62, %v1604_v52 }
 0x190   :  { %458 = vst.msk [vmem:[#allocation2 + $0x160] sm:$0xff] %vm443_vm14, %v424_v9  ;;  %v4840_v9 = vld [vmem:[#allocation12_spill] sm:$0xff] }
 0x191   :  { %529 = vst.msk [vmem:[#allocation2 + $0x120] sm:$0xff] %vm516_vm12, %v493_v37 }
 0x193   :  { %1643 = vrot.lane.b32.xlu0 %v1600_v35, %s2931_s3  ;;  %v1726_v61 = vpop.permute.xlu1 %1725  ;;  %v584_v40 = vpop.permute.xlu0 %583  ;;  %1663 = vrot.lane.b32.xlu1 %v1616_v19, %s2931_s3  ;;  %v2092_v19 = vld [vmem:[#allocation2 + $0xf8] sm:$0xff] }
 0x194   :  { %620 = vst.msk [vmem:[#allocation2 + $0x130] sm:$0x7f] %vm607_vm15, %v584_v40 }
 0x195   :  { %v719_v15 = vld [vmem:[#allocation2 + $0xf0] sm:$0xff] }
 0x196   :  { %1564 = vst.msk [vmem:[#allocation2 + $0xf0] sm:$0xfc] %vm341_vm8, %v1510_v34  ;;  %921 = vmatmul.mubr.f32.gmra.mxu1 %v719_v15 }
 0x197   :  { %1578 = vst.msk [vmem:[#allocation2 + $0xf0] sm:$0x3] %vm359_vm3, %v4815_v22  ;;  %1749 = vrot.lane.b32.xlu0 %v3628_v57, %s2929_s26  ;;  %v1622_v28 = vpop.permute.xlu1 %1621  ;;  %2717 = vmatprep.mubr.msk.f32.mxu1 %vm343_vm6, %v4831_v43  ;;  %v499_v56 = vpop.permute.xlu0 %498 }
 0x198   :  { %1722 = vst.msk [vmem:[#allocation2 + $0xf0] sm:$0x1] %vm459_vm4, %v4815_v22  ;;  %1901 = vrot.lane.b32.xlu1 %v1854_v13, %s2930_s0  ;;  %v2066_v13 = vld [vmem:[#allocation2 + $0x28] sm:$0xff] }
 0x199   :  { %1693 = vst.msk [vmem:[#allocation2] sm:$0xfe] %vm441_vm11, %v1622_v28 }
 0x19a   :  { %1797 = vst.msk [vmem:[#allocation2] sm:$0xff] %vm516_vm12, %v1726_v61  ;;  %532 = vst.msk [vmem:[#allocation2 + $0x160] sm:$0xff] %vm516_vm12, %v499_v56  ;;  %926 = vmatmul.mubr.f32.gmra.mxu1 %v721_v8 }
 0x19b   :  { %631 = vst.msk [vmem:[#allocation2 + $0x167] sm:$0x1] %vm623_vm1, %v4815_v22  ;;  %1645 = vrot.lane.b32.xlu0 %v1601_v33, %s2931_s3  ;;  %v1732_v11 = vpop.permute.xlu1 %1731  ;;  %2718 = vmatprep.mubr.msk.f32.mxu1 %vm343_vm6, %v4832_v58  ;;  %v582_v48 = vpop.permute.xlu0 %581  ;;  %v725_v57 = vld [vmem:[#allocation2 + $0x130] sm:$0xff] }
 0x19c   :  { %1899 = vrot.lane.b32.xlu1 %v1855_v54, %s2930_s0  ;;  %619 = vst.msk [vmem:[#allocation2 + $0x120] sm:$0xff] %vm605_vm13, %v582_v48  ;;  %v2070_v48 = vld [vmem:[#allocation2 + $0x48] sm:$0xff] }
 0x19d   :  { %1568 = vst.msk [vmem:[#allocation2 + $0x130] sm:$0xff] %vm343_vm6, %v1517_v42 }
 0x19f   :  { %1885 = vrot.lane.b32.xlu0 %v1843_v16, %s2930_s0  ;;  %v1624_v45 = vpop.permute.xlu1 %1623  ;;  %v497_v6 = vpop.permute.xlu0 %496  ;;  %v2072_v16 = vld [vmem:[#allocation2 + $0x58] sm:$0xff] }
 0x1a0   :  { %1694 = vst.msk [vmem:[#allocation2 + $0x10] sm:$0xff] %vm443_vm14, %v1624_v45  ;;  %1661 = vrot.lane.b32.xlu1 %v1615_v53, %s2931_s3 }
 0x1a1   :  { %1798 = vst.msk [vmem:[#allocation2 + $0x10] sm:$0xff] %vm516_vm12, %v4224_v27  ;;  %531 = vst.msk [vmem:[#allocation2 + $0x150] sm:$0xff] %vm516_vm12, %v497_v6  ;;  %v4838_v27 = vld [vmem:[#allocation7_spill] sm:$0xff]  ;;  %v2074_v6 = vld [vmem:[#allocation2 + $0x68] sm:$0xff] }
 0x1a2   :  { %v1859_v41 = vrot.slane %v4838_v27, 1  ;;  %v1619_v8 = vrot.slane %v4838_v27, 7 }
 0x1a3   :  { %1647 = vrot.lane.b32.xlu0 %v1603_v1, %s2931_s3  ;;  %v1730_v30 = vpop.permute.xlu1 %1729  ;;  %v723_v0 = vld [vmem:[#allocation2 + $0x120] sm:$0xff]  ;;  %v588_v29 = vpop.permute.xlu0 %587 }
 0x1a4   :  { %1769 = vrot.lane.b32.xlu1 %v4834_v59, %s2929_s26  ;;  %1567 = vst.msk [vmem:[#allocation2 + $0x120] sm:$0xfc] %vm341_vm8, %v1515_v63  ;;  %931 = vmatmul.mubr.f32.gmra.mxu1 %v723_v0  ;;  %v1860_v47 = vsel %vm119_vm0, %v1857_v4, %v1859_v41  ;;  %v1620_v37 = vsel %vm368_vm10, %v1617_v49, %v1619_v8  ;;  %v2076_v59 = vld [vmem:[#allocation2 + $0x78] sm:$0xff]  ;;  %vm1060_vm0 = vcmask 130112   ;;  %vm2662_vm10 = vcmask 195584  }
 0x1a5   :  { %1579 = vst.msk [vmem:[#allocation2 + $0x120] sm:$0x3] %vm359_vm3, %v4815_v22  ;;  %2719 = vmatprep.mubr.msk.f32.mxu1 %vm343_vm6, %v4836_v23 }
 0x1a6   :  { %622 = vst.msk [vmem:[#allocation2 + $0x160] sm:$0x7f] %vm607_vm15, %v588_v29 }
 0x1a7   :  { %1723 = vst.msk [vmem:[#allocation2 + $0x120] sm:$0x1] %vm459_vm4, %v4815_v22  ;;  %1753 = vrot.lane.b32.xlu0 %v4835_v39, %s2929_s26  ;;  %v1628_v38 = vpop.permute.xlu1 %1627  ;;  %v586_v7 = vpop.permute.xlu0 %585 }
 0x1a8   :  { %1696 = vst.msk [vmem:[#allocation2 + $0x30] sm:$0xfe] %vm441_vm11, %v1628_v38  ;;  %1903 = vrot.lane.b32.xlu1 %v1858_v10, %s2930_s0  ;;  %936 = vmatmul.mubr.f32.gmra.mxu1 %v725_v57 }
 0x1a9   :  { %1800 = vst.msk [vmem:[#allocation2 + $0x30] sm:$0xff] %vm516_vm12, %v1732_v11  ;;  %2720 = vmatprep.mubr.msk.f32.mxu1 %vm343_vm6, %v4837_v36 }
 0x1aa   :  { %621 = vst.msk [vmem:[#allocation2 + $0x150] sm:$0xff] %vm605_vm13, %v586_v7 }
 0x1ab   :  { %1889 = vrot.lane.b32.xlu0 %v1844_v44, %s2930_s0  ;;  %v1736_v12 = vpop.permute.xlu1 %1735  ;;  %v1862_v25 = vpop.permute.xlu0 %1861  ;;  %v2094_v44 = vld [vmem:[#allocation2 + $0x108] sm:$0xff] }
 0x1ac   :  { %1665 = vrot.lane.b32.xlu1 %v1618_v55, %s2931_s3  ;;  %1933 = vst.msk [vmem:[#allocation2] sm:$0xff] %vm605_vm13, %v1862_v25 }
 0x1ad   :  { %v729_v34 = vld [vmem:[#allocation2 + $0x160] sm:$0xff] }
 0x1ae   :  { %1571 = vst.msk [vmem:[#allocation2 + $0x160] sm:$0xff] %vm343_vm6, %v1522_v60 }
 0x1af   :  { %1887 = vrot.lane.b32.xlu0 %v1845_v32, %s2930_s0  ;;  %v1626_v14 = vpop.permute.xlu1 %1625  ;;  %v1866_v18 = vpop.permute.xlu0 %1865 }
 0x1b0   :  { %1695 = vst.msk [vmem:[#allocation2 + $0x20] sm:$0xff] %vm443_vm14, %v1626_v14  ;;  %1905 = vrot.lane.b32.xlu1 %v1860_v47, %s2930_s0  ;;  %v2080_v14 = vld [vmem:[#allocation2 + $0x98] sm:$0xff] }
 0x1b1   :  { %v727_v5 = vld [vmem:[#allocation2 + $0x150] sm:$0xff]  ;;  %1799 = vst.msk [vmem:[#allocation2 + $0x20] sm:$0xff] %vm516_vm12, %v1730_v30 }
 0x1b2   :  { %1570 = vst.msk [vmem:[#allocation2 + $0x150] sm:$0xfc] %vm341_vm8, %v1520_v2  ;;  %941 = vmatmul.mubr.f32.gmra.mxu1 %v727_v5  ;;  %v2098_v5 = vld [vmem:[#allocation2 + $0x128] sm:$0xff]  ;;  %vm1135_vm8 = vcmask 1046534  }
 0x1b3   :  { %1580 = vst.msk [vmem:[#allocation2 + $0x150] sm:$0x3] %vm359_vm3, %v4815_v22  ;;  %1649 = vrot.lane.b32.xlu0 %v1605_v46, %s2931_s3  ;;  %v1734_v17 = vpop.permute.xlu1 %1733  ;;  %2721 = vmatprep.mubr.msk.f32.mxu1 %vm343_vm6, %v4840_v9  ;;  %v1864_v51 = vpop.permute.xlu0 %1863  ;;  %v2061_v35 = vld [vmem:[#allocation2] sm:$0xff]  ;;  %vm1127_vm3 = vcmask 1042434  }
 0x1b4   :  { %1957 = vst.msk [vmem:[#allocation2 + $0x27] sm:$0x1] %vm623_vm1, %v4815_v22  ;;  %1667 = vrot.lane.b32.xlu1 %v1620_v37, %s2931_s3  ;;  %2273 = vmatmul.mubr.f32.vlgmr.msra.gmra.mxu0 %v2061_v35 }
 0x1b5   :  { %1935 = vst.msk [vmem:[#allocation2 + $0x20] sm:$0x7f] %vm607_vm15, %v1866_v18  ;;  %2750 = vmatprep.mubr.msk.f32.mxu0 %vm343_vm6, %v2064_v50  ;;  %v2082_v50 = vld [vmem:[#allocation2 + $0xa8] sm:$0xff] }
 0x1b6   :  { %1724 = vst.msk [vmem:[#allocation2 + $0x150] sm:$0x1] %vm459_vm4, %v4815_v22  ;;  %946 = vmatmul.mubr.f32.gmra.mxu1 %v729_v34  ;;  %vm1129_vm4 = vcmask 1043459  }
 0x1b7   :  { %1934 = vst.msk [vmem:[#allocation2 + $0x10] sm:$0xff] %vm605_vm13, %v1864_v51  ;;  %1771 = vrot.lane.b32.xlu0 %v4838_v27, %s2929_s26  ;;  %v1630_v61 = vpop.permute.xlu1 %1629  ;;  %2764 = vmatprep.mubr.msk.f32.mxu1 %vm343_vm6, %v2092_v19  ;;  %v1872_v15 = vpop.permute.xlu0 %1871 }
 0x1b8   :  { %1697 = vst.msk [vmem:[#allocation2 + $0x40] sm:$0xff] %vm443_vm14, %v1630_v61  ;;  %1907 = vrot.lane.b32.xlu1 %v1859_v41, %s2930_s0  ;;  %v2078_v41 = vld [vmem:[#allocation2 + $0x88] sm:$0xff] }
 0x1b9   :  { %1801 = vst.msk [vmem:[#allocation2 + $0x40] sm:$0xff] %vm516_vm12, %v1734_v17 }
 0x1bb   :  { %v1632_v40 = vpop.permute.xlu1 %1631  ;;  %v1740_v28 = vpop.permute.xlu0 %1739 }
 0x1bc   :  { %1698 = vst.msk [vmem:[#allocation2 + $0x50] sm:$0xff] %vm443_vm14, %v1632_v40  ;;  %v2065_v33 = vld [vmem:[#allocation2 + $0x20] sm:$0xff] }
 0x1bd   :  { %1802 = vst.msk [vmem:[#allocation2 + $0x50] sm:$0xff] %vm516_vm12, %v1736_v12 }
 0x1be   :  { %v2063_v43 = vld [vmem:[#allocation2 + $0x10] sm:$0xff]  ;;  %1938 = vst.msk [vmem:[#allocation2 + $0x50] sm:$0x7f] %vm607_vm15, %v1872_v15  ;;  %v2100_v15 = vld [vmem:[#allocation2 + $0x138] sm:$0xff] }
 0x1bf   :  { %1958 = vst.msk [vmem:[#allocation2 + $0x57] sm:$0x1] %vm623_vm1, %v4815_v22  ;;  %2278 = vmatmul.mubr.f32.gmra.mxu0 %v2063_v43  ;;  %v1738_v63 = vpop.permute.xlu1 %1737  ;;  %v1868_v56 = vpop.permute.xlu0 %1867 }
 0x1c0   :  { %2751 = vmatprep.mubr.msk.f32.mxu0 %vm343_vm6, %v2066_v13  ;;  %1936 = vst.msk [vmem:[#allocation2 + $0x30] sm:$0xff] %vm605_vm13, %v1868_v56 }
 0x1c3   :  { %2283 = vmatmul.mubr.f32.gmra.mxu0 %v2065_v33  ;;  %v1634_v26 = vpop.permute.xlu1 %1633  ;;  %v1870_v11 = vpop.permute.xlu0 %1869 }
 0x1c4   :  { %2752 = vmatprep.mubr.msk.f32.mxu0 %vm343_vm6, %v2068_v20  ;;  %1699 = vst.msk [vmem:[#allocation2 + $0x60] sm:$0xfe] %vm441_vm11, %v1634_v26  ;;  %v4455_v20 = vld [vmem:[%s4784_s4] ss:$0 sm:$0xff] }
 0x1c5   :  { %1803 = vst.msk [vmem:[#allocation2 + $0x60] sm:$0xff] %vm516_vm12, %v1738_v63  ;;  %v2084_v63 = vld [vmem:[#allocation2 + $0xb8] sm:$0xff] }
 0x1c6   :  { %1937 = vst.msk [vmem:[#allocation2 + $0x40] sm:$0xff] %vm605_vm13, %v1870_v11  ;;  %v2071_v53 = vld [vmem:[#allocation2 + $0x50] sm:$0xff] }
 0x1c7   :  { %v1756_v58 = vpop.permute.xlu1 %1755  ;;  %v1744_v54 = vpop.permute.xlu0 %1743  ;;  %v2067_v3 = vld [vmem:[#allocation2 + $0x30] sm:$0xff] }
 0x1c8   :  { %2288 = vmatmul.mubr.f32.gmra.mxu0 %v2067_v3 }
 0x1c9   :  { %2753 = vmatprep.mubr.msk.f32.mxu0 %vm343_vm6, %v2070_v48 }
 0x1cb   :  { %v1652_v57 = vpop.permute.xlu1 %1651  ;;  %v1874_v24 = vpop.permute.xlu0 %1873 }
 0x1cc   :  { %1708 = vst.msk [vmem:[#allocation2 + $0xf0] sm:$0xfe] %vm441_vm11, %v1652_v57  ;;  %v4464_v57 = vld [vmem:[%s4785_s5] sm:$0xff] }
 0x1cd   :  { %1812 = vst.msk [vmem:[#allocation2 + $0xf0] sm:$0xff] %vm516_vm12, %v1756_v58  ;;  %v2069_v42 = vld [vmem:[#allocation2 + $0x40] sm:$0xff] }
 0x1ce   :  { %1939 = vst.msk [vmem:[#allocation2 + $0x60] sm:$0xff] %vm605_vm13, %v1874_v24  ;;  %2293 = vmatmul.mubr.f32.gmra.mxu0 %v2069_v42 }
 0x1cf   :  { %v1760_v62 = vpop.permute.xlu1 %1759  ;;  %2754 = vmatprep.mubr.msk.f32.mxu0 %vm343_vm6, %v2072_v16  ;;  %v1636_v45 = vpop.permute.xlu0 %1635 }
 0x1d0   :  { %1700 = vst.msk [vmem:[#allocation2 + $0x70] sm:$0xff] %vm443_vm14, %v1636_v45 }
 0x1d1   :  { %1804 = vst.msk [vmem:[#allocation2 + $0x70] sm:$0xff] %vm516_vm12, %v1740_v28 }
 0x1d2   :  { %2298 = vmatmul.mubr.f32.gmra.mxu0 %v2071_v53 }
 0x1d3   :  { %v1758_v1 = vpop.permute.xlu1 %1757  ;;  %2755 = vmatprep.mubr.msk.f32.mxu0 %vm343_vm6, %v2074_v6  ;;  %v1742_v30 = vpop.permute.xlu0 %1741 }
 0x1d5   :  { %v2073_v21 = vld [vmem:[#allocation2 + $0x60] sm:$0xff] }
 0x1d6   :  { %2303 = vmatmul.mubr.f32.gmra.mxu0 %v2073_v21 }
 0x1d7   :  { %v1896_v4 = vpop.permute.xlu1 %1895  ;;  %2756 = vmatprep.mubr.msk.f32.mxu0 %vm343_vm6, %v2076_v59  ;;  %v1640_v0 = vpop.permute.xlu0 %1639 }
 0x1d8   :  { %1702 = vst.msk [vmem:[#allocation2 + $0x90] sm:$0xfe] %vm441_vm11, %v1640_v0 }
 0x1d9   :  { %1806 = vst.msk [vmem:[#allocation2 + $0x90] sm:$0xff] %vm516_vm12, %v1744_v54  ;;  %v2086_v54 = vld [vmem:[#allocation2 + $0xc8] sm:$0xff] }
 0x1db   :  { %v1764_v29 = vpop.permute.xlu1 %1763  ;;  %v1878_v39 = vpop.permute.xlu0 %1877 }
 0x1df   :  { %v1892_v38 = vpop.permute.xlu1 %1891  ;;  %v4408_v23 = vpop.permute.xlu0 %1747 }
 0x1e0   :  { %1948 = vst.msk [vmem:[#allocation2 + $0xf0] sm:$0xff] %vm605_vm13, %v1892_v38 }
 0x1e3   :  { %v1654_v10 = vpop.permute.xlu1 %1653  ;;  %v1876_v49 = vpop.permute.xlu0 %1875 }
 0x1e4   :  { %1709 = vst.msk [vmem:[#allocation2 + $0x100] sm:$0xff] %vm443_vm14, %v1654_v10  ;;  %v2088_v10 = vld [vmem:[#allocation2 + $0xd8] sm:$0xff] }
 0x1e5   :  { %1813 = vst.msk [vmem:[#allocation2 + $0x100] sm:$0xff] %vm516_vm12, %v1758_v1  ;;  %v4477_v1 = vld [vmem:[%s4785_s5 + $0x8] sm:$0xff] }
 0x1e6   :  { %1940 = vst.msk [vmem:[#allocation2 + $0x70] sm:$0xff] %vm605_vm13, %v1876_v49 }
 0x1e7   :  { %v1894_v2 = vpop.permute.xlu1 %1893  ;;  %v2091_v7 = vld [vmem:[#allocation2 + $0xf0] sm:$0xff]  ;;  %v1638_v12 = vpop.permute.xlu0 %1637 }
 0x1e8   :  { %1949 = vst.msk [vmem:[#allocation2 + $0x100] sm:$0xff] %vm605_vm13, %v1894_v2  ;;  %2348 = vmatmul.mubr.f32.vlgmr.msra.gmra.mxu1 %v2091_v7 }
 0x1e9   :  { %2765 = vmatprep.mubr.msk.f32.mxu1 %vm343_vm6, %v2094_v44  ;;  %1701 = vst.msk [vmem:[#allocation2 + $0x80] sm:$0xff] %vm443_vm14, %v1638_v12 }
 0x1ea   :  { %1805 = vst.msk [vmem:[#allocation2 + $0x80] sm:$0xff] %vm516_vm12, %v1742_v30 }
 0x1eb   :  { %v1656_v36 = vpop.permute.xlu1 %1655  ;;  %1941 = vst.msk [vmem:[#allocation2 + $0x80] sm:$0x7f] %vm607_vm15, %v1878_v39  ;;  %v1746_v55 = vpop.permute.xlu0 %1745 }
 0x1ec   :  { %1959 = vst.msk [vmem:[#allocation2 + $0x87] sm:$0x1] %vm623_vm1, %v4815_v22 }
 0x1ed   :  { %1710 = vst.msk [vmem:[#allocation2 + $0x110] sm:$0xff] %vm443_vm14, %v1656_v36  ;;  %v2075_v27 = vld [vmem:[#allocation2 + $0x70] sm:$0xff]  ;;  %v2104_v36 = vld [vmem:[#allocation2 + $0x158] sm:$0xff] }
 0x1ee   :  { %1814 = vst.msk [vmem:[#allocation2 + $0x110] sm:$0xff] %vm516_vm12, %v1760_v62  ;;  %2308 = vmatmul.mubr.f32.gmra.mxu0 %v2075_v27 }
 0x1ef   :  { %1950 = vst.msk [vmem:[#allocation2 + $0x110] sm:$0x7f] %vm607_vm15, %v1896_v4  ;;  %v1762_v25 = vpop.permute.xlu1 %1761  ;;  %2757 = vmatprep.mubr.msk.f32.mxu0 %vm343_vm6, %v2078_v41  ;;  %v2093_v34 = vld [vmem:[#allocation2 + $0x100] sm:$0xff]  ;;  %v1884_v60 = vpop.permute.xlu0 %1883 }
 0x1f0   :  { %1962 = vst.msk [vmem:[#allocation2 + $0x117] sm:$0x1] %vm623_vm1, %v4815_v22  ;;  %2353 = vmatmul.mubr.f32.gmra.mxu1 %v2093_v34 }
 0x1f1   :  { %2766 = vmatprep.mubr.msk.f32.mxu1 %vm343_vm6, %v2096_v31 }
 0x1f3   :  { %v1658_v32 = vpop.permute.xlu1 %1657  ;;  %v2077_v52 = vld [vmem:[#allocation2 + $0x80] sm:$0xff]  ;;  %v4429_v47 = vpop.permute.xlu0 %1751 }
 0x1f4   :  { %1711 = vst.msk [vmem:[#allocation2 + $0x120] sm:$0xfe] %vm441_vm11, %v1658_v32  ;;  %2313 = vmatmul.mubr.f32.gmra.mxu0 %v2077_v52 }
 0x1f5   :  { %1815 = vst.msk [vmem:[#allocation2 + $0x120] sm:$0xff] %vm516_vm12, %v1762_v25  ;;  %2758 = vmatprep.mubr.msk.f32.mxu0 %vm343_vm6, %v2080_v14 }
 0x1f7   :  { %v2095_v8 = vld [vmem:[#allocation2 + $0x110] sm:$0xff]  ;;  %v1768_v18 = vpop.permute.xlu1 %1767  ;;  %v1880_v46 = vpop.permute.xlu0 %1879 }
 0x1f8   :  { %2358 = vmatmul.mubr.f32.gmra.mxu1 %v2095_v8  ;;  %1942 = vst.msk [vmem:[#allocation2 + $0x90] sm:$0xff] %vm605_vm13, %v1880_v46  ;;  %v2106_v8 = vld [vmem:[#allocation2 + $0x168] sm:$0xff] }
 0x1f9   :  { %2767 = vmatprep.mubr.msk.f32.mxu1 %vm343_vm6, %v2098_v5 }
 0x1fb   :  { %v1898_v17 = vpop.permute.xlu1 %1897 }
 0x1fc   :  { %1951 = vst.msk [vmem:[#allocation2 + $0x120] sm:$0xff] %vm605_vm13, %v1898_v17 }
 0x1fd   :  { %v1642_v9 = vpop.permute.xlu0 %1641 }
 0x1fe   :  { %1703 = vst.msk [vmem:[#allocation2 + $0xa0] sm:$0xff] %vm443_vm14, %v1642_v9 }
 0x1ff   :  { %1807 = vst.msk [vmem:[#allocation2 + $0xa0] sm:$0xff] %vm516_vm12, %v1746_v55  ;;  %v1660_v37 = vpop.permute.xlu1 %1659  ;;  %v2079_v35 = vld [vmem:[#allocation2 + $0x90] sm:$0xff] }
 0x200   :  { %1712 = vst.msk [vmem:[#allocation2 + $0x130] sm:$0xff] %vm443_vm14, %v1660_v37  ;;  %2318 = vmatmul.mubr.f32.gmra.mxu0 %v2079_v35 }
 0x201   :  { %1816 = vst.msk [vmem:[#allocation2 + $0x130] sm:$0xff] %vm516_vm12, %v1764_v29  ;;  %v1882_v51 = vpop.permute.xlu0 %1881  ;;  %2759 = vmatprep.mubr.msk.f32.mxu0 %vm343_vm6, %v2082_v50  ;;  %v2102_v29 = vld [vmem:[#allocation2 + $0x148] sm:$0xff] }
 0x202   :  { %1943 = vst.msk [vmem:[#allocation2 + $0xa0] sm:$0xff] %vm605_vm13, %v1882_v51 }
 0x203   :  { %v1766_v61 = vpop.permute.xlu1 %1765  ;;  %v2097_v19 = vld [vmem:[#allocation2 + $0x120] sm:$0xff] }
 0x204   :  { %2363 = vmatmul.mubr.f32.gmra.mxu1 %v2097_v19 }
 0x205   :  { %v1644_v40 = vpop.permute.xlu0 %1643  ;;  %2768 = vmatprep.mubr.msk.f32.mxu1 %vm343_vm6, %v2100_v15 }
 0x206   :  { %1704 = vst.msk [vmem:[#allocation2 + $0xb0] sm:$0xff] %vm443_vm14, %v1644_v40 }
 0x207   :  { %1808 = vst.msk [vmem:[#allocation2 + $0xb0] sm:$0xff] %vm516_vm12, %v4408_v23  ;;  %v1664_v28 = vpop.permute.xlu1 %1663 }
 0x208   :  { %1944 = vst.msk [vmem:[#allocation2 + $0xb0] sm:$0x7f] %vm607_vm15, %v1884_v60 }
 0x209   :  { %1960 = vst.msk [vmem:[#allocation2 + $0xb7] sm:$0x1] %vm623_vm1, %v4815_v22  ;;  %v1750_v43 = vpop.permute.xlu0 %1749  ;;  %v2081_v13 = vld [vmem:[#allocation2 + $0xa0] sm:$0xff] }
 0x20a   :  { %1714 = vst.msk [vmem:[#allocation2 + $0x150] sm:$0xfe] %vm441_vm11, %v1664_v28  ;;  %2323 = vmatmul.mubr.f32.gmra.mxu0 %v2081_v13 }
 0x20b   :  { %1818 = vst.msk [vmem:[#allocation2 + $0x150] sm:$0xff] %vm516_vm12, %v1768_v18  ;;  %v1902_v56 = vpop.permute.xlu1 %1901  ;;  %2760 = vmatprep.mubr.msk.f32.mxu0 %vm343_vm6, %v2084_v63 }
 0x20d   :  { %v1646_v33 = vpop.permute.xlu0 %1645 }
 0x20e   :  { %1705 = vst.msk [vmem:[#allocation2 + $0xc0] sm:$0xfe] %vm441_vm11, %v1646_v33  ;;  %v872_v58 = vpop.f32.mrf.mxu1  ;;  %vm1140_vm11 = vcmask 130048  }
 0x20f   :  { %1809 = vst.msk [vmem:[#allocation2 + $0xc0] sm:$0xff] %vm516_vm12, %v1750_v43  ;;  %v1900_v26 = vpop.permute.xlu1 %1899  ;;  %v873_v3 = vadd.f32 %v4455_v20, %v872_v58  ;;  %v2108_v43 = vld [vmem:[#allocation2 + $0x178] sm:$0xff] }
 0x210   :  { %v2083_v11 = vld [vmem:[#allocation2 + $0xb0] sm:$0xff]  ;;  %1952 = vst.msk [vmem:[#allocation2 + $0x130] sm:$0xff] %vm605_vm13, %v1900_v26  ;;  %v874_v24 = vpop.f32.mrf.mxu1 }
 0x211   :  { %2328 = vmatmul.mubr.f32.gmra.mxu0 %v2083_v11  ;;  %v1886_v48 = vpop.permute.xlu0 %1885  ;;  %v951_v42 = vmax.f32 %v873_v3, 0.0 }
 0x212   :  { %2761 = vmatprep.mubr.msk.f32.mxu0 %vm343_vm6, %v2086_v54  ;;  %1945 = vst.msk [vmem:[#allocation2 + $0xc0] sm:$0xff] %vm605_vm13, %v1886_v48  ;;  %v877_v62 = vpop.f32.mrf.mxu1 }
 0x213   :  { %v1662_v16 = vpop.permute.xlu1 %1661  ;;  %v969_v45 = vmul.f32 %v4464_v57, %v951_v42  ;;  %v878_v53 = vadd.f32 %v4455_v20, %v877_v62 }
 0x214   :  { %1713 = vst.msk [vmem:[#allocation2 + $0x140] sm:$0xff] %vm443_vm14, %v1662_v16  ;;  %v879_v30 = vpop.f32.mrf.mxu1 }
 0x215   :  { %1817 = vst.msk [vmem:[#allocation2 + $0x140] sm:$0xff] %vm516_vm12, %v1766_v61  ;;  %v1648_v6 = vpop.permute.xlu0 %1647  ;;  %v952_v21 = vmax.f32 %v878_v53, 0.0  ;;  %v985_v4 = vsel %vm343_vm6, %v969_v45, 0.0  ;;  %v2090_v61 = vld [vmem:[#allocation2 + $0xe8] sm:$0xff] }
 0x216   :  { %1953 = vst.msk [vmem:[#allocation2 + $0x140] sm:$0x7f] %vm607_vm15, %v1902_v56  ;;  %986 = vadd.xlane.f32.xlu1 %v985_v4 }
 0x217   :  { %1963 = vst.msk [vmem:[#allocation2 + $0x147] sm:$0x1] %vm623_vm1, %v4815_v22  ;;  %v1770_v59 = vpop.permute.xlu1 %1769  ;;  %v2099_v0 = vld [vmem:[#allocation2 + $0x130] sm:$0xff]  ;;  %v970_v39 = vmul.f32 %v4477_v1, %v952_v21 }
 0x218   :  { %1706 = vst.msk [vmem:[#allocation2 + $0xd0] sm:$0xff] %vm443_vm14, %v1648_v6  ;;  %2368 = vmatmul.mubr.f32.gmra.mxu1 %v2099_v0 }
 0x219   :  { %1810 = vst.msk [vmem:[#allocation2 + $0xd0] sm:$0xff] %vm516_vm12, %v4429_v47  ;;  %v1754_v38 = vpop.permute.xlu0 %1753  ;;  %2769 = vmatprep.mubr.msk.f32.mxu1 %vm343_vm6, %v2102_v29  ;;  %v2085_v23 = vld [vmem:[#allocation2 + $0xc0] sm:$0xff]  ;;  %v988_v2 = vsel %vm343_vm6, %v970_v39, 0.0 }
 0x21a   :  { %2333 = vmatmul.mubr.f32.gmra.mxu0 %v2085_v23  ;;  %989 = vadd.xlane.f32.xlu0 %v988_v2 }
 0x21b   :  { %v1904_v49 = vpop.permute.xlu1 %1903  ;;  %2762 = vmatprep.mubr.msk.f32.mxu0 %vm343_vm6, %v2088_v10 }
 0x21c   :  { %1954 = vst.msk [vmem:[#allocation2 + $0x150] sm:$0xff] %vm605_vm13, %v1904_v49 }
 0x21d   :  { %v1890_v7 = vpop.permute.xlu0 %1889 }
 0x21e   :  { %v2101_v44 = vld [vmem:[#allocation2 + $0x140] sm:$0xff] }
 0x21f   :  { %v882_v12 = vpop.f32.mrf.mxu1  ;;  %2373 = vmatmul.mubr.f32.gmra.mxu1 %v2101_v44  ;;  %v1666_v27 = vpop.permute.xlu1 %1665 }
 0x220   :  { %v883_v55 = vadd.f32 %v4455_v20, %v882_v12  ;;  %2770 = vmatprep.mubr.msk.f32.mxu1 %vm343_vm6, %v2104_v36  ;;  %1715 = vst.msk [vmem:[#allocation2 + $0x160] sm:$0xff] %vm443_vm14, %v1666_v27 }
 0x221   :  { %v884_v41 = vpop.f32.mrf.mxu1  ;;  %1819 = vst.msk [vmem:[#allocation2 + $0x160] sm:$0xff] %vm516_vm12, %v1770_v59  ;;  %v1888_v34 = vpop.permute.xlu0 %1887 }
 0x222   :  { %v953_v25 = vmax.f32 %v883_v55, 0.0  ;;  %1946 = vst.msk [vmem:[#allocation2 + $0xd0] sm:$0xff] %vm605_vm13, %v1888_v34 }
 0x223   :  { %v887_v31 = vpop.f32.mrf.mxu1  ;;  %v1906_v52 = vpop.permute.xlu1 %1905  ;;  %v2103_v14 = vld [vmem:[#allocation2 + $0x150] sm:$0xff] }
 0x224   :  { %v971_v60 = vmul.f32 %v4464_v57, %v953_v25  ;;  %v888_v32 = vadd.f32 %v4455_v20, %v887_v31  ;;  %1955 = vst.msk [vmem:[#allocation2 + $0x160] sm:$0xff] %vm605_vm13, %v1906_v52  ;;  %2378 = vmatmul.mubr.f32.gmra.mxu1 %v2103_v14 }
 0x225   :  { %v889_v47 = vpop.f32.mrf.mxu1  ;;  %v1650_v18 = vpop.permute.xlu0 %1649  ;;  %2771 = vmatprep.mubr.msk.f32.mxu1 %vm343_vm6, %v2106_v8 }
 0x226   :  { %v954_v5 = vmax.f32 %v888_v32, 0.0  ;;  %v991_v46 = vsel %vm343_vm6, %v971_v60, 0.0  ;;  %1707 = vst.msk [vmem:[#allocation2 + $0xe0] sm:$0xff] %vm443_vm14, %v1650_v18  ;;  %v4532_v32 = vld [vmem:[%s4786_s10] ss:$0 sm:$0xff] }
 0x227   :  { %992 = vadd.xlane.f32.xlu1 %v991_v46  ;;  %1811 = vst.msk [vmem:[#allocation2 + $0xe0] sm:$0xff] %vm516_vm12, %v1754_v38  ;;  %v1668_v9 = vpop.permute.xlu1 %1667 }
 0x228   :  { %v972_v17 = vmul.f32 %v4477_v1, %v954_v5  ;;  %1947 = vst.msk [vmem:[#allocation2 + $0xe0] sm:$0x7f] %vm607_vm15, %v1890_v7  ;;  %v4541_v5 = vld [vmem:[%s4787_s11] sm:$0xff] }
 0x229   :  { %1961 = vst.msk [vmem:[#allocation2 + $0xe7] sm:$0x1] %vm623_vm1, %v4815_v22  ;;  %v1772_v37 = vpop.permute.xlu0 %1771  ;;  %v2087_v51 = vld [vmem:[#allocation2 + $0xd0] sm:$0xff] }
 0x22a   :  { %1716 = vst.msk [vmem:[#allocation2 + $0x170] sm:$0xff] %vm443_vm14, %v1668_v9  ;;  %v994_v35 = vsel %vm343_vm6, %v972_v17, 0.0  ;;  %2338 = vmatmul.mubr.f32.gmra.mxu0 %v2087_v51 }
 0x22b   :  { %1820 = vst.msk [vmem:[#allocation2 + $0x170] sm:$0xff] %vm516_vm12, %v1772_v37  ;;  %995 = vadd.xlane.f32.xlu0 %v994_v35  ;;  %v1908_v15 = vpop.permute.xlu1 %1907  ;;  %2763 = vmatprep.mubr.msk.f32.mxu0 %vm343_vm6, %v2090_v61  ;;  %v2105_v40 = vld [vmem:[#allocation2 + $0x160] sm:$0xff]  ;;  %vm2681_vm12 = vcmask 7168  }
 0x22c   :  { %1964 = vst.msk [vmem:[#allocation2 + $0x177] sm:$0x1] %vm623_vm1, %v4815_v22  ;;  %2383 = vmatmul.mubr.f32.gmra.mxu1 %v2105_v40 }
 0x22d   :  { %1956 = vst.msk [vmem:[#allocation2 + $0x170] sm:$0x7f] %vm607_vm15, %v1908_v15  ;;  %2772 = vmatprep.mubr.msk.f32.mxu1 %vm343_vm6, %v2108_v43 }
 0x22e   :  { %v892_v50 = vpop.f32.mrf.mxu1 }
 0x22f   :  { %v893_v19 = vadd.f32 %v4455_v20, %v892_v50 }
 0x230   :  { %v894_v28 = vpop.f32.mrf.mxu1  ;;  %v2089_v22 = vld [vmem:[#allocation2 + $0xe0] sm:$0xff] }
 0x231   :  { %v955_v13 = vmax.f32 %v893_v19, 0.0  ;;  %2343 = vmatmul.mubr.f32.gmra.mxu0 %v2089_v22  ;;  %v4552_v28 = vld [vmem:[%s4787_s11 + $0x8] sm:$0xff] }
 0x232   :  { %v897_v63 = vpop.f32.mrf.mxu1 }
 0x233   :  { %v973_v56 = vmul.f32 %v4464_v57, %v955_v13  ;;  %v898_v33 = vadd.f32 %v4455_v20, %v897_v63 }
 0x234   :  { %v899_v26 = vpop.f32.mrf.mxu1  ;;  %v2107_v3 = vld [vmem:[#allocation2 + $0x170] sm:$0xff] }
 0x235   :  { %v956_v11 = vmax.f32 %v898_v33, 0.0  ;;  %v997_v58 = vsel %vm343_vm6, %v973_v56, 0.0  ;;  %2388 = vmatmul.mubr.f32.gmra.mxu1 %v2107_v3 }
 0x236   :  { %998 = vadd.xlane.f32.xlu1 %v997_v58  ;;  %v4561_v58 = vld [vmem:[%s4787_s11 + $0x10] sm:$0xff] }
 0x237   :  { %v974_v54 = vmul.f32 %v4477_v1, %v956_v11 }
 0x239   :  { %v1000_v48 = vsel %vm343_vm6, %v974_v54, 0.0 }
 0x23a   :  { %v902_v24 = vpop.f32.mrf.mxu1  ;;  %1001 = vadd.xlane.f32.xlu0 %v1000_v48 }
 0x23b   :  { %v903_v42 = vadd.f32 %v4455_v20, %v902_v24 }
 0x23c   :  { %v904_v16 = vpop.f32.mrf.mxu1 }
 0x23d   :  { %v957_v62 = vmax.f32 %v903_v42, 0.0 }
 0x23e   :  { %v907_v45 = vpop.f32.mrf.mxu1 }
 0x23f   :  { %v975_v53 = vmul.f32 %v4464_v57, %v957_v62  ;;  %v908_v6 = vadd.f32 %v4455_v20, %v907_v45 }
 0x240   :  { %v909_v30 = vpop.f32.mrf.mxu1 }
 0x241   :  { %v958_v21 = vmax.f32 %v908_v6, 0.0  ;;  %v1003_v59 = vsel %vm343_vm6, %v975_v53, 0.0 }
 0x242   :  { %1004 = vadd.xlane.f32.xlu0 %v1003_v59 }
 0x243   :  { %v976_v4 = vmul.f32 %v4477_v1, %v958_v21 }
 0x245   :  { %v1006_v0 = vsel %vm343_vm6, %v976_v4, 0.0 }
 0x246   :  { %1007 = vadd.xlane.f32.xlu1 %v1006_v0 }
 0x249   :  { %v912_v29 = vpop.f32.mrf.mxu1 }
 0x24a   :  { %v913_v39 = vadd.f32 %v4455_v20, %v912_v29 }
 0x24b   :  { %v914_v38 = vpop.f32.mrf.mxu1 }
 0x24c   :  { %v959_v23 = vmax.f32 %v913_v39, 0.0 }
 0x24d   :  { %v917_v10 = vpop.f32.mrf.mxu1 }
 0x24e   :  { %v977_v49 = vmul.f32 %v4464_v57, %v959_v23  ;;  %v918_v52 = vadd.f32 %v4455_v20, %v917_v10 }
 0x24f   :  { %v919_v2 = vpop.f32.mrf.mxu1 }
 0x250   :  { %v1009_v7 = vsel %vm343_vm6, %v977_v49, 0.0  ;;  %v960_v17 = vmax.f32 %v918_v52, 0.0 }
 0x251   :  { %1010 = vadd.xlane.f32.xlu1 %v1009_v7 }
 0x252   :  { %v978_v35 = vmul.f32 %v4477_v1, %v960_v17 }
 0x254   :  { %v1012_v56 = vsel %vm343_vm6, %v978_v35, 0.0 }
 0x256   :  { %v922_v44 = vpop.f32.mrf.mxu1 }
 0x257   :  { %v923_v9 = vadd.f32 %v4455_v20, %v922_v44 }
 0x258   :  { %v924_v12 = vpop.f32.mrf.mxu1 }
 0x259   :  { %v961_v50 = vmax.f32 %v923_v9, 0.0 }
 0x25a   :  { %v927_v36 = vpop.f32.mrf.mxu1 }
 0x25b   :  { %v928_v40 = vadd.f32 %v4455_v20, %v927_v36  ;;  %v979_v13 = vmul.f32 %v4464_v57, %v961_v50 }
 0x25c   :  { %v929_v55 = vpop.f32.mrf.mxu1 }
 0x25d   :  { %v962_v11 = vmax.f32 %v928_v40, 0.0  ;;  %v1015_v42 = vsel %vm343_vm6, %v979_v13, 0.0 }
 0x25f   :  { %v980_v62 = vmul.f32 %v4477_v1, %v962_v11 }
 0x261   :  { %v1018_v0 = vsel %vm343_vm6, %v980_v62, 0.0 }
 0x264   :  { %v932_v27 = vpop.f32.mrf.mxu1 }
 0x265   :  { %v933_v3 = vadd.f32 %v4455_v20, %v932_v27 }
 0x266   :  { %v934_v41 = vpop.f32.mrf.mxu1 }
 0x267   :  { %v963_v45 = vmax.f32 %v933_v3, 0.0 }
 0x268   :  { %v937_v25 = vpop.f32.mrf.mxu1 }
 0x269   :  { %v981_v59 = vmul.f32 %v4464_v57, %v963_v45  ;;  %v938_v10 = vadd.f32 %v4455_v20, %v937_v25 }
 0x26a   :  { %v939_v34 = vpop.f32.mrf.mxu1 }
 0x26b   :  { %v1021_v2 = vsel %vm343_vm6, %v981_v59, 0.0  ;;  %v964_v27 = vmax.f32 %v938_v10, 0.0 }
 0x272   :  { %v4527_v31 = vpop.f32.mrf.mxu1 }
 0x273   :  { %v943_v41 = vadd.f32 %v4455_v20, %v4527_v31 }
 0x274   :  { %v944_v60 = vpop.f32.mrf.mxu1  ;;  %v2274_v47 = vpop.f32.mrf.mxu0 }
 0x275   :  { %v2275_v8 = vadd.f32 %v4532_v32, %v2274_v47  ;;  %v965_v17 = vmax.f32 %v943_v41, 0.0 }
 0x276   :  { %v4535_v14 = vpop.f32.mrf.mxu1  ;;  %v2276_v46 = vpop.f32.mrf.mxu0 }
 0x277   :  { %v2393_v37 = vmax.f32 %v2275_v8, 0.0  ;;  %v982_v46 = vmul.f32 %v4477_v1, %v964_v27  ;;  %v983_v35 = vmul.f32 %v4464_v57, %v965_v17 }
 0x278   :  { %v949_v18 = vpop.f32.mrf.mxu1 }
 0x279   :  { %v2420_v51 = vmul.f32 %v4541_v5, %v2393_v37  ;;  %v1049_v18 = vlaneseq  ;;  %v1027_v40 = vsel %vm343_vm6, %v983_v35, 0.0 }
 0x27b   :  { %v2444_v61 = vsel %vm343_vm6, %v2420_v51, 0.0  ;;  %v4587_v51 = vand.u32 127, %v1049_v18 }
 0x27c   :  { %2445 = vadd.xlane.f32.xlu0 %v2444_v61  ;;  %v1024_v61 = vsel %vm343_vm6, %v982_v46, 0.0 }
 0x27f   :  { %v2279_v19 = vpop.f32.mrf.mxu0 }
 0x280   :  { %v2280_v15 = vadd.f32 %v4532_v32, %v2279_v19  ;;  %1013 = vadd.xlane.f32.xlu0 %v1012_v56  ;;  %v4592_v19 = vshrl.u32 %v1049_v18, 7 }
 0x281   :  { %v2281_v43 = vpop.f32.mrf.mxu0 }
 0x282   :  { %v2394_v63 = vmax.f32 %v2280_v15, 0.0  ;;  %v1055_v15 = vadd.s32 4294967288, %v4587_v51  ;;  %v4598_v43 = vsub.s32 %v4587_v51, %v4592_v19 }
 0x283   :  { %v2284_v33 = vpop.f32.mrf.mxu0 }
 0x284   :  { %v2421_v22 = vmul.f32 %v4552_v28, %v2394_v63  ;;  %v2285_v26 = vadd.f32 %v4532_v32, %v2284_v33  ;;  %1016 = vadd.xlane.f32.xlu0 %v1015_v42  ;;  %v4601_v13 = vsub.s32 %v1055_v15, %v4592_v19 }
 0x285   :  { %v2286_v54 = vpop.f32.mrf.mxu0 }
 0x286   :  { %v2395_v48 = vmax.f32 %v2285_v26, 0.0  ;;  %v2447_v24 = vsel %vm343_vm6, %v2421_v22, 0.0 }
 0x287   :  { %2448 = vadd.xlane.f32.xlu1 %v2447_v24 }
 0x288   :  { %v2422_v16 = vmul.f32 %v4561_v58, %v2395_v48  ;;  %v2289_v6 = vpop.f32.mrf.mxu0 }
 0x289   :  { %v2290_v30 = vadd.f32 %v4532_v32, %v2289_v6 }
 0x28a   :  { %v2450_v53 = vsel %vm343_vm6, %v2422_v16, 0.0  ;;  %v2291_v21 = vpop.f32.mrf.mxu0 }
 0x28b   :  { %2451 = vadd.xlane.f32.xlu1 %v2450_v53  ;;  %v2396_v4 = vmax.f32 %v2290_v30, 0.0 }
 0x28d   :  { %v2423_v39 = vmul.f32 %v4541_v5, %v2396_v4 }
 0x28e   :  { %v2294_v29 = vpop.f32.mrf.mxu0 }
 0x28f   :  { %1019 = vadd.xlane.f32.xlu1 %v1018_v0  ;;  %v2295_v38 = vadd.f32 %v4532_v32, %v2294_v29  ;;  %v2453_v7 = vsel %vm343_vm6, %v2423_v39, 0.0 }
 0x290   :  { %v2296_v23 = vpop.f32.mrf.mxu0  ;;  %2454 = vadd.xlane.f32.xlu0 %v2453_v7 }
 0x291   :  { %v2397_v49 = vmax.f32 %v2295_v38, 0.0 }
 0x292   :  { %v2299_v44 = vpop.f32.mrf.mxu0 }
 0x293   :  { %1022 = vadd.xlane.f32.xlu1 %v1021_v2  ;;  %v2424_v12 = vmul.f32 %v4552_v28, %v2397_v49  ;;  %v2300_v36 = vadd.f32 %v4532_v32, %v2299_v44 }
 0x294   :  { %v2301_v55 = vpop.f32.mrf.mxu0 }
 0x295   :  { %v2398_v34 = vmax.f32 %v2300_v36, 0.0  ;;  %v2456_v25 = vsel %vm343_vm6, %v2424_v12, 0.0 }
 0x296   :  { %v2304_v60 = vpop.f32.mrf.mxu0  ;;  %2457 = vadd.xlane.f32.xlu0 %v2456_v25 }
 0x297   :  { %v2425_v52 = vmul.f32 %v4561_v58, %v2398_v34  ;;  %v2305_v47 = vadd.f32 %v4532_v32, %v2304_v60 }
 0x298   :  { %v2306_v8 = vpop.f32.mrf.mxu0 }
 0x299   :  { %v2399_v9 = vmax.f32 %v2305_v47, 0.0  ;;  %v2459_v37 = vsel %vm343_vm6, %v2425_v52, 0.0 }
 0x29a   :  { %2460 = vadd.xlane.f32.xlu0 %v2459_v37 }
 0x29b   :  { %v2426_v31 = vmul.f32 %v4541_v5, %v2399_v9 }
 0x29d   :  { %v2462_v50 = vsel %vm343_vm6, %v2426_v31, 0.0 }
 0x29e   :  { %2463 = vadd.xlane.f32.xlu1 %v2462_v50  ;;  %1025 = vadd.xlane.f32.xlu0 %v1024_v61 }
 0x29f   :  { %v987_v57 = vpop.xlane.xlu1 %986 }
 0x2a0   :  { %v1054_v56 = vrot.slane %v987_v57, %v4598_v43 }
 0x2a2   :  { %1028 = vadd.xlane.f32.xlu0 %v1027_v40 }
 0x2a3   :  { %v990_v63 = vpop.xlane.xlu0 %989 }
 0x2a4   :  { %v1059_v33 = vrot.slane %v990_v63, %v4601_v13 }
 0x2a6   :  { %v1061_v22 = vsel %vm1060_vm0, %v1059_v33, %v1054_v56 }
 0x2a8   :  { %v2349_v26 = vpop.f32.mrf.mxu1 }
 0x2a9   :  { %v2350_v54 = vadd.f32 %v4532_v32, %v2349_v26 }
 0x2aa   :  { %v2351_v11 = vpop.f32.mrf.mxu1 }
 0x2ab   :  { %v2408_v16 = vmax.f32 %v2350_v54, 0.0 }
 0x2ad   :  { %v2435_v29 = vmul.f32 %v4541_v5, %v2408_v16 }
 0x2ae   :  { %v2309_v3 = vpop.f32.mrf.mxu0 }
 0x2af   :  { %v2310_v48 = vadd.f32 %v4532_v32, %v2309_v3  ;;  %v2489_v55 = vsel %vm343_vm6, %v2435_v29, 0.0 }
 0x2b0   :  { %v2311_v24 = vpop.f32.mrf.mxu0  ;;  %v2354_v42 = vpop.f32.mrf.mxu1 }
 0x2b1   :  { %v2400_v62 = vmax.f32 %v2310_v48, 0.0  ;;  %v993_v45 = vpop.xlane.xlu1 %992  ;;  %v2355_v30 = vadd.f32 %v4532_v32, %v2354_v42 }
 0x2b2   :  { %v2356_v53 = vpop.f32.mrf.mxu1  ;;  %v1065_v59 = vrot.slane %v993_v45, %v4598_v43 }
 0x2b3   :  { %v2427_v6 = vmul.f32 %v4552_v28, %v2400_v62  ;;  %v2409_v2 = vmax.f32 %v2355_v30, 0.0 }
 0x2b4   :  { %v996_v21 = vpop.xlane.xlu0 %995  ;;  %v2314_v0 = vpop.f32.mrf.mxu0 }
 0x2b5   :  { %v1069_v4 = vrot.slane %v996_v21, %v4601_v13  ;;  %v2315_v39 = vadd.f32 %v4532_v32, %v2314_v0  ;;  %v2465_v38 = vsel %vm343_vm6, %v2427_v6, 0.0  ;;  %v2436_v27 = vmul.f32 %v4552_v28, %v2409_v2 }
 0x2b6   :  { %v2316_v10 = vpop.f32.mrf.mxu0  ;;  %2466 = vadd.xlane.f32.xlu0 %v2465_v38 }
 0x2b7   :  { %v1070_v23 = vsel %vm1060_vm0, %v1069_v4, %v1065_v59  ;;  %v2401_v44 = vmax.f32 %v2315_v39, 0.0  ;;  %v2492_v60 = vsel %vm343_vm6, %v2436_v27, 0.0 }
 0x2b8   :  { %v2359_v49 = vpop.f32.mrf.mxu1  ;;  %v1126_v7 = vsel %vm1125_vm2, %v1070_v23, %v1061_v22 }
 0x2b9   :  { %v2428_v36 = vmul.f32 %v4561_v58, %v2401_v44  ;;  %v2360_v8 = vadd.f32 %v4532_v32, %v2359_v49 }
 0x2ba   :  { %v2361_v12 = vpop.f32.mrf.mxu1  ;;  %2490 = vadd.xlane.f32.xlu0 %v2489_v55 }
 0x2bb   :  { %v2468_v41 = vsel %vm343_vm6, %v2428_v36, 0.0  ;;  %v2410_v35 = vmax.f32 %v2360_v8, 0.0 }
 0x2bc   :  { %2469 = vadd.xlane.f32.xlu1 %v2468_v41 }
 0x2bd   :  { %v2437_v40 = vmul.f32 %v4561_v58, %v2410_v35 }
 0x2bf   :  { %v999_v34 = vpop.xlane.xlu1 %998  ;;  %v2495_v42 = vsel %vm343_vm6, %v2437_v40, 0.0 }
 0x2c0   :  { %v1074_v52 = vrot.slane %v999_v34, %v4598_v43  ;;  %2493 = vadd.xlane.f32.xlu1 %v2492_v60  ;;  %v2319_v46 = vpop.f32.mrf.mxu0 }
 0x2c1   :  { %v2320_v9 = vadd.f32 %v4532_v32, %v2319_v46 }
 0x2c2   :  { %v2321_v37 = vpop.f32.mrf.mxu0 }
 0x2c3   :  { %v1002_v25 = vpop.xlane.xlu0 %1001  ;;  %v2402_v50 = vmax.f32 %v2320_v9, 0.0 }
 0x2c4   :  { %v1078_v47 = vrot.slane %v1002_v25, %v4601_v13  ;;  %v2364_v31 = vpop.f32.mrf.mxu1 }
 0x2c5   :  { %v2429_v15 = vmul.f32 %v4541_v5, %v2402_v50  ;;  %v2365_v57 = vadd.f32 %v4532_v32, %v2364_v31 }
 0x2c6   :  { %v1079_v18 = vsel %vm1060_vm0, %v1078_v47, %v1074_v52  ;;  %v2366_v61 = vpop.f32.mrf.mxu1 }
 0x2c7   :  { %v1128_v17 = vsel %vm1127_vm3, %v1079_v18, %v1126_v7  ;;  %v2471_v56 = vsel %vm343_vm6, %v2429_v15, 0.0  ;;  %v2411_v48 = vmax.f32 %v2365_v57, 0.0 }
 0x2c8   :  { %2472 = vadd.xlane.f32.xlu0 %v2471_v56 }
 0x2c9   :  { %v2438_v6 = vmul.f32 %v4541_v5, %v2411_v48 }
 0x2ca   :  { %v2324_v33 = vpop.f32.mrf.mxu0 }
 0x2cb   :  { %v1005_v63 = vpop.xlane.xlu0 %1004  ;;  %v2325_v22 = vadd.f32 %v4532_v32, %v2324_v33  ;;  %v2498_v29 = vsel %vm343_vm6, %v2438_v6, 0.0 }
 0x2cc   :  { %v1083_v11 = vrot.slane %v1005_v63, %v4598_v43  ;;  %v2326_v3 = vpop.f32.mrf.mxu0  ;;  %2496 = vadd.xlane.f32.xlu0 %v2495_v42 }
 0x2cd   :  { %v2403_v24 = vmax.f32 %v2325_v22, 0.0 }
 0x2cf   :  { %v1008_v26 = vpop.xlane.xlu1 %1007  ;;  %v2430_v62 = vmul.f32 %v4552_v28, %v2403_v24 }
 0x2d0   :  { %v1087_v54 = vrot.slane %v1008_v26, %v4601_v13 }
 0x2d1   :  { %v2329_v53 = vpop.f32.mrf.mxu0  ;;  %v2474_v21 = vsel %vm343_vm6, %v2430_v62, 0.0 }
 0x2d2   :  { %v1088_v16 = vsel %vm1060_vm0, %v1087_v54, %v1083_v11  ;;  %v2330_v30 = vadd.f32 %v4532_v32, %v2329_v53  ;;  %2475 = vadd.xlane.f32.xlu1 %v2474_v21  ;;  %v948_v11 = vadd.f32 %v4455_v20, %v4535_v14 }
 0x2d3   :  { %v4639_v45 = vsel %vm1129_vm4, %v1088_v16, %v1128_v17  ;;  %v2331_v59 = vpop.f32.mrf.mxu0 }
 0x2d4   :  { %v2404_v4 = vmax.f32 %v2330_v30, 0.0 }
 0x2d6   :  { %v2431_v0 = vmul.f32 %v4561_v58, %v2404_v4  ;;  %2499 = vadd.xlane.f32.xlu1 %v2498_v29 }
 0x2d8   :  { %v2477_v39 = vsel %vm343_vm6, %v2431_v0, 0.0  ;;  %v2369_v38 = vpop.f32.mrf.mxu1 }
 0x2d9   :  { %2478 = vadd.xlane.f32.xlu0 %v2477_v39  ;;  %v2370_v23 = vadd.f32 %v4532_v32, %v2369_v38 }
 0x2da   :  { %v2334_v10 = vpop.f32.mrf.mxu0  ;;  %v2371_v49 = vpop.f32.mrf.mxu1 }
 0x2db   :  { %v2412_v2 = vmax.f32 %v2370_v23, 0.0  ;;  %v2335_v7 = vadd.f32 %v4532_v32, %v2334_v10  ;;  %v4679_v39 = vpop.xlane.xlu1 %1010 }
 0x2dc   :  { %v2336_v44 = vpop.f32.mrf.mxu0 }
 0x2dd   :  { %v2439_v12 = vmul.f32 %v4552_v28, %v2412_v2  ;;  %v2405_v36 = vmax.f32 %v2335_v7, 0.0 }
 0x2df   :  { %v2374_v55 = vpop.f32.mrf.mxu1  ;;  %v2432_v27 = vmul.f32 %v4541_v5, %v2405_v36  ;;  %v2501_v34 = vsel %vm343_vm6, %v2439_v12, 0.0 }
 0x2e0   :  { %v2375_v41 = vadd.f32 %v4532_v32, %v2374_v55  ;;  %2502 = vadd.xlane.f32.xlu0 %v2501_v34 }
 0x2e1   :  { %v2376_v25 = vpop.f32.mrf.mxu1  ;;  %v2480_v52 = vsel %vm343_vm6, %v2432_v27, 0.0 }
 0x2e2   :  { %v2413_v60 = vmax.f32 %v2375_v41, 0.0  ;;  %2481 = vadd.xlane.f32.xlu1 %v2480_v52 }
 0x2e4   :  { %v2440_v47 = vmul.f32 %v4561_v58, %v2413_v60  ;;  %v2379_v8 = vpop.f32.mrf.mxu1 }
 0x2e5   :  { %v2380_v17 = vadd.f32 %v4532_v32, %v2379_v8 }
 0x2e6   :  { %v2504_v18 = vsel %vm343_vm6, %v2440_v47, 0.0  ;;  %v2381_v46 = vpop.f32.mrf.mxu1  ;;  %v2549_v47 = vadd.s32 4294967280, %v4587_v51 }
 0x2e7   :  { %2505 = vadd.xlane.f32.xlu1 %v2504_v18  ;;  %v2414_v50 = vmax.f32 %v2380_v17, 0.0 }
 0x2e8   :  { %v4695_v46 = vsub.s32 %v2549_v47, %v4592_v19 }
 0x2e9   :  { %v2441_v56 = vmul.f32 %v4541_v5, %v2414_v50  ;;  %v966_v5 = vmax.f32 %v948_v11, 0.0 }
 0x2ea   :  { %v2339_v9 = vpop.f32.mrf.mxu0 }
 0x2eb   :  { %v2340_v37 = vadd.f32 %v4532_v32, %v2339_v9  ;;  %v2507_v16 = vsel %vm343_vm6, %v2441_v56, 0.0  ;;  %v984_v14 = vmul.f32 %v4477_v1, %v966_v5 }
 0x2ec   :  { %v2341_v31 = vpop.f32.mrf.mxu0  ;;  %v2384_v35 = vpop.f32.mrf.mxu1 }
 0x2ed   :  { %v2406_v61 = vmax.f32 %v2340_v37, 0.0  ;;  %v2385_v57 = vadd.f32 %v4532_v32, %v2384_v35 }
 0x2ee   :  { %v2386_v15 = vpop.f32.mrf.mxu1 }
 0x2ef   :  { %v2433_v40 = vmul.f32 %v4552_v28, %v2406_v61  ;;  %v2415_v54 = vmax.f32 %v2385_v57, 0.0 }
 0x2f1   :  { %v2344_v63 = vpop.f32.mrf.mxu0  ;;  %v2483_v22 = vsel %vm343_vm6, %v2433_v40, 0.0  ;;  %v2442_v53 = vmul.f32 %v4552_v28, %v2415_v54 }
 0x2f2   :  { %v2345_v33 = vadd.f32 %v4532_v32, %v2344_v63  ;;  %2484 = vadd.xlane.f32.xlu0 %v2483_v22  ;;  %v1092_v63 = vrot.slane %v4679_v39, %v4598_v43 }
 0x2f3   :  { %v2346_v26 = vpop.f32.mrf.mxu0  ;;  %v2510_v21 = vsel %vm343_vm6, %v2442_v53, 0.0 }
 0x2f4   :  { %v2407_v3 = vmax.f32 %v2345_v33, 0.0 }
 0x2f5   :  { %v2389_v48 = vpop.f32.mrf.mxu1 }
 0x2f6   :  { %v2434_v24 = vmul.f32 %v4561_v58, %v2407_v3  ;;  %v2390_v42 = vadd.f32 %v4532_v32, %v2389_v48  ;;  %2508 = vadd.xlane.f32.xlu0 %v2507_v16  ;;  %v1030_v32 = vsel %vm343_vm6, %v984_v14, 0.0 }
 0x2f7   :  { %v2391_v62 = vpop.f32.mrf.mxu1 }
 0x2f8   :  { %v2416_v6 = vmax.f32 %v2390_v42, 0.0  ;;  %v2486_v30 = vsel %vm343_vm6, %v2434_v24, 0.0 }
 0x2f9   :  { %2487 = vadd.xlane.f32.xlu1 %v2486_v30 }
 0x2fa   :  { %v2443_v20 = vmul.f32 %v4561_v58, %v2416_v6 }
 0x2fc   :  { %v2513_v59 = vsel %vm343_vm6, %v2443_v20, 0.0  ;;  %vm1131_vm6 = vcmask 1044484  }
 0x2fd   :  { %2511 = vadd.xlane.f32.xlu1 %v2510_v21  ;;  %2514 = vadd.xlane.f32.xlu0 %v2513_v59 }
 0x301   :  { %1031 = vadd.xlane.f32.xlu1 %v1030_v32 }
 0x305   :  { %v2446_v4 = vpop.xlane.xlu0 %2445 }
 0x306   :  { %v2543_v56 = vrot.slane %v2446_v4, %v4598_v43 }
 0x309   :  { %v4675_v0 = vpop.xlane.xlu0 %1013 }
 0x30a   :  { %v1096_v26 = vrot.slane %v4675_v0, %v4601_v13 }
 0x30d   :  { %v4677_v28 = vpop.xlane.xlu0 %1016 }
 0x30e   :  { %v1101_v14 = vrot.slane %v4677_v28, %v4598_v43 }
 0x310   :  { %v2449_v58 = vpop.xlane.xlu1 %2448 }
 0x311   :  { %v2547_v35 = vrot.slane %v2449_v58, %v4601_v13 }
 0x313   :  { %v2548_v48 = vsel %vm1060_vm0, %v2547_v35, %v2543_v56 }
 0x314   :  { %v2452_v1 = vpop.xlane.xlu1 %2451 }
 0x315   :  { %v2553_v19 = vrot.slane %v2452_v1, %v4695_v46 }
 0x317   :  { %v2555_v62 = vsel %vm2554_vm5, %v2553_v19, %v2548_v48 }
 0x318   :  { %v4681_v10 = vpop.xlane.xlu1 %1019 }
 0x319   :  { %v2455_v29 = vpop.xlane.xlu0 %2454  ;;  %v1105_v4 = vrot.slane %v4681_v10, %v4601_v13 }
 0x31a   :  { %v2559_v50 = vrot.slane %v2455_v29, %v4598_v43 }
 0x31c   :  { %v4685_v2 = vpop.xlane.xlu1 %1022 }
 0x31f   :  { %v2458_v38 = vpop.xlane.xlu0 %2457 }
 0x320   :  { %v2563_v17 = vrot.slane %v2458_v38, %v4601_v13 }
 0x322   :  { %v2564_v33 = vsel %vm1060_vm0, %v2563_v17, %v2559_v50 }
 0x323   :  { %v2461_v23 = vpop.xlane.xlu0 %2460 }
 0x324   :  { %v2568_v9 = vrot.slane %v2461_v23, %v4695_v46 }
 0x326   :  { %v2569_v11 = vsel %vm2554_vm5, %v2568_v9, %v2564_v33 }
 0x327   :  { %v4683_v49 = vpop.xlane.xlu0 %1025  ;;  %v2464_v44 = vpop.xlane.xlu1 %2463  ;;  %v2654_v21 = vsel %vm1125_vm2, %v2569_v11, %v2555_v62 }
 0x328   :  { %v2573_v15 = vrot.slane %v2464_v44, %v4598_v43  ;;  %v1114_v23 = vrot.slane %v4683_v49, %v4601_v13  ;;  %v1110_v49 = vrot.slane %v4685_v2, %v4598_v43 }
 0x32a   :  { %v1115_v17 = vsel %vm1060_vm0, %v1114_v23, %v1110_v49 }
 0x32b   :  { %v4687_v7 = vpop.xlane.xlu0 %1028 }
 0x33f   :  { %v2467_v12 = vpop.xlane.xlu0 %2466 }
 0x340   :  { %v2577_v37 = vrot.slane %v2467_v12, %v4601_v13 }
 0x342   :  { %v2578_v54 = vsel %vm1060_vm0, %v2577_v37, %v2573_v15 }
 0x343   :  { %v2491_v55 = vpop.xlane.xlu0 %2490 }
 0x344   :  { %v2615_v59 = vrot.slane %v2491_v55, %v4598_v43 }
 0x345   :  { %v2470_v36 = vpop.xlane.xlu1 %2469 }
 0x346   :  { %v2582_v51 = vrot.slane %v2470_v36, %v4695_v46 }
 0x348   :  { %v2583_v24 = vsel %vm2554_vm5, %v2582_v51, %v2578_v54 }
 0x349   :  { %v2494_v27 = vpop.xlane.xlu1 %2493  ;;  %v2655_v0 = vsel %vm1127_vm3, %v2583_v24, %v2654_v21 }
 0x34a   :  { %v2619_v42 = vrot.slane %v2494_v27, %v4601_v13 }
 0x34c   :  { %v2620_v58 = vsel %vm1060_vm0, %v2619_v42, %v2615_v59 }
 0x351   :  { %v2473_v41 = vpop.xlane.xlu0 %2472 }
 0x352   :  { %v2587_v22 = vrot.slane %v2473_v41, %v4598_v43 }
 0x355   :  { %v2497_v25 = vpop.xlane.xlu0 %2496 }
 0x356   :  { %v2624_v5 = vrot.slane %v2497_v25, %v4695_v46 }
 0x358   :  { %v2625_v10 = vsel %vm2554_vm5, %v2624_v5, %v2620_v58 }
 0x35b   :  { %v2476_v34 = vpop.xlane.xlu1 %2475 }
 0x35c   :  { %v2591_v61 = vrot.slane %v2476_v34, %v4601_v13 }
 0x35e   :  { %v2592_v16 = vsel %vm1060_vm0, %v2591_v61, %v2587_v22 }
 0x35f   :  { %v4689_v60 = vpop.xlane.xlu1 %2499 }
 0x360   :  { %v2629_v44 = vrot.slane %v4689_v60, %v4598_v43  ;;  %v1106_v60 = vsel %vm1060_vm0, %v1105_v4, %v1101_v14 }
 0x362   :  { %v2479_v52 = vpop.xlane.xlu0 %2478 }
 0x363   :  { %v2596_v40 = vrot.slane %v2479_v52, %v4695_v46  ;;  %v1097_v52 = vsel %vm1060_vm0, %v1096_v26, %v1092_v63 }
 0x364   :  { %v1132_v2 = vsel %vm1131_vm6, %v1097_v52, %v4639_v45 }
 0x365   :  { %v2597_v53 = vsel %vm2554_vm5, %v2596_v40, %v2592_v16  ;;  %v1134_v61 = vsel %vm1133_vm7, %v1106_v60, %v1132_v2 }
 0x366   :  { %v2656_v28 = vsel %vm1129_vm4, %v2597_v53, %v2655_v0  ;;  %v1136_v15 = vsel %vm1135_vm8, %v1115_v17, %v1134_v61 }
 0x369   :  { %v4692_v8 = vpop.xlane.xlu0 %2502 }
 0x36a   :  { %v2633_v29 = vrot.slane %v4692_v8, %v4601_v13 }
 0x36b   :  { %v2482_v18 = vpop.xlane.xlu1 %2481 }
 0x36c   :  { %v2601_v6 = vrot.slane %v2482_v18, %v4598_v43  ;;  %v2634_v47 = vsel %vm1060_vm0, %v2633_v29, %v2629_v44 }
 0x370   :  { %v2506_v57 = vpop.xlane.xlu1 %2505 }
 0x371   :  { %v2638_v38 = vrot.slane %v2506_v57, %v4695_v46 }
 0x373   :  { %v2639_v8 = vsel %vm2554_vm5, %v2638_v38, %v2634_v47 }
 0x37b   :  { %v2485_v31 = vpop.xlane.xlu0 %2484 }
 0x37c   :  { %v2605_v3 = vrot.slane %v2485_v31, %v4601_v13  ;;  %v1119_v31 = vrot.slane %v4687_v7, %v4598_v43 }
 0x37e   :  { %v2606_v39 = vsel %vm1060_vm0, %v2605_v3, %v2601_v6 }
 0x37f   :  { %v2509_v30 = vpop.xlane.xlu0 %2508 }
 0x380   :  { %v2643_v27 = vrot.slane %v2509_v30, %v4598_v43  ;;  %v18_v43 = vstv %s4788_s12 }
 0x381   :  { %19 = vst [vmem:[#allocation3] sm:$0x1] %v18_v43 }
 0x382   :  { %v2488_v20 = vpop.xlane.xlu1 %2487 }
 0x383   :  { %v2610_v32 = vrot.slane %v2488_v20, %v4695_v46 }
 0x385   :  { %v2611_v1 = vsel %vm2554_vm5, %v2610_v32, %v2606_v39 }
 0x386   :  { %v2657_v12 = vsel %vm1131_vm6, %v2611_v1, %v2656_v28  ;;  %v2512_v36 = vpop.xlane.xlu1 %2511  ;;  %v2515_v55 = vpop.xlane.xlu0 %2514 }
 0x387   :  { %v2647_v41 = vrot.slane %v2512_v36, %v4601_v13  ;;  %v2652_v34 = vrot.slane %v2515_v55, %v4695_v46  ;;  %v2658_v25 = vsel %vm1133_vm7, %v2625_v10, %v2657_v12 }
 0x388   :  { %v2659_v37 = vsel %vm1135_vm8, %v2639_v8, %v2658_v25  ;;  %v2773_v45 = vld [vmem:[#allocation3] ss:$0 sm:$0xff] }
 0x389   :  { %v2648_v18 = vsel %vm1060_vm0, %v2647_v41, %v2643_v27 }
 0x38a   :  { %v1032_v46 = vpop.xlane.xlu1 %1031  ;;  %v2653_v9 = vsel %vm2554_vm5, %v2652_v34, %v2648_v18 }
 0x38b   :  { %v1123_v35 = vrot.slane %v1032_v46, %v4601_v13  ;;  %v2660_v50 = vsel %vm1137_vm9, %v2653_v9, %v2659_v37 }
 0x38c   :  { %v2663_v51 = vsel %vm2662_vm10, %v2660_v50, 0.0 }
 0x38d   :  { %2664 = vadd.xlane.f32.xlu0 %v2663_v51  ;;  %v1124_v19 = vsel %vm1060_vm0, %v1123_v35, %v1119_v31 }
 0x38e   :  { %v1138_v40 = vsel %vm1137_vm9, %v1124_v19, %v1136_v15 }
 0x38f   :  { %v1141_v57 = vsel %vm1140_vm11, %v1138_v40, 0.0 }
 0x390   :  { %1142 = vadd.xlane.f32.xlu1 %v1141_v57 }
 0x416   :  { %v2665_v13 = vpop.xlane.xlu0 %2664 }
 0x419   :  { %v1143_v7 = vpop.xlane.xlu1 %1142 }
 0x41a   :  { %v2666_v63 = vadd.f32 %v2665_v13, %v1143_v7 }
 0x41c   :  { %v2674_v56 = vadd.f32 %v2773_v45, %v2666_v63 }
 0x41e   :  { %v2675_v33 = vsub.f32 0.0, %v2674_v56 }
 0x420   :  { %v2676_v22 = vmul.f32 1.442695, %v2675_v33 }
 0x422   :  { %2924 = vpow2.f32 %v2676_v22 }
 0x42f   :  { %v2925_v26 = vpop.eup %2924 }
 0x430   :  { %v2678_v11 = vadd.f32 1.0, %v2925_v26 }
 0x432   :  { %2926 = vrcp.f32 %v2678_v11 }
 0x43f   :  { %v2927_v54 = vpop.eup %2926 }
 0x440   :  { %2682 = vst.msk [vmem:[%s4789_s13] sm:$0xff] %vm2681_vm12, %v2927_v54 }

</bundles_post_ra>
